<compile_context>
chip_gen: v7x
topology: tpu7x:2x2x1
jax: 0.10.0
libtpu: 0.0.40
codegen_flags: <defaults>
</compile_context>

<pallas_src>
import functools

import jax
import jax.numpy as jnp
from jax.experimental import pallas as pl
from jax.experimental.pallas import tpu as pltpu

_EPS = 1e-5


# ----------------------------------------------------------------------------
# Fused Pallas kernel
# ----------------------------------------------------------------------------
def _bottleneck_kernel(x_ref, w_red_ref, b_red_ref, w_conv_ref, b_conv_ref,
                       w_es_ref, b_es_ref, o_ref, pad_ref, col_ref,
                       *, stride, H, W, D, NB, has_sc):
    Ho = (H - 1) // stride + 1
    Wo = (W - 1) // stride + 1
    M_in = NB * H * W
    M_out = NB * Ho * Wo
    n_phase = 4 if stride == 2 else 1

    xb = x_ref[...]                                     # (NB, H*W, Cin)
    cin = xb.shape[-1]
    x2d = xb.reshape(M_in, cin).astype(jnp.bfloat16)    # no-op cast if already bf16

    # ---- conv_reduce (1x1) + BN bias + ReLU (BN scale folded into weight) --
    y1 = jnp.dot(x2d, w_red_ref[...], preferred_element_type=jnp.float32)
    y1 = jnp.maximum(y1 + b_red_ref[...], 0.0)          # (M_in, D) f32

    # ---- grouped 3x3 conv (stride, pad=1) + BN bias + ReLU, via im2col -----
    # Build the zero halo in registers and fill pad_ref with ONE aligned
    # full-buffer store per step: no memset, no unaligned sub-tile stores, and
    # no dependence on grid iteration order (safe with megacore "parallel").
    y5 = y1.reshape(NB, n_phase, Ho, Wo, D)
    zr = jnp.zeros((NB, n_phase, 1, Wo, D), jnp.float32)
    y5 = (jnp.concatenate([zr, y5], axis=2) if stride == 2
          else jnp.concatenate([zr, y5, zr], axis=2))
    ph_rows = y5.shape[2]
    zc = jnp.zeros((NB, n_phase, ph_rows, 1, D), jnp.float32)
    y5 = (jnp.concatenate([zc, y5], axis=3) if stride == 2
          else jnp.concatenate([zc, y5, zc], axis=3))
    pad_ref[...] = y5

    # Taps are contiguous windows of pad_ref (stride-2 uses phase-major rows,
    # so no strided access is ever needed).  Grouped + concatenated so stores
    # to the bf16 col land on 128-lane boundaries when D divides 128.
    def tap(k):
        kh, kw = divmod(k, 3)
        if stride == 1:
            return pad_ref[:, 0, kh:kh + Ho, kw:kw + Wo, :]
        rp, ro = ((1, 0), (0, 1), (1, 1))[kh]
        cp, co = ((1, 0), (0, 1), (1, 1))[kw]
        return pad_ref[:, 2 * rp + cp, ro:ro + Ho, co:co + Wo, :]

    g = (128 // D) if (128 % D == 0 and D <= 128) else 1
    for k0 in range(0, 9, g):
        ks = list(range(k0, min(k0 + g, 9)))
        parts = [tap(k).astype(jnp.bfloat16) for k in ks]
        blk = parts[0] if len(parts) == 1 else jnp.concatenate(parts, axis=-1)
        col_ref[:, :, :, k0 * D:(k0 + len(ks)) * D] = blk

    col = col_ref[...].reshape(M_out, 9 * D)            # bf16, K = 9*D
    y2 = jnp.dot(col, w_conv_ref[...], preferred_element_type=jnp.float32)
    y2 = jnp.maximum(y2 + b_conv_ref[...], 0.0).astype(jnp.bfloat16)

    # ---- conv_expand (1x1) + BN bias, fused with the shortcut --------------
    # stride=2: rows are phase-major, so x[:, ::2, ::2, :] is simply the first
    # Ho*Wo rows of every image — a contiguous slice.
    x_sc = xb if stride == 1 else xb[:, :Ho * Wo, :]
    x_sc = x_sc.reshape(M_out, cin)
    if has_sc:
        # One K = D + Cin matmul instead of two tiny ones (fewer MXU bubbles).
        op = jnp.concatenate([y2, x_sc.astype(jnp.bfloat16)], axis=-1)
        y3 = jnp.dot(op, w_es_ref[...],
                     preferred_element_type=jnp.float32) + b_es_ref[...]
    else:
        y3 = jnp.dot(y2, w_es_ref[...],
                     preferred_element_type=jnp.float32) + b_es_ref[...]
        # identity residual stays fp32 (input is fed as f32 in this case)
        y3 = y3 + x_sc.astype(jnp.float32)

    o_ref[...] = jnp.maximum(y3, 0.0).reshape(o_ref.shape).astype(o_ref.dtype)


# ----------------------------------------------------------------------------
# Step sizing helpers
# ----------------------------------------------------------------------------
def _vmem_step_bytes(nb, *, h, w, ho, wo, cin, d, cout, stride,
                     in_bytes, out_bytes):
    """Rough per-grid-step VMEM footprint (pipelined blocks + scratch + temps)."""
    n_phase = 4 if stride == 2 else 1
    ph, pw = (ho + 1, wo + 1) if stride == 2 else (h + 2, w + 2)
    m_in, m_out = nb * h * w, nb * ho * wo
    est = 2 * nb * h * w * cin * in_bytes              # double-buffered input block
    est += 2 * nb * ho * wo * cout * out_bytes         # double-buffered output block
    est += 2 * nb * n_phase * ph * pw * d * 4          # f32 padded scratch + value
    est += 2 * nb * ho * wo * 9 * d * 2                # bf16 im2col scratch + temps
    est += m_in * (cin * 2 + d * 4)                    # x2d / y1 temporaries
    est += m_out * (d * 4 + (d + cin) * 2 + cout * 4)  # y2 / concat / y3 temporaries
    return est


def _pick_images_per_step(n, m_img, step_bytes_fn, *, target_m=1024,
                          vmem_budget=24 << 20):
    """Smallest divisor of n that reaches M >= target_m, while keeping >= 2 grid
    steps (pipelining / megacore) and staying inside a VMEM budget."""
    best = 1
    for nb in range(1, n + 1):
        if n % nb:
            continue
        if n >= 2 and (n // nb) < 2:
            continue
        if step_bytes_fn(nb) > vmem_budget:
            continue
        best = nb
        if nb * m_img >= target_m:
            break
    return best


# ----------------------------------------------------------------------------
# Wrapper: layout plumbing + pallas_call
# ----------------------------------------------------------------------------
def resnext_bottleneck_forward(x_nchw, params, *, stride, images_per_step=None,
                               out_dtype=jnp.float32):
    """ResNeXtBottleneck forward.  x_nchw: (N, Cin, H, W) float32 -> NCHW out."""
    n, cin, h, w = x_nchw.shape
    d = params["w_reduce"].shape[1]
    cout = params["b_expand_sc"].shape[-1]
    has_sc = params["w_expand_sc"].shape[0] != d
    if has_sc:
        assert params["w_expand_sc"].shape[0] == d + cin
    if stride not in (1, 2):
        raise NotImplementedError("stride must be 1 or 2")
    if not has_sc and stride != 1:
        # The PyTorch reference fails with a shape mismatch here as well.
        raise ValueError("identity shortcut requires stride == 1")

    ho = (h - 1) // stride + 1
    wo = (w - 1) // stride + 1

    # Layout plumbing: ONE fused transpose NCHW -> channels-last (+ phase-major
    # space-to-depth for stride 2, so the kernel needs no strided access).
    # TODO(synk): in a fully channels-last / phase-major model these boundary
    # transposes disappear; kept here because the module contract is NCHW.
    in_dtype = jnp.bfloat16 if has_sc else jnp.float32  # f32 keeps identity exact
    if stride == 1:
        x2d = (jnp.transpose(x_nchw, (0, 2, 3, 1))
               .reshape(n, h * w, cin).astype(in_dtype))
    else:
        assert h % 2 == 0 and w % 2 == 0, "stride-2 path assumes even H, W"
        x2d = (x_nchw.reshape(n, cin, ho, 2, wo, 2)
               .transpose(0, 3, 5, 2, 4, 1)       # (n, ph_r, ph_c, ho, wo, cin)
               .reshape(n, h * w, cin).astype(in_dtype))

    step_bytes = functools.partial(
        _vmem_step_bytes, h=h, w=w, ho=ho, wo=wo, cin=cin, d=d, cout=cout,
        stride=stride, in_bytes=jnp.dtype(in_dtype).itemsize,
        out_bytes=jnp.dtype(out_dtype).itemsize)
    nb = images_per_step or _pick_images_per_step(n, h * w, step_bytes)
    assert n % nb == 0, (n, nb)

    kernel = functools.partial(_bottleneck_kernel, stride=stride, H=h, W=w,
                               D=d, NB=nb, has_sc=has_sc)

    weights = [params["w_reduce"], params["b_reduce"],
               params["w_conv"], params["b_conv"],
               params["w_expand_sc"], params["b_expand_sc"]]

    def _whole(a):  # whole-array block, loaded once (constant index_map)
        return pl.BlockSpec(a.shape, lambda i: (0,) * a.ndim)

    in_specs = ([pl.BlockSpec((nb, h * w, cin), lambda i: (i, 0, 0))]
                + [_whole(a) for a in weights])

    n_phase, ph, pw = ((4, ho + 1, wo + 1) if stride == 2
                       else (1, h + 2, w + 2))

    est = step_bytes(nb) + sum(a.size * a.dtype.itemsize for a in weights)
    compiler_kwargs = dict(dimension_semantics=("parallel",))
    if est > (12 << 20):  # above the smallest default scoped-VMEM limit (v5e)
        compiler_kwargs["vmem_limit_bytes"] = int(min(64 << 20, 2 * est))
    # TODO(synk): for large spatial configs (e.g. 56x56) add a spatial row-band
    # grid axis (with halo exchange) so v7x's 64 MiB VMEM keeps >=2 steps/core.

    flops = 2 * n * (h * w * cin * d + ho * wo * 9 * d * d
                     + ho * wo * (d + (cin if has_sc else 0)) * cout)
    bytes_accessed = (x2d.size * x2d.dtype.itemsize
                      + n * ho * wo * cout * jnp.dtype(out_dtype).itemsize
                      + sum(a.size * a.dtype.itemsize for a in weights))

    out = pl.pallas_call(
        kernel,
        out_shape=jax.ShapeDtypeStruct((n, ho * wo, cout), out_dtype),
        grid=(n // nb,),
        in_specs=in_specs,
        out_specs=pl.BlockSpec((nb, ho * wo, cout), lambda i: (i, 0, 0)),
        scratch_shapes=[
            pltpu.VMEM((nb, n_phase, ph, pw, d), jnp.float32),  # padded stage-1
            pltpu.VMEM((nb, ho, wo, 9 * d), jnp.bfloat16),      # im2col matrix
        ],
        compiler_params=pltpu.CompilerParams(**compiler_kwargs),
        cost_estimate=pl.CostEstimate(flops=flops, transcendentals=0,
                                      bytes_accessed=bytes_accessed),
    )(x2d, *weights)

    out = out.reshape(n, ho, wo, cout)
    return jnp.transpose(out, (0, 3, 1, 2))  # back to NCHW


# ----------------------------------------------------------------------------
# Parameter construction + pure-JAX reference
# ----------------------------------------------------------------------------
def _fold_bn(gamma, beta, mean, var):
    scale = gamma / jnp.sqrt(var + _EPS)
    return scale, beta - mean * scale


def init_params(key, in_channels, out_channels, d, cardinality):
    dg = d // cardinality
    ks = jax.random.split(key, 8)

    def w_init(k, shape, fan_in):
        return jax.random.normal(k, shape, jnp.float32) / jnp.sqrt(float(fan_in))

    def bn_init(k, c):
        k1, k2, k3, k4 = jax.random.split(k, 4)
        gamma = 1.0 + 0.1 * jax.random.normal(k1, (c,), jnp.float32)
        beta = 0.1 * jax.random.normal(k2, (c,), jnp.float32)
        mean = 0.1 * jax.random.normal(k3, (c,), jnp.float32)
        var = 0.5 + jax.random.uniform(k4, (c,), jnp.float32)
        return gamma, beta, mean, var

    w_reduce_oihw = w_init(ks[0], (d, in_channels, 1, 1), in_channels)
    w_conv_oihw = w_init(ks[1], (d, dg, 3, 3), dg * 9)
    w_expand_oihw = w_init(ks[2], (out_channels, d, 1, 1), d)
    bn_reduce = bn_init(ks[3], d)
    bn_mid = bn_init(ks[4], d)
    bn_expand = bn_init(ks[5], out_channels)

    s_red, b_red = _fold_bn(*bn_reduce)
    s_mid, b_mid = _fold_bn(*bn_mid)
    s_exp, b_exp = _fold_bn(*bn_expand)

    # Grouped 3x3 weight -> block-diagonal dense per-tap matrices, flattened to
    # a (9*D_in, D_out) im2col weight (K ordering = tap-major, din-minor).
    # NOTE: densification wastes cardinality-x FLOPs; acceptable while D is
    # small and the kernel is not MXU-bound — revisit for cardinality >= 16.
    w_dense = jnp.zeros((3, 3, d, d), jnp.float32)
    for g in range(cardinality):
        blk = w_conv_oihw[g * dg:(g + 1) * dg]            # (dg_out, dg_in, 3, 3)
        blk = jnp.transpose(blk, (2, 3, 1, 0))            # (3, 3, dg_in, dg_out)
        w_dense = w_dense.at[:, :, g * dg:(g + 1) * dg,
                             g * dg:(g + 1) * dg].set(blk)

    w_expand = jnp.transpose(w_expand_oihw[:, :, 0, 0]) * s_exp[None, :]  # (D, Cout)

    params = {
        "w_reduce": (jnp.transpose(w_reduce_oihw[:, :, 0, 0]) *
                     s_red[None, :]).astype(jnp.bfloat16),        # (Cin, D)
        "b_reduce": b_red[None, :],                               # (1, D) f32
        "w_conv": (w_dense * s_mid[None, None, None, :]
                   ).reshape(9 * d, d).astype(jnp.bfloat16),      # (9D, D)
        "b_conv": b_mid[None, :],
    }
    ref = {
        "w_reduce_oihw": w_reduce_oihw,
        "w_conv_oihw": w_conv_oihw,
        "w_expand_oihw": w_expand_oihw,
        "bn_reduce": bn_reduce,
        "bn_mid": bn_mid,
        "bn_expand": bn_expand,
        "w_sc_oihw": None,
        "bn_sc": None,
    }

    if in_channels != out_channels:
        w_sc_oihw = w_init(ks[6], (out_channels, in_channels, 1, 1), in_channels)
        bn_sc = bn_init(ks[7], out_channels)
        s_sc, b_sc = _fold_bn(*bn_sc)
        w_sc = jnp.transpose(w_sc_oihw[:, :, 0, 0]) * s_sc[None, :]  # (Cin, Cout)
        # conv_expand and the projection shortcut fused into one matmul:
        #   [y2 | x] @ [[w_expand], [w_shortcut]] + (b_expand + b_shortcut)
        params["w_expand_sc"] = jnp.concatenate([w_expand, w_sc],
                                                axis=0).astype(jnp.bfloat16)
        params["b_expand_sc"] = (b_exp + b_sc)[None, :]
        ref["w_sc_oihw"] = w_sc_oihw
        ref["bn_sc"] = bn_sc
    else:
        params["w_expand_sc"] = w_expand.astype(jnp.bfloat16)     # (D, Cout)
        params["b_expand_sc"] = b_exp[None, :]

    return params, ref


def ref_forward(x, p, stride, cardinality):
    def bn(y, stats):
        g, b, m, v = stats
        s = (g / jnp.sqrt(v + _EPS))[None, :, None, None]
        return (y - m[None, :, None, None]) * s + b[None, :, None, None]

    def conv(y, w, s, pad, groups=1):
        return jax.lax.conv_general_dilated(
            y, w, (s, s), [(pad, pad), (pad, pad)],
            dimension_numbers=("NCHW", "OIHW", "NCHW"),
            feature_group_count=groups,
            precision=jax.lax.Precision.HIGHEST)

    y = jax.nn.relu(bn(conv(x, p["w_reduce_oihw"], 1, 0), p["bn_reduce"]))
    y = jax.nn.relu(bn(conv(y, p["w_conv_oihw"], stride, 1, cardinality),
                       p["bn_mid"]))
    y = bn(conv(y, p["w_expand_oihw"], 1, 0), p["bn_expand"])
    if p["w_sc_oihw"] is not None:
        r = bn(conv(x, p["w_sc_oihw"], stride, 0), p["bn_sc"])
    else:
        r = x
    return jax.nn.relu(r + y)


# ----------------------------------------------------------------------------
if __name__ == "__main__":
    key = jax.random.PRNGKey(0)
    configs = [
        # (in_ch, out_ch, stride, cardinality, base_width, widen, N, H, W)
        (64, 128, 2, 4, 4, 1, 8, 16, 16),   # projection shortcut, stride 2
        (128, 128, 1, 4, 4, 1, 4, 8, 8),    # identity shortcut, stride 1
    ]
    for (cin, cout, stride, card, bw, widen, n, h, w) in configs:
        width_ratio = cout / (widen * 64.0)
        d = card * int(bw * width_ratio)
        key, kp, kx = jax.random.split(key, 3)
        params, ref_params = init_params(kp, cin, cout, d, card)
        x = jax.random.normal(kx, (n, cin, h, w), jnp.float32)  # NCHW

        fwd = jax.jit(functools.partial(resnext_bottleneck_forward,
                                        stride=stride))
        out = jax.block_until_ready(fwd(x, params))

        ref = jax.block_until_ready(ref_forward(x, ref_params, stride, card))
        assert out.shape == ref.shape, (out.shape, ref.shape)
        max_err = float(jnp.max(jnp.abs(out - ref)))
        # bf16 matmul operands, fp32 accumulation across 3 chained matmuls.
        assert max_err < 8e-2, \
            f"mismatch vs reference ({cin}->{cout}, s{stride}): {max_err}"

    print("KERNEL_OK")
</pallas_src>

<mosaic_0001>
module attributes {stable_mosaic.version = 11 : i64} {
  func.func @_bottleneck_kernel(%arg0: i32, %arg1: memref<4x256x64xbf16, #tpu.memory_space<vmem>>, %arg2: memref<64x32xbf16, #tpu.memory_space<vmem>>, %arg3: memref<1x32xf32, #tpu.memory_space<vmem>>, %arg4: memref<288x32xbf16, #tpu.memory_space<vmem>>, %arg5: memref<1x32xf32, #tpu.memory_space<vmem>>, %arg6: memref<96x128xbf16, #tpu.memory_space<vmem>>, %arg7: memref<1x128xf32, #tpu.memory_space<vmem>>, %arg8: memref<4x64x128xf32, #tpu.memory_space<vmem>>, %arg9: memref<4x4x9x9x32xf32, #tpu.memory_space<vmem>>, %arg10: memref<4x8x8x288xbf16, #tpu.memory_space<vmem>>) attributes {dimension_semantics = [#tpu.dimension_semantics<parallel>], iteration_bounds = array<i64: 2>, scalar_prefetch = 0 : i64, scratch_operands = 2 : i64, tpu.core_type = #tpu.core_type<tc>, window_params = [{transform_indices = @transform_0, window_bounds = array<i64: 4, 256, 64>}, {pipeline_mode = #tpu.pipeline_mode<synchronous>, transform_indices = @transform_1, window_bounds = array<i64: 64, 32>}, {pipeline_mode = #tpu.pipeline_mode<synchronous>, transform_indices = @transform_2, window_bounds = array<i64: 1, 32>}, {pipeline_mode = #tpu.pipeline_mode<synchronous>, transform_indices = @transform_3, window_bounds = array<i64: 288, 32>}, {pipeline_mode = #tpu.pipeline_mode<synchronous>, transform_indices = @transform_4, window_bounds = array<i64: 1, 32>}, {pipeline_mode = #tpu.pipeline_mode<synchronous>, transform_indices = @transform_5, window_bounds = array<i64: 96, 128>}, {pipeline_mode = #tpu.pipeline_mode<synchronous>, transform_indices = @transform_6, window_bounds = array<i64: 1, 128>}, {transform_indices = @transform_7, window_bounds = array<i64: 4, 64, 128>}]} {
    %c0 = arith.constant 0 : index
    %c0_0 = arith.constant 0 : index
    %c0_1 = arith.constant 0 : index
    %0 = vector.load %arg1[%c0, %c0_0, %c0_1] : memref<4x256x64xbf16, #tpu.memory_space<vmem>>, vector<4x256x64xbf16>
    %1 = vector.shape_cast %0 : vector<4x256x64xbf16> to vector<1024x64xbf16>
    %c0_2 = arith.constant 0 : index
    %c0_3 = arith.constant 0 : index
    %2 = vector.load %arg2[%c0_2, %c0_3] : memref<64x32xbf16, #tpu.memory_space<vmem>>, vector<64x32xbf16>
    %cst = arith.constant dense<0.000000e+00> : vector<1024x32xf32>
    %3 = tpu.matmul %1, %2, %cst {dimension_numbers = #tpu.dot_dimension_numbers<[1], [0], [0], [1], [0, 0, 1, 1], [], []>} : vector<1024x64xbf16>, vector<64x32xbf16>, vector<1024x32xf32> -> vector<1024x32xf32>
    %c0_4 = arith.constant 0 : index
    %c0_5 = arith.constant 0 : index
    %4 = vector.load %arg3[%c0_4, %c0_5] : memref<1x32xf32, #tpu.memory_space<vmem>>, vector<1x32xf32>
    %5 = vector.broadcast %4 : vector<1x32xf32> to vector<1024x32xf32>
    %6 = arith.addf %3, %5 : vector<1024x32xf32>
    %cst_6 = arith.constant 0.000000e+00 : f32
    %7 = vector.broadcast %cst_6 : f32 to vector<1024x32xf32>
    %8 = arith.maximumf %6, %7 : vector<1024x32xf32>
    %9 = vector.shape_cast %8 : vector<1024x32xf32> to vector<4x4x8x8x32xf32>
    %cst_7 = arith.constant 0.000000e+00 : f32
    %10 = vector.broadcast %cst_7 : f32 to vector<4x4x1x8x32xf32>
    %11 = tpu.concatenate %10, %9 in 2 : vector<4x4x1x8x32xf32>, vector<4x4x8x8x32xf32> -> vector<4x4x9x8x32xf32>
    %cst_8 = arith.constant 0.000000e+00 : f32
    %12 = vector.broadcast %cst_8 : f32 to vector<4x4x9x1x32xf32>
    %13 = tpu.concatenate %12, %11 in 3 : vector<4x4x9x1x32xf32>, vector<4x4x9x8x32xf32> -> vector<4x4x9x9x32xf32>
    %c0_9 = arith.constant 0 : index
    %c0_10 = arith.constant 0 : index
    %c0_11 = arith.constant 0 : index
    %c0_12 = arith.constant 0 : index
    %c0_13 = arith.constant 0 : index
    %14 = vector.load %arg9[%c0_9, %c0_10, %c0_11, %c0_12, %c0_13] : memref<4x4x9x9x32xf32, #tpu.memory_space<vmem>>, vector<4x4x9x9x32xf32>
    tpu.vector_store %arg9[%c0_9, %c0_10, %c0_11, %c0_12, %c0_13], %13 {strides = array<i32>} : memref<4x4x9x9x32xf32, #tpu.memory_space<vmem>>, vector<4x4x9x9x32xf32>,
    %c0_14 = arith.constant 0 : index
    %c3 = arith.constant 3 : index
    %c0_15 = arith.constant 0 : index
    %c0_16 = arith.constant 0 : index
    %c0_17 = arith.constant 0 : index
    %15 = vector.load %arg9[%c0_14, %c3, %c0_15, %c0_16, %c0_17] : memref<4x4x9x9x32xf32, #tpu.memory_space<vmem>>, vector<4x1x8x8x32xf32>
    %16 = vector.shape_cast %15 : vector<4x1x8x8x32xf32> to vector<4x8x8x32xf32>
    %17 = arith.truncf %16 : vector<4x8x8x32xf32> to vector<4x8x8x32xbf16>
    %c0_18 = arith.constant 0 : index
    %c2 = arith.constant 2 : index
    %c0_19 = arith.constant 0 : index
    %c1 = arith.constant 1 : index
    %c0_20 = arith.constant 0 : index
    %18 = vector.load %arg9[%c0_18, %c2, %c0_19, %c1, %c0_20] : memref<4x4x9x9x32xf32, #tpu.memory_space<vmem>>, vector<4x1x8x8x32xf32>
    %19 = vector.shape_cast %18 : vector<4x1x8x8x32xf32> to vector<4x8x8x32xf32>
    %20 = arith.truncf %19 : vector<4x8x8x32xf32> to vector<4x8x8x32xbf16>
    %c0_21 = arith.constant 0 : index
    %c3_22 = arith.constant 3 : index
    %c0_23 = arith.constant 0 : index
    %c1_24 = arith.constant 1 : index
    %c0_25 = arith.constant 0 : index
    %21 = vector.load %arg9[%c0_21, %c3_22, %c0_23, %c1_24, %c0_25] : memref<4x4x9x9x32xf32, #tpu.memory_space<vmem>>, vector<4x1x8x8x32xf32>
    %22 = vector.shape_cast %21 : vector<4x1x8x8x32xf32> to vector<4x8x8x32xf32>
    %23 = arith.truncf %22 : vector<4x8x8x32xf32> to vector<4x8x8x32xbf16>
    %c0_26 = arith.constant 0 : index
    %c1_27 = arith.constant 1 : index
    %c1_28 = arith.constant 1 : index
    %c0_29 = arith.constant 0 : index
    %c0_30 = arith.constant 0 : index
    %24 = vector.load %arg9[%c0_26, %c1_27, %c1_28, %c0_29, %c0_30] : memref<4x4x9x9x32xf32, #tpu.memory_space<vmem>>, vector<4x1x8x8x32xf32>
    %25 = vector.shape_cast %24 : vector<4x1x8x8x32xf32> to vector<4x8x8x32xf32>
    %26 = arith.truncf %25 : vector<4x8x8x32xf32> to vector<4x8x8x32xbf16>
    %27 = tpu.concatenate %17, %20, %23, %26 in 3 : vector<4x8x8x32xbf16>, vector<4x8x8x32xbf16>, vector<4x8x8x32xbf16>, vector<4x8x8x32xbf16> -> vector<4x8x8x128xbf16>
    %c0_31 = arith.constant 0 : index
    %c0_32 = arith.constant 0 : index
    %c0_33 = arith.constant 0 : index
    %c0_34 = arith.constant 0 : index
    %28 = vector.load %arg10[%c0_31, %c0_32, %c0_33, %c0_34] : memref<4x8x8x288xbf16, #tpu.memory_space<vmem>>, vector<4x8x8x128xbf16>
    tpu.vector_store %arg10[%c0_31, %c0_32, %c0_33, %c0_34], %27 {strides = array<i32>} : memref<4x8x8x288xbf16, #tpu.memory_space<vmem>>, vector<4x8x8x128xbf16>,
    %c0_35 = arith.constant 0 : index
    %c0_36 = arith.constant 0 : index
    %c1_37 = arith.constant 1 : index
    %c1_38 = arith.constant 1 : index
    %c0_39 = arith.constant 0 : index
    %29 = vector.load %arg9[%c0_35, %c0_36, %c1_37, %c1_38, %c0_39] : memref<4x4x9x9x32xf32, #tpu.memory_space<vmem>>, vector<4x1x8x8x32xf32>
    %30 = vector.shape_cast %29 : vector<4x1x8x8x32xf32> to vector<4x8x8x32xf32>
    %31 = arith.truncf %30 : vector<4x8x8x32xf32> to vector<4x8x8x32xbf16>
    %c0_40 = arith.constant 0 : index
    %c1_41 = arith.constant 1 : index
    %c1_42 = arith.constant 1 : index
    %c1_43 = arith.constant 1 : index
    %c0_44 = arith.constant 0 : index
    %32 = vector.load %arg9[%c0_40, %c1_41, %c1_42, %c1_43, %c0_44] : memref<4x4x9x9x32xf32, #tpu.memory_space<vmem>>, vector<4x1x8x8x32xf32>
    %33 = vector.shape_cast %32 : vector<4x1x8x8x32xf32> to vector<4x8x8x32xf32>
    %34 = arith.truncf %33 : vector<4x8x8x32xf32> to vector<4x8x8x32xbf16>
    %c0_45 = arith.constant 0 : index
    %c3_46 = arith.constant 3 : index
    %c1_47 = arith.constant 1 : index
    %c0_48 = arith.constant 0 : index
    %c0_49 = arith.constant 0 : index
    %35 = vector.load %arg9[%c0_45, %c3_46, %c1_47, %c0_48, %c0_49] : memref<4x4x9x9x32xf32, #tpu.memory_space<vmem>>, vector<4x1x8x8x32xf32>
    %36 = vector.shape_cast %35 : vector<4x1x8x8x32xf32> to vector<4x8x8x32xf32>
    %37 = arith.truncf %36 : vector<4x8x8x32xf32> to vector<4x8x8x32xbf16>
    %c0_50 = arith.constant 0 : index
    %c2_51 = arith.constant 2 : index
    %c1_52 = arith.constant 1 : index
    %c1_53 = arith.constant 1 : index
    %c0_54 = arith.constant 0 : index
    %38 = vector.load %arg9[%c0_50, %c2_51, %c1_52, %c1_53, %c0_54] : memref<4x4x9x9x32xf32, #tpu.memory_space<vmem>>, vector<4x1x8x8x32xf32>
    %39 = vector.shape_cast %38 : vector<4x1x8x8x32xf32> to vector<4x8x8x32xf32>
    %40 = arith.truncf %39 : vector<4x8x8x32xf32> to vector<4x8x8x32xbf16>
    %41 = tpu.concatenate %31, %34, %37, %40 in 3 : vector<4x8x8x32xbf16>, vector<4x8x8x32xbf16>, vector<4x8x8x32xbf16>, vector<4x8x8x32xbf16> -> vector<4x8x8x128xbf16>
    %c0_55 = arith.constant 0 : index
    %c0_56 = arith.constant 0 : index
    %c0_57 = arith.constant 0 : index
    %c128 = arith.constant 128 : index
    %42 = vector.load %arg10[%c0_55, %c0_56, %c0_57, %c128] : memref<4x8x8x288xbf16, #tpu.memory_space<vmem>>, vector<4x8x8x128xbf16>
    tpu.vector_store %arg10[%c0_55, %c0_56, %c0_57, %c128], %41 {strides = array<i32>} : memref<4x8x8x288xbf16, #tpu.memory_space<vmem>>, vector<4x8x8x128xbf16>,
    %c0_58 = arith.constant 0 : index
    %c3_59 = arith.constant 3 : index
    %c1_60 = arith.constant 1 : index
    %c1_61 = arith.constant 1 : index
    %c0_62 = arith.constant 0 : index
    %43 = vector.load %arg9[%c0_58, %c3_59, %c1_60, %c1_61, %c0_62] : memref<4x4x9x9x32xf32, #tpu.memory_space<vmem>>, vector<4x1x8x8x32xf32>
    %44 = vector.shape_cast %43 : vector<4x1x8x8x32xf32> to vector<4x8x8x32xf32>
    %45 = arith.truncf %44 : vector<4x8x8x32xf32> to vector<4x8x8x32xbf16>
    %c0_63 = arith.constant 0 : index
    %c0_64 = arith.constant 0 : index
    %c0_65 = arith.constant 0 : index
    %c256 = arith.constant 256 : index
    %46 = vector.load %arg10[%c0_63, %c0_64, %c0_65, %c256] : memref<4x8x8x288xbf16, #tpu.memory_space<vmem>>, vector<4x8x8x32xbf16>
    tpu.vector_store %arg10[%c0_63, %c0_64, %c0_65, %c256], %45 {strides = array<i32>} : memref<4x8x8x288xbf16, #tpu.memory_space<vmem>>, vector<4x8x8x32xbf16>,
    %c0_66 = arith.constant 0 : index
    %c0_67 = arith.constant 0 : index
    %c0_68 = arith.constant 0 : index
    %c0_69 = arith.constant 0 : index
    %47 = vector.load %arg10[%c0_66, %c0_67, %c0_68, %c0_69] : memref<4x8x8x288xbf16, #tpu.memory_space<vmem>>, vector<4x8x8x288xbf16>
    %48 = vector.shape_cast %47 : vector<4x8x8x288xbf16> to vector<256x288xbf16>
    %c0_70 = arith.constant 0 : index
    %c0_71 = arith.constant 0 : index
    %49 = vector.load %arg4[%c0_70, %c0_71] : memref<288x32xbf16, #tpu.memory_space<vmem>>, vector<288x32xbf16>
    %cst_72 = arith.constant dense<0.000000e+00> : vector<256x32xf32>
    %50 = tpu.matmul %48, %49, %cst_72 {dimension_numbers = #tpu.dot_dimension_numbers<[1], [0], [0], [1], [0, 0, 1, 1], [], []>} : vector<256x288xbf16>, vector<288x32xbf16>, vector<256x32xf32> -> vector<256x32xf32>
    %c0_73 = arith.constant 0 : index
    %c0_74 = arith.constant 0 : index
    %51 = vector.load %arg5[%c0_73, %c0_74] : memref<1x32xf32, #tpu.memory_space<vmem>>, vector<1x32xf32>
    %52 = vector.broadcast %51 : vector<1x32xf32> to vector<256x32xf32>
    %53 = arith.addf %50, %52 : vector<256x32xf32>
    %cst_75 = arith.constant 0.000000e+00 : f32
    %54 = vector.broadcast %cst_75 : f32 to vector<256x32xf32>
    %55 = arith.maximumf %53, %54 : vector<256x32xf32>
    %56 = arith.truncf %55 : vector<256x32xf32> to vector<256x32xbf16>
    %57 = vector.extract_strided_slice %0 {offsets = [0, 0, 0], sizes = [4, 64, 64], strides = [1, 1, 1]} : vector<4x256x64xbf16> to vector<4x64x64xbf16>
    %58 = vector.shape_cast %57 : vector<4x64x64xbf16> to vector<256x64xbf16>
    %59 = tpu.concatenate %56, %58 in 1 : vector<256x32xbf16>, vector<256x64xbf16> -> vector<256x96xbf16>
    %c0_76 = arith.constant 0 : index
    %c0_77 = arith.constant 0 : index
    %60 = vector.load %arg6[%c0_76, %c0_77] : memref<96x128xbf16, #tpu.memory_space<vmem>>, vector<96x128xbf16>
    %cst_78 = arith.constant dense<0.000000e+00> : vector<256x128xf32>
    %61 = tpu.matmul %59, %60, %cst_78 {dimension_numbers = #tpu.dot_dimension_numbers<[1], [0], [0], [1], [0, 0, 1, 1], [], []>} : vector<256x96xbf16>, vector<96x128xbf16>, vector<256x128xf32> -> vector<256x128xf32>
    %c0_79 = arith.constant 0 : index
    %c0_80 = arith.constant 0 : index
    %62 = vector.load %arg7[%c0_79, %c0_80] : memref<1x128xf32, #tpu.memory_space<vmem>>, vector<1x128xf32>
    %63 = vector.broadcast %62 : vector<1x128xf32> to vector<256x128xf32>
    %64 = arith.addf %61, %63 : vector<256x128xf32>
    %cst_81 = arith.constant 0.000000e+00 : f32
    %65 = vector.broadcast %cst_81 : f32 to vector<256x128xf32>
    %66 = arith.maximumf %64, %65 : vector<256x128xf32>
    %67 = vector.shape_cast %66 : vector<256x128xf32> to vector<4x64x128xf32>
    %c0_82 = arith.constant 0 : index
    %c0_83 = arith.constant 0 : index
    %c0_84 = arith.constant 0 : index
    %68 = vector.load %arg8[%c0_82, %c0_83, %c0_84] : memref<4x64x128xf32, #tpu.memory_space<vmem>>, vector<4x64x128xf32>
    tpu.vector_store %arg8[%c0_82, %c0_83, %c0_84], %67 {strides = array<i32>} : memref<4x64x128xf32, #tpu.memory_space<vmem>>, vector<4x64x128xf32>,
    return
  }
  func.func @transform_0(%arg0: i32) -> (i32, i32, i32) {
    %c0_i32 = arith.constant 0 : i32
    %c0_i32_0 = arith.constant 0 : i32
    %c0_i32_1 = arith.constant 0 : i32
    return %arg0, %c0_i32, %c0_i32_0 : i32, i32, i32
  }
  func.func @transform_1(%arg0: i32) -> (i32, i32) {
    %c0_i32 = arith.constant 0 : i32
    %c0_i32_0 = arith.constant 0 : i32
    %c0_i32_1 = arith.constant 0 : i32
    return %c0_i32, %c0_i32_0 : i32, i32
  }
  func.func @transform_2(%arg0: i32) -> (i32, i32) {
    %c0_i32 = arith.constant 0 : i32
    %c0_i32_0 = arith.constant 0 : i32
    %c0_i32_1 = arith.constant 0 : i32
    return %c0_i32, %c0_i32_0 : i32, i32
  }
  func.func @transform_3(%arg0: i32) -> (i32, i32) {
    %c0_i32 = arith.constant 0 : i32
    %c0_i32_0 = arith.constant 0 : i32
    %c0_i32_1 = arith.constant 0 : i32
    return %c0_i32, %c0_i32_0 : i32, i32
  }
  func.func @transform_4(%arg0: i32) -> (i32, i32) {
    %c0_i32 = arith.constant 0 : i32
    %c0_i32_0 = arith.constant 0 : i32
    %c0_i32_1 = arith.constant 0 : i32
    return %c0_i32, %c0_i32_0 : i32, i32
  }
  func.func @transform_5(%arg0: i32) -> (i32, i32) {
    %c0_i32 = arith.constant 0 : i32
    %c0_i32_0 = arith.constant 0 : i32
    %c0_i32_1 = arith.constant 0 : i32
    return %c0_i32, %c0_i32_0 : i32, i32
  }
  func.func @transform_6(%arg0: i32) -> (i32, i32) {
    %c0_i32 = arith.constant 0 : i32
    %c0_i32_0 = arith.constant 0 : i32
    %c0_i32_1 = arith.constant 0 : i32
    return %c0_i32, %c0_i32_0 : i32, i32
  }
  func.func @transform_7(%arg0: i32) -> (i32, i32, i32) {
    %c0_i32 = arith.constant 0 : i32
    %c0_i32_0 = arith.constant 0 : i32
    %c0_i32_1 = arith.constant 0 : i32
    return %arg0, %c0_i32, %c0_i32_0 : i32, i32, i32
  }
}

</mosaic_0001>

<bundles_post_ra>
// kernel: resnext_bottleneck_forward.1
= control target key start
LH: loop header
LB: loop body
LE: loop exit
PB: predicated region body
PF: predicated region fallthrough
CT: control target
= control target key end

     0   :  { %12 = vsyncpa [#allocation5], 0  ;;  %s8775_s0 = inlined_call_operand.vmem [shape: bf16[8,256,64], index: 0, kind: input, shape index: {}]   ;;  %s8776_s1 = inlined_call_operand.vmem [shape: bf16[64,32], index: 1, kind: input, shape index: {}]   ;;  %s8777_s2 = inlined_call_operand.vmem [shape: f32[1,32], index: 2, kind: input, shape index: {}]   ;;  %s8778_s3 = inlined_call_operand.vmem [shape: bf16[288,32], index: 3, kind: input, shape index: {}]   ;;  %s8779_s4 = inlined_call_operand.vmem [shape: f32[1,32], index: 4, kind: input, shape index: {}]   ;;  %s8780_s5 = inlined_call_operand.vmem [shape: bf16[96,128], index: 5, kind: input, shape index: {}]   ;;  %s8781_s6 = inlined_call_operand.vmem [shape: f32[1,128], index: 6, kind: input, shape index: {}]   ;;  %s8782_s7 = inlined_call_operand.hbm [shape: f32[8,64,128], index: 7, kind: output, shape index: {}]  }
   0x1   :  { %14 = vsyncpa [#allocation5 + $0x1], 0  ;;  %s6589_s24 = smov 0   ;;  %s6591_s25 = smov 0  }
   0x2   :  { %s6593_s26 = smov 0   ;;  %s6595_s27 = smov 0  }
   0x3 LB: > { %s6610_s28 = sadd.s32 4294967295, %s6540_s27   ;;  %s5554_s29 = sadd.s32 4294967294, %s6540_s27   ;;  %s6540_s27 = sphi %s6595_s27, %s8804_s27   ;;  %s6536_s26 = sphi %s6593_s26, %s8803_s26   ;;  %s6532_s25 = sphi %s6591_s25, %s8802_s25   ;;  %s6528_s24 = sphi %s6589_s24, %s8801_s24  }
   0x4   : > { %s6614_s30 = sadd.s32 1, %s6540_s27   ;;  %s179_s8 = sadd.s32 1, %s6536_s26 }
   0x5   : > { %s176_s9 = ssub.s32 %s6540_s27, %s6614_s30  ;;  %p189_p0 = scmp.ne.s32.totalorder %s6536_s26, %s6532_s25 }
   0x6   : > { %p177_p1 = scmp.eq.s32.totalorder %s176_s9, 0  ;;  %p190_p2 = scmp.eq.s32.totalorder %s6610_s28, 1 }
   0x7   : > { %p195_p3 = scmp.ne.s32.totalorder %s6532_s25, %s6528_s24  ;;  %p196_p4 = scmp.eq.s32.totalorder %s5554_s29, 1 }
   0x8   : > { %s6625_s10 = scalar_select %p177_p1, %s6536_s26, %s179_s8  }
   0x9   : > { %p6627_p5 = por %p190_p2, %p189_p0  ;;  %p6631_p6 = por %p196_p4, %p195_p3 }
   0xa   : > { %p5557_p7 = scmp.ge.s32.totalorder %s6540_s27, 1  ;;  %p242_p8 = scmp.lt.s32.totalorder %s6540_s27, 3 }
   0xc   : > { %p243_p9 = pnand %p5557_p7, %p242_p8 }
   0xe   : > { %246 = sbr.rel (%p243_p9) target bundleno = 1306 (0x51a), region = 48 }
  0x15   : > { %v6307_v0 = vld [vmem:[%s8776_s1] sm:$0xff]   ;;  %s5559_s15 = sshll.u32 %s6610_s28, 2  ;;  %v6308_v1 = vld [vmem:[%s8776_s1 + $0x8] sm:$0xff]   ;;  %v6309_v2 = vld [vmem:[%s8776_s1 + $0x10] sm:$0xff]   ;;  %vm771_vm0 = vcmask 523264   ;;  %v6542_v25 = vmov 0.0  }
  0x16   : > { %p276_p10 = scmp.lt.s32.totalorder %s5559_s15, 7  ;;  %6030 = vmatprep.subr.bf16.mxu0 %v6307_v0  ;;  %v6310_v4 = vld [vmem:[%s8776_s1 + $0x18] sm:$0xff]   ;;  %v1766_v26 = vrot.slane %v6542_v25, 7  ;;  %vm2024_vm1 = vcmask 1040384   ;;  %vm2154_vm2 = vcmask 261120   ;;  %vm2156_vm3 = vcmask 253952  }
  0x17   : > { %6031 = vmatpush3.bf16.msra.mxu0 %v6307_v0  ;;  %s6543_s9 = smov 32   ;;  %s6544_s13 = smov 64   ;;  %vm4179_vm4 = vcmask 257024   ;;  %vm3151_vm5 = vcmask 785408  }
  0x18   : > { %s8806_s15 = smov (!%p276_p10, %s5559_s15), 7  ;;  %6032 = vmatprep.subr.bf16.mxu0 %v6308_v1  ;;  %v2025_v27 = vsel %vm2024_vm1, 0.0, %v1766_v26  ;;  %2265 = vst.msk [vmem:[#allocation2 + $0x368] sm:$0x1] %vm2156_vm3, %v1766_v26  ;;  %2193 = vst.msk [vmem:[#allocation2 + $0x128] sm:$0x1] %vm2156_vm3, %v1766_v26 }
  0x19   : > { %s5807_s20 = sshll.u32 %s8806_s15, 7  ;;  %2264 = vst.msk [vmem:[#allocation2 + $0x360] sm:$0xff] %vm2154_vm2, %v2025_v27  ;;  %2192 = vst.msk [vmem:[#allocation2 + $0x120] sm:$0xff] %vm2154_vm2, %v2025_v27  ;;  %s6545_s16 = smov 96  }
  0x1a   : > { %s6650_s23 = scalar_lea.vmem %s8775_s0, %s5807_s20  ;;  %2210 = vst.msk [vmem:[#allocation2 + $0x1b0] sm:$0xff] %vm2154_vm2, %v2025_v27  ;;  %2282 = vst.msk [vmem:[#allocation2 + $0x3f0] sm:$0xff] %vm2154_vm2, %v2025_v27  ;;  %s5809_s18 = sshll.u32 %s6610_s28, 12 }
  0x1b   : > { %6033 = vmatpush3.bf16.msra.mxu0 %v6308_v1  ;;  %v6311_v3 = vld [vmem:[%s6650_s23] sm:$0xff]   ;;  %v6312_v5 = vld [vmem:[%s6650_s23 + $0x8] sm:$0xff]   ;;  %v6313_v6 = vld [vmem:[%s6650_s23 + $0x10] sm:$0xff]   ;;  %2211 = vst.msk [vmem:[#allocation2 + $0x1b8] sm:$0x1] %vm2156_vm3, %v1766_v26  ;;  %s8725_s22 = scalar_lea.hbm %s8782_s7, %s5809_s18  ;;  %s6546_s8 = smov [#allocation4]  }
  0x1c   : > { %6034 = vmatprep.subr.bf16.mxu0 %v6309_v2  ;;  %6038 = vmatprep.mubr.msk.bf16.mxu0 %vm771_vm0, %v6311_v3  ;;  %v6314_v7 = vld [vmem:[%s6650_s23 + $0x18] sm:$0xff]   ;;  %v6315_v8 = vld [vmem:[%s6650_s23 + $0x20] sm:$0xff]   ;;  %v6316_v9 = vld [vmem:[%s6650_s23 + $0x28] sm:$0xff]   ;;  %2283 = vst.msk [vmem:[#allocation2 + $0x3f8] sm:$0x1] %vm2156_vm3, %v1766_v26  ;;  %s6482_s14 = sshll.u32 %s6546_s8, 4  ;;  %s6483_s14 = int_to_ptr.vmem [resolvable:$false] %s6482_s14 }
  0x1d   : > { %v6317_v10 = vld [vmem:[%s6650_s23 + $0x30] sm:$0xff]   ;;  %v6318_v11 = vld [vmem:[%s6650_s23 + $0x38] sm:$0xff]   ;;  %v6319_v12 = vld [vmem:[%s6650_s23 + $0x40] sm:$0xff]   ;;  %2336 = vst.msk [vmem:[#allocation2 + $0x5a0] sm:$0xff] %vm2154_vm2, %v2025_v27  ;;  %s6484_s15 = scalar_lea.vmem %s6483_s14, 8192 }
  0x1e   : > { %v6320_v13 = vld [vmem:[%s6650_s23 + $0x48] sm:$0xff]   ;;  %v6321_v14 = vld [vmem:[%s6650_s23 + $0x50] sm:$0xff]   ;;  %v6322_v15 = vld [vmem:[%s6650_s23 + $0x58] sm:$0xff]   ;;  %2337 = vst.msk [vmem:[#allocation2 + $0x5a8] sm:$0x1] %vm2156_vm3, %v1766_v26 }
  0x1f   : > { %6035 = vmatpush3.bf16.msra.mxu0 %v6309_v2  ;;  %v6323_v16 = vld [vmem:[%s6650_s23 + $0x60] sm:$0xff]   ;;  %v6324_v17 = vld [vmem:[%s6650_s23 + $0x68] sm:$0xff]   ;;  %v6325_v18 = vld [vmem:[%s6650_s23 + $0x70] sm:$0xff]   ;;  %2354 = vst.msk [vmem:[#allocation2 + $0x630] sm:$0xff] %vm2154_vm2, %v2025_v27 }
  0x20   : > { %6036 = vmatprep.subr.bf16.mxu0 %v6310_v4  ;;  %v6326_v19 = vld [vmem:[%s6650_s23 + $0x78] sm:$0xff]   ;;  %v6327_v20 = vld [vmem:[%s6650_s23 + $0x80] sm:$0xff]   ;;  %v6328_v21 = vld [vmem:[%s6650_s23 + $0x88] sm:$0xff]   ;;  %2355 = vst.msk [vmem:[#allocation2 + $0x638] sm:$0x1] %vm2156_vm3, %v1766_v26 }
  0x21   : > { %v6329_v22 = vld [vmem:[%s6650_s23 + $0x90] sm:$0xff]   ;;  %v6330_v23 = vld [vmem:[%s6650_s23 + $0x98] sm:$0xff]   ;;  %v6331_v24 = vld [vmem:[%s6650_s23 + $0xa0] sm:$0xff]   ;;  %2408 = vst.msk [vmem:[#allocation2 + $0x7e0] sm:$0xff] %vm2154_vm2, %v2025_v27 }
  0x22   : > { %2409 = vst.msk [vmem:[#allocation2 + $0x7e8] sm:$0x1] %vm2156_vm3, %v1766_v26  ;;  %2427 = vst.msk [vmem:[#allocation2 + $0x878] sm:$0x1] %vm2156_vm3, %v1766_v26  ;;  %v6332_v28 = vld [vmem:[%s6650_s23 + $0xa8] sm:$0xff]   ;;  %v6333_v29 = vld [vmem:[%s6650_s23 + $0xb0] sm:$0xff]  }
  0x23   : > { %6037 = vmatpush3.bf16.msra.mxu0 %v6310_v4  ;;  %2426 = vst.msk [vmem:[#allocation2 + $0x870] sm:$0xff] %vm2154_vm2, %v2025_v27  ;;  %v2518_v30 = vld [vmem:[#allocation2 + $0x361] sm:$0xff]  ;;  %v6334_v32 = vld [vmem:[%s6650_s23 + $0xb8] sm:$0xff]   ;;  %v6337_v39 = vld [vmem:[%s6650_s23 + $0xd0] sm:$0xff]  }
  0x24   : > { %v2550_v31 = vpack.c.bf16 %v2518_v30, %v2518_v30  ;;  %v6335_v33 = vld [vmem:[%s6650_s23 + $0xc0] sm:$0xff]   ;;  %v2582_v34 = vld [vmem:[#allocation2 + $0x3f1] sm:$0xff]  ;;  %v6336_v38 = vld [vmem:[%s6650_s23 + $0xc8] sm:$0xff]  }
  0x25   : > { %v2614_v35 = vpack.c.bf16 %v2582_v34, %v2582_v34  ;;  %v2526_v36 = vld [vmem:[#allocation2 + $0x5a1] sm:$0xff]  ;;  %v6338_v44 = vld [vmem:[%s6650_s23 + $0xd8] sm:$0xff]   ;;  %v6341_v51 = vld [vmem:[%s6650_s23 + $0xf0] sm:$0xff]  }
  0x26   : > { %6039 = vmatmul.mubr.msk.bf16.vlgmr.msra.gmra.mrb[0].mxu0 %vm771_vm0, %v6312_v5  ;;  %2751 = vrot.lane.b32.xlu0 %v2550_v31, %s6543_s9  ;;  %v2558_v37 = vpack.c.bf16 %v2526_v36, %v2526_v36  ;;  %v6339_v45 = vld [vmem:[%s6650_s23 + $0xe0] sm:$0xff]   ;;  %v6340_v50 = vld [vmem:[%s6650_s23 + $0xe8] sm:$0xff]   ;;  %v2574_v52 = vld [vmem:[#allocation2 + $0x1b1] sm:$0xff] }
  0x27   : > { %6042 = vmatprep.mubr.msk.bf16.mxu0 %vm771_vm0, %v6313_v6  ;;  %v2590_v40 = vld [vmem:[#allocation2 + $0x631] sm:$0xff]  ;;  %v2510_v48 = vld [vmem:[#allocation2 + $0x121] sm:$0xff]  ;;  %v2606_v53 = vpack.c.bf16 %v2574_v52, %v2574_v52 }
  0x28   : > { %v2622_v41 = vpack.c.bf16 %v2590_v40, %v2590_v40  ;;  %v2542_v49 = vpack.c.bf16 %v2510_v48, %v2510_v48  ;;  %v6342_v54 = vld [vmem:[%s6650_s23 + $0xf8] sm:$0xff]   ;;  %v6343_v55 = vld [vmem:[%s6650_s23 + $0x100] sm:$0xff]   ;;  %v6344_v56 = vld [vmem:[%s6650_s23 + $0x108] sm:$0xff]  }
  0x29   : > { %v2534_v42 = vld [vmem:[#allocation2 + $0x7e1] sm:$0xff]  ;;  %v6345_v57 = vld [vmem:[%s6650_s23 + $0x110] sm:$0xff]   ;;  %v6346_v58 = vld [vmem:[%s6650_s23 + $0x118] sm:$0xff]  }
  0x2a   : > { %2847 = vrot.lane.b32.xlu0 %v2614_v35, %s6544_s13  ;;  %v2566_v43 = vpack.c.bf16 %v2534_v42, %v2534_v42  ;;  %v2598_v46 = vld [vmem:[#allocation2 + $0x871] sm:$0xff]  ;;  %v6347_v59 = vld [vmem:[%s6650_s23 + $0x120] sm:$0xff]   ;;  %v6348_v60 = vld [vmem:[%s6650_s23 + $0x128] sm:$0xff]  }
  0x2b   : > { %v2630_v47 = vpack.c.bf16 %v2598_v46, %v2598_v46  ;;  %v6349_v61 = vld [vmem:[%s6650_s23 + $0x130] sm:$0xff]   ;;  %v6350_v62 = vld [vmem:[%s6650_s23 + $0x138] sm:$0xff]   ;;  %v6351_v63 = vld [vmem:[%s6650_s23 + $0x140] sm:$0xff]  }
  0x2c   : > { %v6352_v0 = vld [vmem:[%s6650_s23 + $0x148] sm:$0xff]   ;;  %v6353_v1 = vld [vmem:[%s6650_s23 + $0x150] sm:$0xff]   ;;  %v6354_v2 = vld [vmem:[%s6650_s23 + $0x158] sm:$0xff]  }
  0x2d   : > { %v6355_v3 = vld [vmem:[%s6650_s23 + $0x160] sm:$0xff]   ;;  %v6356_v4 = vld [vmem:[%s6650_s23 + $0x168] sm:$0xff]   ;;  %v6357_v5 = vld [vmem:[%s6650_s23 + $0x170] sm:$0xff]  }
  0x2e   : > { %6043 = vmatmul.mubr.msk.bf16.gmra.mrb[4].mxu0 %vm771_vm0, %v6314_v7  ;;  %2767 = vrot.lane.b32.xlu0 %v2558_v37, %s6543_s9  ;;  %v6358_v6 = vld [vmem:[%s6650_s23 + $0x178] sm:$0xff]   ;;  %v6359_v7 = vld [vmem:[%s6650_s23 + $0x180] sm:$0xff]  }
  0x2f   : > { %6046 = vmatprep.mubr.msk.bf16.mxu0 %vm771_vm0, %v6315_v8  ;;  %v6360_v8 = vld [vmem:[%s6650_s23 + $0x188] sm:$0xff]  }
  0x32   : > { %2863 = vrot.lane.b32.xlu0 %v2622_v41, %s6544_s13 }
  0x36   : > { %6047 = vmatmul.mubr.msk.bf16.gmra.mrb[8].mxu0 %vm771_vm0, %v6316_v9  ;;  %2783 = vrot.lane.b32.xlu0 %v2566_v43, %s6543_s9  ;;  %v6361_v9 = vld [vmem:[%s6650_s23 + $0x190] sm:$0xff]  }
  0x37   : > { %6050 = vmatprep.mubr.msk.bf16.mxu0 %vm771_vm0, %v6317_v10  ;;  %v6362_v10 = vld [vmem:[%s6650_s23 + $0x198] sm:$0xff]   ;;  %v6369_v43 = vld [vmem:[%s6650_s23 + $0x1d0] sm:$0xff]  }
  0x3a   : > { %2879 = vrot.lane.b32.xlu0 %v2630_v47, %s6544_s13 }
  0x3e   : > { %6051 = vmatmul.mubr.msk.bf16.gmra.mrb[12].mxu0 %vm771_vm0, %v6318_v11  ;;  %2735 = vrot.lane.b32.xlu0 %v2542_v49, %s6543_s9  ;;  %v6363_v11 = vld [vmem:[%s6650_s23 + $0x1a0] sm:$0xff]  }
  0x3f   : > { %6054 = vmatprep.mubr.msk.bf16.mxu0 %vm771_vm0, %v6319_v12  ;;  %v6364_v12 = vld [vmem:[%s6650_s23 + $0x1a8] sm:$0xff]  }
  0x42   : > { %2831 = vrot.lane.b32.xlu0 %v2606_v53, %s6544_s13 }
  0x46   : > { %6055 = vmatmul.mubr.msk.bf16.gmra.mrb[16].mxu0 %vm771_vm0, %v6320_v13  ;;  %v6365_v13 = vld [vmem:[%s6650_s23 + $0x1b0] sm:$0xff]  }
  0x47   : > { %6058 = vmatprep.mubr.msk.bf16.mxu0 %vm771_vm0, %v6321_v14  ;;  %v6792_v14 = vld [vmem:[%s8777_s2] ss:$0 sm:$0xff] }
  0x4e   : > { %6059 = vmatmul.mubr.msk.bf16.gmra.mrb[20].mxu0 %vm771_vm0, %v6322_v15 }
  0x4f   : > { %6062 = vmatprep.mubr.msk.bf16.mxu0 %vm771_vm0, %v6323_v16 }
  0x56   : > { %6063 = vmatmul.mubr.msk.bf16.gmra.mrb[24].mxu0 %vm771_vm0, %v6324_v17 }
  0x57   : > { %6066 = vmatprep.mubr.msk.bf16.mxu0 %vm771_vm0, %v6325_v18  ;;  %v6366_v18 = vld [vmem:[%s6650_s23 + $0x1b8] sm:$0xff]  }
  0x5e   : > { %6067 = vmatmul.mubr.msk.bf16.gmra.mrb[28].mxu0 %vm771_vm0, %v6326_v19 }
  0x5f   : > { %6070 = vmatprep.mubr.msk.bf16.mxu0 %vm771_vm0, %v6327_v20 }
  0x66   : > { %6071 = vmatmul.mubr.msk.bf16.gmra.mrb[32].mxu0 %vm771_vm0, %v6328_v21  ;;  %v6367_v21 = vld [vmem:[%s6650_s23 + $0x1c0] sm:$0xff]  }
  0x67   : > { %6074 = vmatprep.mubr.msk.bf16.mxu0 %vm771_vm0, %v6329_v22 }
  0x6e   : > { %6075 = vmatmul.mubr.msk.bf16.gmra.mrb[36].mxu0 %vm771_vm0, %v6330_v23 }
  0x6f   : > { %6078 = vmatprep.mubr.msk.bf16.mxu0 %vm771_vm0, %v6331_v24 }
  0x76   : > { %6079 = vmatmul.mubr.msk.bf16.gmra.mrb[40].mxu0 %vm771_vm0, %v6332_v28 }
  0x77   : > { %6082 = vmatprep.mubr.msk.bf16.mxu0 %vm771_vm0, %v6333_v29 }
  0x7e   : > { %6083 = vmatmul.mubr.msk.bf16.gmra.mrb[44].mxu0 %vm771_vm0, %v6334_v32 }
  0x7f   : > { %6086 = vmatprep.mubr.msk.bf16.mxu0 %vm771_vm0, %v6335_v33 }
  0x86   : > { %6087 = vmatmul.mubr.msk.bf16.gmra.mrb[48].mxu0 %vm771_vm0, %v6336_v38 }
  0x87   : > { %6090 = vmatprep.mubr.msk.bf16.mxu0 %vm771_vm0, %v6337_v39  ;;  %v6368_v39 = vld [vmem:[%s6650_s23 + $0x1c8] sm:$0xff]  }
  0x8e   : > { %6091 = vmatmul.mubr.msk.bf16.gmra.mrb[52].mxu0 %vm771_vm0, %v6338_v44 }
  0x8f   : > { %6094 = vmatprep.mubr.msk.bf16.mxu0 %vm771_vm0, %v6339_v45 }
  0x96   : > { %6095 = vmatmul.mubr.msk.bf16.gmra.mrb[56].mxu0 %vm771_vm0, %v6340_v50 }
  0x97   : > { %6098 = vmatprep.mubr.msk.bf16.mxu0 %vm771_vm0, %v6341_v51 }
  0x9e   : > { %6099 = vmatmul.mubr.msk.bf16.gmra.mrb[60].mxu0 %vm771_vm0, %v6342_v54 }
  0x9f   : > { %6102 = vmatprep.mubr.msk.bf16.mxu0 %vm771_vm0, %v6343_v55 }
  0xa6   : > { %6103 = vmatmul.mubr.msk.bf16.gmra.mrb[64].mxu0 %vm771_vm0, %v6344_v56 }
  0xa7   : > { %6106 = vmatprep.mubr.msk.bf16.mxu0 %vm771_vm0, %v6345_v57 }
  0xae   : > { %6107 = vmatmul.mubr.msk.bf16.gmra.mrb[68].mxu0 %vm771_vm0, %v6346_v58 }
  0xaf   : > { %6110 = vmatprep.mubr.msk.bf16.mxu0 %vm771_vm0, %v6347_v59 }
  0xb6   : > { %6111 = vmatmul.mubr.msk.bf16.gmra.mrb[72].mxu0 %vm771_vm0, %v6348_v60 }
  0xb7   : > { %6114 = vmatprep.mubr.msk.bf16.mxu0 %vm771_vm0, %v6349_v61  ;;  %v6370_v61 = vld [vmem:[%s6650_s23 + $0x1d8] sm:$0xff]  }
  0xbe   : > { %6115 = vmatmul.mubr.msk.bf16.gmra.mrb[76].mxu0 %vm771_vm0, %v6350_v62 }
  0xbf   : > { %6118 = vmatprep.mubr.msk.bf16.mxu0 %vm771_vm0, %v6351_v63 }
  0xc6   : > { %6119 = vmatmul.mubr.msk.bf16.gmra.mrb[80].mxu0 %vm771_vm0, %v6352_v0 }
  0xc7   : > { %6122 = vmatprep.mubr.msk.bf16.mxu0 %vm771_vm0, %v6353_v1  ;;  %v6371_v1 = vld [vmem:[%s6650_s23 + $0x1e0] sm:$0xff]  }
  0xce   : > { %6123 = vmatmul.mubr.msk.bf16.gmra.mrb[84].mxu0 %vm771_vm0, %v6354_v2 }
  0xcf   : > { %6126 = vmatprep.mubr.msk.bf16.mxu0 %vm771_vm0, %v6355_v3 }
  0xd6   : > { %6127 = vmatmul.mubr.msk.bf16.gmra.mrb[88].mxu0 %vm771_vm0, %v6356_v4 }
  0xd7   : > { %6130 = vmatprep.mubr.msk.bf16.mxu0 %vm771_vm0, %v6357_v5 }
  0xde   : > { %6131 = vmatmul.mubr.msk.bf16.gmra.mrb[92].mxu0 %vm771_vm0, %v6358_v6 }
  0xdf   : > { %6134 = vmatprep.mubr.msk.bf16.mxu0 %vm771_vm0, %v6359_v7 }
  0xe6   : > { %6135 = vmatmul.mubr.msk.bf16.gmra.mrb[96].mxu0 %vm771_vm0, %v6360_v8 }
  0xe7   : > { %6138 = vmatprep.mubr.msk.bf16.mxu0 %vm771_vm0, %v6361_v9 }
  0xee   : > { %6139 = vmatmul.mubr.msk.bf16.gmra.mrb[100].mxu0 %vm771_vm0, %v6362_v10 }
  0xef   : > { %6142 = vmatprep.mubr.msk.bf16.mxu0 %vm771_vm0, %v6363_v11 }
  0xf6   : > { %6143 = vmatmul.mubr.msk.bf16.gmra.mrb[104].mxu0 %vm771_vm0, %v6364_v12 }
  0xf7   : > { %6146 = vmatprep.mubr.msk.bf16.mxu0 %vm771_vm0, %v6365_v13 }
  0xf9   : > { %v6040_v15 = vpop.f32.mrb[0].mxu0 }
  0xfa   : > { %v1007_v16 = vadd.f32 %v6040_v15, %v6792_v14  ;;  %v998_v17 = vpop.f32.mrb[1].mxu0 }
  0xfb   : > { %v999_v19 = vadd.f32 %v6792_v14, %v998_v17  ;;  %v6041_v20 = vpop.f32.mrb[2].mxu0 }
  0xfc   : > { %v1511_v22 = vmax.f32 %v1007_v16, 0.0  ;;  %v1010_v23 = vadd.f32 %v6041_v20, %v6792_v14  ;;  %v1001_v24 = vpop.f32.mrb[3].mxu0  ;;  %v6372_v20 = vld [vmem:[%s6650_s23 + $0x1e8] sm:$0xff]  }
  0xfd   : > { %v1509_v25 = vmax.f32 %v999_v19, 0.0  ;;  %v1002_v26 = vadd.f32 %v6792_v14, %v1001_v24  ;;  %v6373_v24 = vld [vmem:[%s6650_s23 + $0x1f0] sm:$0xff]  }
  0xfe   : > { %v1769_v27 = vrot.slane %v1511_v22, 7  ;;  %v1512_v28 = vmax.f32 %v1010_v23, 0.0  ;;  %6147 = vmatmul.mubr.msk.bf16.gmra.mrb[108].mxu0 %vm771_vm0, %v6366_v18 }
  0xff   : > { %v1767_v29 = vrot.slane %v1509_v25, 7  ;;  %v1510_v30 = vmax.f32 %v1002_v26, 0.0  ;;  %6150 = vmatprep.mubr.msk.bf16.mxu0 %vm771_vm0, %v6367_v21 }
 0x100   : > { %v2028_v31 = vsel %vm2024_vm1, 0.0, %v1769_v27  ;;  %2163 = vst.msk [vmem:[#allocation2 + $0x38] sm:$0x1] %vm2156_vm3, %v1769_v27  ;;  %v1770_v32 = vrot.slane %v1512_v28, 7 }
 0x101   : > { %2162 = vst.msk [vmem:[#allocation2 + $0x30] sm:$0xff] %vm2154_vm2, %v2028_v31  ;;  %v2026_v33 = vsel %vm2024_vm1, 0.0, %v1767_v29  ;;  %v1768_v34 = vrot.slane %v1510_v30, 7  ;;  %v6044_v35 = vpop.f32.mrb[4].mxu0 }
 0x102   : > { %2159 = vst.msk [vmem:[#allocation2 + $0x18] sm:$0x1] %vm2156_vm3, %v1767_v29  ;;  %v2029_v36 = vsel %vm2024_vm1, 0.0, %v1770_v32  ;;  %2165 = vst.msk [vmem:[#allocation2 + $0x48] sm:$0x1] %vm2156_vm3, %v1770_v32  ;;  %v1023_v37 = vadd.f32 %v6044_v35, %v6792_v14  ;;  %v1014_v38 = vpop.f32.mrb[5].mxu0 }
 0x103   : > { %2158 = vst.msk [vmem:[#allocation2 + $0x10] sm:$0xff] %vm2154_vm2, %v2026_v33  ;;  %2164 = vst.msk [vmem:[#allocation2 + $0x40] sm:$0xff] %vm2154_vm2, %v2029_v36  ;;  %v2027_v40 = vsel %vm2024_vm1, 0.0, %v1768_v34  ;;  %v1015_v41 = vadd.f32 %v6792_v14, %v1014_v38  ;;  %v6045_v42 = vpop.f32.mrb[6].mxu0 }
 0x104   : > { %2161 = vst.msk [vmem:[#allocation2 + $0x28] sm:$0x1] %vm2156_vm3, %v1768_v34  ;;  %v1515_v44 = vmax.f32 %v1023_v37, 0.0  ;;  %v1026_v45 = vadd.f32 %v6045_v42, %v6792_v14  ;;  %v1017_v46 = vpop.f32.mrb[7].mxu0 }
 0x105   : > { %2160 = vst.msk [vmem:[#allocation2 + $0x20] sm:$0xff] %vm2154_vm2, %v2027_v40  ;;  %v1513_v47 = vmax.f32 %v1015_v41, 0.0  ;;  %v1018_v48 = vadd.f32 %v6792_v14, %v1017_v46 }
 0x106   : > { %v1773_v49 = vrot.slane %v1515_v44, 7  ;;  %v1516_v50 = vmax.f32 %v1026_v45, 0.0  ;;  %6151 = vmatmul.mubr.msk.bf16.gmra.mrb[112].mxu0 %vm771_vm0, %v6368_v39 }
 0x107   : > { %v1771_v51 = vrot.slane %v1513_v47, 7  ;;  %v1514_v52 = vmax.f32 %v1018_v48, 0.0  ;;  %6154 = vmatprep.mubr.msk.bf16.mxu0 %vm771_vm0, %v6369_v43  ;;  %v6374_v48 = vld [vmem:[%s6650_s23 + $0x1f8] sm:$0xff]  }
 0x108   : > { %v2032_v53 = vsel %vm2024_vm1, 0.0, %v1773_v49  ;;  %2171 = vst.msk [vmem:[#allocation2 + $0x78] sm:$0x1] %vm2156_vm3, %v1773_v49  ;;  %v1774_v54 = vrot.slane %v1516_v50, 7 }
 0x109   : > { %2170 = vst.msk [vmem:[#allocation2 + $0x70] sm:$0xff] %vm2154_vm2, %v2032_v53  ;;  %v2030_v55 = vsel %vm2024_vm1, 0.0, %v1771_v51  ;;  %v1772_v56 = vrot.slane %v1514_v52, 7  ;;  %v6048_v57 = vpop.f32.mrb[8].mxu0 }
 0x10a   : > { %2167 = vst.msk [vmem:[#allocation2 + $0x58] sm:$0x1] %vm2156_vm3, %v1771_v51  ;;  %v2033_v58 = vsel %vm2024_vm1, 0.0, %v1774_v54  ;;  %2173 = vst.msk [vmem:[#allocation2 + $0x88] sm:$0x1] %vm2156_vm3, %v1774_v54  ;;  %v1039_v59 = vadd.f32 %v6048_v57, %v6792_v14  ;;  %v1030_v60 = vpop.f32.mrb[9].mxu0 }
 0x10b   : > { %2166 = vst.msk [vmem:[#allocation2 + $0x50] sm:$0xff] %vm2154_vm2, %v2030_v55  ;;  %2172 = vst.msk [vmem:[#allocation2 + $0x80] sm:$0xff] %vm2154_vm2, %v2033_v58  ;;  %v2031_v62 = vsel %vm2024_vm1, 0.0, %v1772_v56  ;;  %v1031_v63 = vadd.f32 %v6792_v14, %v1030_v60  ;;  %v6049_v0 = vpop.f32.mrb[10].mxu0 }
 0x10c   : > { %2169 = vst.msk [vmem:[#allocation2 + $0x68] sm:$0x1] %vm2156_vm3, %v1772_v56  ;;  %v1519_v2 = vmax.f32 %v1039_v59, 0.0  ;;  %v1042_v3 = vadd.f32 %v6049_v0, %v6792_v14  ;;  %v1033_v4 = vpop.f32.mrb[11].mxu0 }
 0x10d   : > { %2168 = vst.msk [vmem:[#allocation2 + $0x60] sm:$0xff] %vm2154_vm2, %v2031_v62  ;;  %v1517_v5 = vmax.f32 %v1031_v63, 0.0  ;;  %v1034_v6 = vadd.f32 %v6792_v14, %v1033_v4 }
 0x10e   : > { %v1777_v7 = vrot.slane %v1519_v2, 7  ;;  %v1520_v8 = vmax.f32 %v1042_v3, 0.0  ;;  %6155 = vmatmul.mubr.msk.bf16.gmra.mrb[116].mxu0 %vm771_vm0, %v6370_v61 }
 0x10f   : > { %v1775_v9 = vrot.slane %v1517_v5, 7  ;;  %v1518_v10 = vmax.f32 %v1034_v6, 0.0  ;;  %6158 = vmatprep.mubr.msk.bf16.mxu0 %vm771_vm0, %v6371_v1 }
 0x110   : > { %v2036_v11 = vsel %vm2024_vm1, 0.0, %v1777_v7  ;;  %2181 = vst.msk [vmem:[#allocation2 + $0xc8] sm:$0x1] %vm2156_vm3, %v1777_v7  ;;  %v1778_v12 = vrot.slane %v1520_v8, 7 }
 0x111   : > { %2180 = vst.msk [vmem:[#allocation2 + $0xc0] sm:$0xff] %vm2154_vm2, %v2036_v11  ;;  %v2034_v13 = vsel %vm2024_vm1, 0.0, %v1775_v9  ;;  %v1776_v15 = vrot.slane %v1518_v10, 7  ;;  %v6052_v16 = vpop.f32.mrb[12].mxu0 }
 0x112   : > { %2177 = vst.msk [vmem:[#allocation2 + $0xa8] sm:$0x1] %vm2156_vm3, %v1775_v9  ;;  %v2037_v17 = vsel %vm2024_vm1, 0.0, %v1778_v12  ;;  %2183 = vst.msk [vmem:[#allocation2 + $0xd8] sm:$0x1] %vm2156_vm3, %v1778_v12  ;;  %v1055_v18 = vadd.f32 %v6052_v16, %v6792_v14  ;;  %v1046_v19 = vpop.f32.mrb[13].mxu0 }
 0x113   : > { %2176 = vst.msk [vmem:[#allocation2 + $0xa0] sm:$0xff] %vm2154_vm2, %v2034_v13  ;;  %2182 = vst.msk [vmem:[#allocation2 + $0xd0] sm:$0xff] %vm2154_vm2, %v2037_v17  ;;  %v2035_v21 = vsel %vm2024_vm1, 0.0, %v1776_v15  ;;  %v1047_v22 = vadd.f32 %v6792_v14, %v1046_v19  ;;  %v6053_v23 = vpop.f32.mrb[14].mxu0 }
 0x114   : > { %2179 = vst.msk [vmem:[#allocation2 + $0xb8] sm:$0x1] %vm2156_vm3, %v1776_v15  ;;  %v1523_v25 = vmax.f32 %v1055_v18, 0.0  ;;  %v1058_v26 = vadd.f32 %v6053_v23, %v6792_v14  ;;  %v1049_v27 = vpop.f32.mrb[15].mxu0 }
 0x115   : > { %2178 = vst.msk [vmem:[#allocation2 + $0xb0] sm:$0xff] %vm2154_vm2, %v2035_v21  ;;  %v1521_v28 = vmax.f32 %v1047_v22, 0.0  ;;  %v1050_v29 = vadd.f32 %v6792_v14, %v1049_v27 }
 0x116   : > { %v1781_v30 = vrot.slane %v1523_v25, 7  ;;  %v1524_v31 = vmax.f32 %v1058_v26, 0.0  ;;  %6159 = vmatmul.mubr.msk.bf16.gmra.mrb[120].mxu0 %vm771_vm0, %v6372_v20 }
 0x117   : > { %v1779_v32 = vrot.slane %v1521_v28, 7  ;;  %v1522_v33 = vmax.f32 %v1050_v29, 0.0  ;;  %6162 = vmatprep.mubr.msk.bf16.mxu0 %vm771_vm0, %v6373_v24 }
 0x118   : > { %v2040_v34 = vsel %vm2024_vm1, 0.0, %v1781_v30  ;;  %2189 = vst.msk [vmem:[#allocation2 + $0x108] sm:$0x1] %vm2156_vm3, %v1781_v30  ;;  %v1782_v35 = vrot.slane %v1524_v31, 7  ;;  %v3347_v36 = vld [vmem:[#allocation2 + $0xc1] sm:$0xff] }
 0x119   : > { %v2641_v37 = vld [vmem:[#allocation2 + $0xc0] sm:$0xff]  ;;  %2188 = vst.msk [vmem:[#allocation2 + $0x100] sm:$0xff] %vm2154_vm2, %v2040_v34  ;;  %v2038_v38 = vsel %vm2024_vm1, 0.0, %v1779_v32  ;;  %v1780_v39 = vrot.slane %v1522_v33, 7  ;;  %v3379_v40 = vpack.c.bf16 %v3347_v36, %v3347_v36  ;;  %v6056_v42 = vpop.f32.mrb[16].mxu0 }
 0x11a   : > { %2185 = vst.msk [vmem:[#allocation2 + $0xe8] sm:$0x1] %vm2156_vm3, %v1779_v32  ;;  %v2673_v41 = vpack.c.bf16 %v2641_v37, %v2641_v37  ;;  %v2041_v43 = vsel %vm2024_vm1, 0.0, %v1782_v35  ;;  %2191 = vst.msk [vmem:[#allocation2 + $0x118] sm:$0x1] %vm2156_vm3, %v1782_v35  ;;  %v3348_v44 = vld [vmem:[#allocation2 + $0xd1] sm:$0xff]  ;;  %v1071_v46 = vadd.f32 %v6056_v42, %v6792_v14 }
 0x11b   : > { %2184 = vst.msk [vmem:[#allocation2 + $0xe0] sm:$0xff] %vm2154_vm2, %v2038_v38  ;;  %v3345_v45 = vld [vmem:[#allocation2 + $0xa1] sm:$0xff]  ;;  %v1062_v47 = vpop.f32.mrb[17].mxu0  ;;  %2190 = vst.msk [vmem:[#allocation2 + $0x110] sm:$0xff] %vm2154_vm2, %v2041_v43  ;;  %v2039_v49 = vsel %vm2024_vm1, 0.0, %v1780_v39  ;;  %3575 = vrot.lane.b32.xlu1 %v3379_v40, %s6543_s9  ;;  %v3380_v55 = vpack.c.bf16 %v3348_v44, %v3348_v44  ;;  %v2642_v60 = vld [vmem:[#allocation2 + $0xd0] sm:$0xff] }
 0x11c   : > { %2187 = vst.msk [vmem:[#allocation2 + $0xf8] sm:$0x1] %vm2156_vm3, %v1780_v39  ;;  %2931 = vrot.lane.b32.xlu0 %v2673_v41, %s6545_s16  ;;  %v1063_v50 = vadd.f32 %v6792_v14, %v1062_v47  ;;  %v6057_v51 = vpop.f32.mrb[18].mxu0  ;;  %v1527_v52 = vmax.f32 %v1071_v46, 0.0  ;;  %v3377_v56 = vpack.c.bf16 %v3345_v45, %v3345_v45  ;;  %v2674_v4 = vpack.c.bf16 %v2642_v60, %v2642_v60  ;;  %v3346_v10 = vld [vmem:[#allocation2 + $0xb1] sm:$0xff] }
 0x11d   : > { %2186 = vst.msk [vmem:[#allocation2 + $0xf0] sm:$0xff] %vm2154_vm2, %v2039_v49  ;;  %v1074_v53 = vadd.f32 %v6057_v51, %v6792_v14  ;;  %v1065_v54 = vpop.f32.mrb[19].mxu0  ;;  %v3378_v21 = vpack.c.bf16 %v3346_v10, %v3346_v10 }
 0x11e   : > { %v1525_v57 = vmax.f32 %v1063_v50, 0.0  ;;  %v1066_v58 = vadd.f32 %v6792_v14, %v1065_v54  ;;  %v1785_v59 = vrot.slane %v1527_v52, 7  ;;  %6163 = vmatmul.mubr.msk.bf16.gmra.mrb[124].mxu0 %vm771_vm0, %v6374_v48 }
 0x11f   : > { %v1528_v61 = vmax.f32 %v1074_v53, 0.0  ;;  %3577 = vrot.lane.b32.xlu1 %v3380_v55, %s6543_s9 }
 0x120   : > { %3571 = vrot.lane.b32.xlu0 %v3377_v56, %s6543_s9  ;;  %v1783_v62 = vrot.slane %v1525_v57, 7  ;;  %v1526_v63 = vmax.f32 %v1066_v58, 0.0  ;;  %v2044_v0 = vsel %vm2024_vm1, 0.0, %v1785_v59  ;;  %2199 = vst.msk [vmem:[#allocation2 + $0x158] sm:$0x1] %vm2156_vm3, %v1785_v59  ;;  %v3351_v1 = vld [vmem:[#allocation2 + $0x101] sm:$0xff] }
 0x121   : > { %v1786_v2 = vrot.slane %v1528_v61, 7  ;;  %v2645_v3 = vld [vmem:[#allocation2 + $0x100] sm:$0xff]  ;;  %2198 = vst.msk [vmem:[#allocation2 + $0x150] sm:$0xff] %vm2154_vm2, %v2044_v0  ;;  %v3383_v5 = vpack.c.bf16 %v3351_v1, %v3351_v1  ;;  %v6060_v8 = vpop.f32.mrb[20].mxu0 }
 0x122   : > { %v2042_v6 = vsel %vm2024_vm1, 0.0, %v1783_v62  ;;  %2195 = vst.msk [vmem:[#allocation2 + $0x138] sm:$0x1] %vm2156_vm3, %v1783_v62  ;;  %v1784_v7 = vrot.slane %v1526_v63, 7  ;;  %v1087_v11 = vadd.f32 %v6060_v8, %v6792_v14  ;;  %v1078_v12 = vpop.f32.mrb[21].mxu0  ;;  %v2677_v15 = vpack.c.bf16 %v2645_v3, %v2645_v3  ;;  %v3352_v25 = vld [vmem:[#allocation2 + $0x111] sm:$0xff] }
 0x123   : > { %2194 = vst.msk [vmem:[#allocation2 + $0x130] sm:$0xff] %vm2154_vm2, %v2042_v6  ;;  %v2045_v9 = vsel %vm2024_vm1, 0.0, %v1786_v2  ;;  %2933 = vrot.lane.b32.xlu1 %v2674_v4, %s6545_s16  ;;  %v1079_v16 = vadd.f32 %v6792_v14, %v1078_v12  ;;  %v6061_v17 = vpop.f32.mrb[22].mxu0  ;;  %v3349_v26 = vld [vmem:[#allocation2 + $0xe1] sm:$0xff]  ;;  %v3384_v32 = vpack.c.bf16 %v3352_v25, %v3352_v25  ;;  %v2646_v38 = vld [vmem:[#allocation2 + $0x110] sm:$0xff] }
 0x124   : > { %2201 = vst.msk [vmem:[#allocation2 + $0x168] sm:$0x1] %vm2156_vm3, %v1786_v2  ;;  %3583 = vrot.lane.b32.xlu0 %v3383_v5, %s6543_s9  ;;  %v2043_v13 = vsel %vm2024_vm1, 0.0, %v1784_v7  ;;  %2197 = vst.msk [vmem:[#allocation2 + $0x148] sm:$0x1] %vm2156_vm3, %v1784_v7  ;;  %v1531_v18 = vmax.f32 %v1087_v11, 0.0  ;;  %v1090_v19 = vadd.f32 %v6061_v17, %v6792_v14  ;;  %v3381_v33 = vpack.c.bf16 %v3349_v26, %v3349_v26 }
 0x125   : > { %2200 = vst.msk [vmem:[#allocation2 + $0x160] sm:$0xff] %vm2154_vm2, %v2045_v9  ;;  %2196 = vst.msk [vmem:[#allocation2 + $0x140] sm:$0xff] %vm2154_vm2, %v2043_v13  ;;  %v1081_v20 = vpop.f32.mrb[23].mxu0  ;;  %v1529_v22 = vmax.f32 %v1079_v16, 0.0  ;;  %v2643_v39 = vld [vmem:[#allocation2 + $0xe0] sm:$0xff]  ;;  %v2678_v49 = vpack.c.bf16 %v2646_v38, %v2646_v38  ;;  %v3350_v54 = vld [vmem:[#allocation2 + $0xf1] sm:$0xff] }
 0x126   : > { %v1082_v23 = vadd.f32 %v6792_v14, %v1081_v20  ;;  %v1789_v24 = vrot.slane %v1531_v18, 7  ;;  %v1532_v27 = vmax.f32 %v1090_v19, 0.0  ;;  %v2675_v50 = vpack.c.bf16 %v2643_v39, %v2643_v39  ;;  %v2644_v2 = vld [vmem:[#allocation2 + $0xf0] sm:$0xff]  ;;  %v6375_v11 = vld [vmem:[%s8778_s3 + $0x40] sm:$0xff]  }
 0x127   : > { %3573 = vrot.lane.b32.xlu1 %v3378_v21, %s6543_s9  ;;  %v1787_v28 = vrot.slane %v1529_v22, 7  ;;  %v3382_v61 = vpack.c.bf16 %v3350_v54, %v3350_v54  ;;  %v2676_v12 = vpack.c.bf16 %v2644_v2, %v2644_v2  ;;  %v6376_v17 = vld [vmem:[%s8778_s3] sm:$0xff]   ;;  %6246 = vmatprep.subr.bf16.mxu1 %v6375_v11  ;;  %v6380_v54 = vld [vmem:[%s8778_s3 + $0x10] sm:$0xff]  }
 0x128   : > { %2939 = vrot.lane.b32.xlu0 %v2677_v15, %s6545_s16  ;;  %v1530_v29 = vmax.f32 %v1082_v23, 0.0  ;;  %v2048_v30 = vsel %vm2024_vm1, 0.0, %v1789_v24  ;;  %2207 = vst.msk [vmem:[#allocation2 + $0x198] sm:$0x1] %vm2156_vm3, %v1789_v24  ;;  %v1790_v31 = vrot.slane %v1532_v27, 7  ;;  %v2513_v46 = vld [vmem:[#allocation2 + $0x151] sm:$0xff]  ;;  %5878 = vmatprep.subr.bf16.mxu0 %v6375_v11 }
 0x129   : > { %2206 = vst.msk [vmem:[#allocation2 + $0x190] sm:$0xff] %vm2154_vm2, %v2048_v30  ;;  %v2046_v34 = vsel %vm2024_vm1, 0.0, %v1787_v28  ;;  %v6064_v36 = vpop.f32.mrb[24].mxu0  ;;  %v2545_v56 = vpack.c.bf16 %v2513_v46, %v2513_v46  ;;  %6254 = vmatpush3.bf16.msra.mxu1 %v6376_v17  ;;  %v6377_v27 = vld [vmem:[%s8778_s3 + $0x48] sm:$0xff]   ;;  %5879 = vmatpush3.bf16.msra.mxu0 %v6376_v17 }
 0x12a   : > { %2203 = vst.msk [vmem:[#allocation2 + $0x178] sm:$0x1] %vm2156_vm3, %v1787_v28  ;;  %v1788_v35 = vrot.slane %v1530_v29, 7  ;;  %v2049_v37 = vsel %vm2024_vm1, 0.0, %v1790_v31  ;;  %2209 = vst.msk [vmem:[#allocation2 + $0x1a8] sm:$0x1] %vm2156_vm3, %v1790_v31  ;;  %v1103_v40 = vadd.f32 %v6064_v36, %v6792_v14  ;;  %6247 = vmatprep.subr.bf16.mxu1 %v6377_v27  ;;  %5880 = vmatprep.subr.bf16.mxu0 %v6377_v27 }
 0x12b   : > { %2202 = vst.msk [vmem:[#allocation2 + $0x170] sm:$0xff] %vm2154_vm2, %v2046_v34  ;;  %v1094_v41 = vpop.f32.mrb[25].mxu0  ;;  %3585 = vrot.lane.b32.xlu1 %v3384_v32, %s6543_s9  ;;  %2208 = vst.msk [vmem:[#allocation2 + $0x1a0] sm:$0xff] %vm2154_vm2, %v2049_v37  ;;  %v2511_v13 = vld [vmem:[#allocation2 + $0x131] sm:$0xff]  ;;  %v6378_v34 = vld [vmem:[%s8778_s3 + $0x8] sm:$0xff]  }
 0x12c   : > { %3579 = vrot.lane.b32.xlu0 %v3381_v33, %s6543_s9  ;;  %v2047_v42 = vsel %vm2024_vm1, 0.0, %v1788_v35  ;;  %2205 = vst.msk [vmem:[#allocation2 + $0x188] sm:$0x1] %vm2156_vm3, %v1788_v35  ;;  %v1095_v43 = vadd.f32 %v6792_v14, %v1094_v41  ;;  %v6065_v44 = vpop.f32.mrb[26].mxu0  ;;  %v1535_v45 = vmax.f32 %v1103_v40, 0.0  ;;  %v2514_v19 = vld [vmem:[#allocation2 + $0x161] sm:$0xff]  ;;  %v2543_v25 = vpack.c.bf16 %v2511_v13, %v2511_v13 }
 0x12d   : > { %2204 = vst.msk [vmem:[#allocation2 + $0x180] sm:$0xff] %vm2154_vm2, %v2047_v42  ;;  %v1106_v47 = vadd.f32 %v6065_v44, %v6792_v14  ;;  %v1097_v48 = vpop.f32.mrb[27].mxu0  ;;  %v2546_v30 = vpack.c.bf16 %v2514_v19, %v2514_v19  ;;  %v2512_v38 = vld [vmem:[#allocation2 + $0x141] sm:$0xff]  ;;  %6255 = vmatpush3.bf16.msra.mxu1 %v6378_v34  ;;  %5881 = vmatpush3.bf16.msra.mxu0 %v6378_v34 }
 0x12e   : > { %v1533_v51 = vmax.f32 %v1095_v43, 0.0  ;;  %v1098_v52 = vadd.f32 %v6792_v14, %v1097_v48  ;;  %v1793_v53 = vrot.slane %v1535_v45, 7  ;;  %v6384_v27 = vld [vmem:[%s8778_s3 + $0x20] sm:$0xff]  }
 0x12f   : > { %v1536_v55 = vmax.f32 %v1106_v47, 0.0  ;;  %2941 = vrot.lane.b32.xlu1 %v2678_v49, %s6545_s16 }
 0x130   : > { %2935 = vrot.lane.b32.xlu0 %v2675_v50, %s6545_s16  ;;  %v1791_v57 = vrot.slane %v1533_v51, 7  ;;  %v1534_v58 = vmax.f32 %v1098_v52, 0.0  ;;  %v2052_v59 = vsel %vm2024_vm1, 0.0, %v1793_v53  ;;  %2217 = vst.msk [vmem:[#allocation2 + $0x1e8] sm:$0x1] %vm2156_vm3, %v1793_v53  ;;  %v6379_v50 = vld [vmem:[%s8778_s3 + $0x50] sm:$0xff]   ;;  %v2544_v51 = vpack.c.bf16 %v2512_v38, %v2512_v38 }
 0x131   : > { %v1794_v60 = vrot.slane %v1536_v55, 7  ;;  %2216 = vst.msk [vmem:[#allocation2 + $0x1e0] sm:$0xff] %vm2154_vm2, %v2052_v59  ;;  %v6068_v0 = vpop.f32.mrb[28].mxu0  ;;  %6248 = vmatprep.subr.bf16.mxu1 %v6379_v50  ;;  %5882 = vmatprep.subr.bf16.mxu0 %v6379_v50 }
 0x132   : > { %v2050_v62 = vsel %vm2024_vm1, 0.0, %v1791_v57  ;;  %2213 = vst.msk [vmem:[#allocation2 + $0x1c8] sm:$0x1] %vm2156_vm3, %v1791_v57  ;;  %v1792_v63 = vrot.slane %v1534_v58, 7  ;;  %v1119_v3 = vadd.f32 %v6068_v0, %v6792_v14  ;;  %v1110_v4 = vpop.f32.mrb[29].mxu0  ;;  %6256 = vmatpush3.bf16.msra.mxu1 %v6380_v54  ;;  %5883 = vmatpush3.bf16.msra.mxu0 %v6380_v54 }
 0x133   : > { %2212 = vst.msk [vmem:[#allocation2 + $0x1c0] sm:$0xff] %vm2154_vm2, %v2050_v62  ;;  %v2053_v1 = vsel %vm2024_vm1, 0.0, %v1794_v60  ;;  %3581 = vrot.lane.b32.xlu1 %v3382_v61, %s6543_s9  ;;  %v1111_v6 = vadd.f32 %v6792_v14, %v1110_v4  ;;  %v6069_v7 = vpop.f32.mrb[30].mxu0 }
 0x134   : > { %2219 = vst.msk [vmem:[#allocation2 + $0x1f8] sm:$0x1] %vm2156_vm3, %v1794_v60  ;;  %2741 = vrot.lane.b32.xlu0 %v2545_v56, %s6543_s9  ;;  %v2051_v5 = vsel %vm2024_vm1, 0.0, %v1792_v63  ;;  %2215 = vst.msk [vmem:[#allocation2 + $0x1d8] sm:$0x1] %vm2156_vm3, %v1792_v63  ;;  %v1539_v8 = vmax.f32 %v1119_v3, 0.0  ;;  %v1122_v9 = vadd.f32 %v6069_v7, %v6792_v14 }
 0x135   : > { %2218 = vst.msk [vmem:[#allocation2 + $0x1f0] sm:$0xff] %vm2154_vm2, %v2053_v1  ;;  %2214 = vst.msk [vmem:[#allocation2 + $0x1d0] sm:$0xff] %vm2154_vm2, %v2051_v5  ;;  %v1113_v10 = vpop.f32.mrb[31].mxu0  ;;  %v1537_v15 = vmax.f32 %v1111_v6, 0.0  ;;  %v6381_v63 = vld [vmem:[%s8778_s3 + $0x58] sm:$0xff]  }
 0x136   : > { %v1114_v16 = vadd.f32 %v6792_v14, %v1113_v10  ;;  %v1797_v18 = vrot.slane %v1539_v8, 7  ;;  %v1540_v20 = vmax.f32 %v1122_v9, 0.0  ;;  %v6382_v6 = vld [vmem:[%s8778_s3 + $0x18] sm:$0xff]   ;;  %6249 = vmatprep.subr.bf16.mxu1 %v6381_v63  ;;  %5884 = vmatprep.subr.bf16.mxu0 %v6381_v63 }
 0x137   : > { %2937 = vrot.lane.b32.xlu1 %v2676_v12, %s6545_s16  ;;  %v1795_v21 = vrot.slane %v1537_v15, 7  ;;  %v2515_v10 = vld [vmem:[#allocation2 + $0x171] sm:$0xff]  ;;  %6257 = vmatpush3.bf16.msra.mxu1 %v6382_v6 }
 0x138   : > { %3767 = vrot.lane.b32.xlu0 %v2545_v56, %s6545_s16  ;;  %v1538_v22 = vmax.f32 %v1114_v16, 0.0  ;;  %v4117_v23 = vld [vmem:[#allocation2 + $0x1e1] sm:$0xff]  ;;  %v2056_v24 = vsel %vm2024_vm1, 0.0, %v1797_v18  ;;  %2225 = vst.msk [vmem:[#allocation2 + $0x228] sm:$0x1] %vm2156_vm3, %v1797_v18  ;;  %v1798_v26 = vrot.slane %v1540_v20, 7  ;;  %5885 = vmatpush3.bf16.msra.mxu0 %v6382_v6 }
 0x139   : > { %v6956_v28 = vpack.c.bf16 %v4117_v23, %v4117_v23  ;;  %2224 = vst.msk [vmem:[#allocation2 + $0x220] sm:$0xff] %vm2154_vm2, %v2056_v24  ;;  %v2054_v31 = vsel %vm2024_vm1, 0.0, %v1795_v21  ;;  %v6072_v33 = vpop.f32.mrb[32].mxu0  ;;  %v2517_v56 = vld [vmem:[#allocation2 + $0x191] sm:$0xff]  ;;  %v6383_v23 = vld [vmem:[%s8778_s3 + $0x60] sm:$0xff]   ;;  %v2547_v24 = vpack.c.bf16 %v2515_v10, %v2515_v10 }
 0x13a   : > { %v4115_v29 = vld [vmem:[#allocation2 + $0x1c1] sm:$0xff]  ;;  %2221 = vst.msk [vmem:[#allocation2 + $0x208] sm:$0x1] %vm2156_vm3, %v1795_v21  ;;  %v1796_v32 = vrot.slane %v1538_v22, 7  ;;  %v2057_v37 = vsel %vm2024_vm1, 0.0, %v1798_v26  ;;  %v1135_v39 = vadd.f32 %v6072_v33, %v6792_v14  ;;  %v1126_v40 = vpop.f32.mrb[33].mxu0  ;;  %v2549_v2 = vpack.c.bf16 %v2517_v56, %v2517_v56  ;;  %6250 = vmatprep.subr.bf16.mxu1 %v6383_v23  ;;  %5886 = vmatprep.subr.bf16.mxu0 %v6383_v23 }
 0x13b   : > { %v4147_v35 = vpack.c.bf16 %v4115_v29, %v4115_v29  ;;  %2220 = vst.msk [vmem:[#allocation2 + $0x200] sm:$0xff] %vm2154_vm2, %v2054_v31  ;;  %2737 = vrot.lane.b32.xlu1 %v2543_v25, %s6543_s9  ;;  %2226 = vst.msk [vmem:[#allocation2 + $0x230] sm:$0xff] %vm2154_vm2, %v2057_v37  ;;  %v1127_v44 = vadd.f32 %v6792_v14, %v1126_v40  ;;  %v6073_v45 = vpop.f32.mrb[34].mxu0  ;;  %v2516_v31 = vld [vmem:[#allocation2 + $0x181] sm:$0xff]  ;;  %6258 = vmatpush3.bf16.msra.mxu1 %v6384_v27  ;;  %v6387_v56 = vld [vmem:[%s8778_s3 + $0x70] sm:$0xff]  }
 0x13c   : > { %v4118_v36 = vld [vmem:[#allocation2 + $0x1f1] sm:$0xff]  ;;  %2227 = vst.msk [vmem:[#allocation2 + $0x238] sm:$0x1] %vm2156_vm3, %v1798_v26  ;;  %2743 = vrot.lane.b32.xlu0 %v2546_v30, %s6543_s9  ;;  %v2055_v43 = vsel %vm2024_vm1, 0.0, %v1796_v32  ;;  %2223 = vst.msk [vmem:[#allocation2 + $0x218] sm:$0x1] %vm2156_vm3, %v1796_v32  ;;  %v1138_v48 = vadd.f32 %v6073_v45, %v6792_v14  ;;  %5887 = vmatpush3.bf16.msra.mxu0 %v6384_v27 }
 0x13d   : > { %4182 = vst.msk [vmem:[#allocation3 + $0x20] sm:$0xf] %vm4179_vm4, %v6956_v28  ;;  %v6970_v41 = vpack.c.bf16 %v4118_v36, %v4118_v36  ;;  %v4116_v42 = vld [vmem:[#allocation2 + $0x1d1] sm:$0xff]  ;;  %4180 = vst.msk [vmem:[#allocation3 + $0x8] sm:$0xf] %vm4179_vm4, %v4147_v35  ;;  %v1543_v47 = vmax.f32 %v1135_v39, 0.0  ;;  %v2548_v39 = vpack.c.bf16 %v2516_v31, %v2516_v31 }
 0x13e   : > { %v6979_v46 = vpack.c.bf16 %v4116_v42, %v4116_v42  ;;  %2222 = vst.msk [vmem:[#allocation2 + $0x210] sm:$0xff] %vm2154_vm2, %v2055_v43  ;;  %v1129_v49 = vpop.f32.mrb[35].mxu0  ;;  %v1541_v52 = vmax.f32 %v1127_v44, 0.0  ;;  %v1544_v57 = vmax.f32 %v1138_v48, 0.0  ;;  %v6385_v37 = vld [vmem:[%s8778_s3 + $0x68] sm:$0xff]  }
 0x13f   : > { %4183 = vst.msk [vmem:[#allocation3 + $0x2c] sm:$0xf] %vm4179_vm4, %v6970_v41  ;;  %v1130_v53 = vadd.f32 %v6792_v14, %v1129_v49  ;;  %v1801_v55 = vrot.slane %v1543_v47, 7  ;;  %3769 = vrot.lane.b32.xlu1 %v2546_v30, %s6545_s16  ;;  %v3482_v30 = vld [vmem:[#allocation2 + $0x1a1] sm:$0xff]  ;;  %6251 = vmatprep.subr.bf16.mxu1 %v6385_v37 }
 0x140   : > { %4181 = vst.msk [vmem:[#allocation3 + $0x14] sm:$0xf] %vm4179_vm4, %v6979_v46  ;;  %2739 = vrot.lane.b32.xlu0 %v2544_v51, %s6543_s9  ;;  %v1799_v58 = vrot.slane %v1541_v52, 7  ;;  %v4121_v60 = vld [vmem:[#allocation2 + $0x221] sm:$0xff]  ;;  %v1802_v62 = vrot.slane %v1544_v57, 7  ;;  %v3514_v38 = vpack.c.bf16 %v3482_v30, %v3482_v30  ;;  %5888 = vmatprep.subr.bf16.mxu0 %v6385_v37 }
 0x141   : > { %v1542_v59 = vmax.f32 %v1130_v53, 0.0  ;;  %v2060_v61 = vsel %vm2024_vm1, 0.0, %v1801_v55  ;;  %2235 = vst.msk [vmem:[#allocation2 + $0x278] sm:$0x1] %vm2156_vm3, %v1801_v55  ;;  %v7001_v0 = vpack.c.bf16 %v4121_v60, %v4121_v60  ;;  %v6076_v5 = vpop.f32.mrb[36].mxu0  ;;  %v6386_v44 = vld [vmem:[%s8778_s3 + $0x28] sm:$0xff]  }
 0x142   : > { %v4119_v1 = vld [vmem:[#allocation2 + $0x201] sm:$0xff]  ;;  %2234 = vst.msk [vmem:[#allocation2 + $0x270] sm:$0xff] %vm2154_vm2, %v2060_v61  ;;  %v2058_v3 = vsel %vm2024_vm1, 0.0, %v1799_v58  ;;  %v2061_v9 = vsel %vm2024_vm1, 0.0, %v1802_v62  ;;  %v1151_v11 = vadd.f32 %v6076_v5, %v6792_v14  ;;  %v1142_v12 = vpop.f32.mrb[37].mxu0  ;;  %6259 = vmatpush3.bf16.msra.mxu1 %v6386_v44  ;;  %5889 = vmatpush3.bf16.msra.mxu0 %v6386_v44  ;;  %v6388_v60 = vld [vmem:[%s8778_s3 + $0x30] sm:$0xff]  }
 0x143   : > { %2231 = vst.msk [vmem:[#allocation2 + $0x258] sm:$0x1] %vm2156_vm3, %v1799_v58  ;;  %v1800_v4 = vrot.slane %v1542_v59, 7  ;;  %v7009_v7 = vpack.c.bf16 %v4119_v1, %v4119_v1  ;;  %v4122_v8 = vld [vmem:[#allocation2 + $0x231] sm:$0xff]  ;;  %2237 = vst.msk [vmem:[#allocation2 + $0x288] sm:$0x1] %vm2156_vm3, %v1802_v62  ;;  %2749 = vrot.lane.b32.xlu1 %v2549_v2, %s6543_s9  ;;  %v1143_v17 = vadd.f32 %v6792_v14, %v1142_v12  ;;  %6252 = vmatprep.subr.bf16.mxu1 %v6387_v56 }
 0x144   : > { %2230 = vst.msk [vmem:[#allocation2 + $0x250] sm:$0xff] %vm2154_vm2, %v2058_v3  ;;  %v4154_v13 = vpack.c.bf16 %v4122_v8, %v4122_v8  ;;  %3775 = vrot.lane.b32.xlu0 %v2549_v2, %s6545_s16  ;;  %2236 = vst.msk [vmem:[#allocation2 + $0x280] sm:$0xff] %vm2154_vm2, %v2061_v9  ;;  %v6077_v18 = vpop.f32.mrb[38].mxu0  ;;  %v1547_v20 = vmax.f32 %v1151_v11, 0.0  ;;  %v3412_v47 = vld [vmem:[#allocation2 + $0x1e0] sm:$0xff]  ;;  %5890 = vmatprep.subr.bf16.mxu0 %v6387_v56  ;;  %v6390_v9 = vld [vmem:[%s8778_s3 + $0x38] sm:$0xff]  }
 0x145   : > { %4186 = vst.msk [vmem:[#allocation3 + $0x50] sm:$0xf] %vm4179_vm4, %v7001_v0  ;;  %v4120_v15 = vld [vmem:[#allocation2 + $0x211] sm:$0xff]  ;;  %v2059_v16 = vsel %vm2024_vm1, 0.0, %v1800_v4  ;;  %4184 = vst.msk [vmem:[#allocation3 + $0x38] sm:$0xf] %vm4179_vm4, %v7009_v7  ;;  %v1154_v21 = vadd.f32 %v6077_v18, %v6792_v14  ;;  %v7067_v57 = vpack.c.bf16 %v3412_v47, %v3412_v47 }
 0x146   : > { %2233 = vst.msk [vmem:[#allocation2 + $0x268] sm:$0x1] %vm2156_vm3, %v1800_v4  ;;  %v7025_v19 = vpack.c.bf16 %v4120_v15, %v4120_v15  ;;  %v1145_v22 = vpop.f32.mrb[39].mxu0  ;;  %v1545_v25 = vmax.f32 %v1143_v17, 0.0  ;;  %v1805_v29 = vrot.slane %v1547_v20, 7  ;;  %6260 = vmatpush3.bf16.msra.mxu1 %v6388_v60  ;;  %v6389_v4 = vld [vmem:[%s8778_s3 + $0x78] sm:$0xff]   ;;  %5891 = vmatpush3.bf16.msra.mxu0 %v6388_v60 }
 0x147   : > { %2232 = vst.msk [vmem:[#allocation2 + $0x260] sm:$0xff] %vm2154_vm2, %v2059_v16  ;;  %v1146_v26 = vadd.f32 %v6792_v14, %v1145_v22  ;;  %v1548_v32 = vmax.f32 %v1154_v21, 0.0  ;;  %2745 = vrot.lane.b32.xlu1 %v2547_v24, %s6543_s9  ;;  %v3413_v11 = vld [vmem:[#allocation2 + $0x1f0] sm:$0xff]  ;;  %6253 = vmatprep.subr.bf16.mxu1 %v6389_v4  ;;  %v3416_v23 = vld [vmem:[#allocation2 + $0x220] sm:$0xff] }
 0x148   : > { %4187 = vst.msk [vmem:[#allocation3 + $0x5c] sm:$0xf] %vm4179_vm4, %v4154_v13  ;;  %4185 = vst.msk [vmem:[#allocation3 + $0x44] sm:$0xf] %vm4179_vm4, %v7025_v19  ;;  %3771 = vrot.lane.b32.xlu0 %v2547_v24, %s6545_s16  ;;  %v1803_v33 = vrot.slane %v1545_v25, 7  ;;  %v2064_v35 = vsel %vm2024_vm1, 0.0, %v1805_v29  ;;  %5892 = vmatprep.subr.bf16.mxu0 %v6389_v4  ;;  %v7110_v31 = vpack.c.bf16 %v3416_v23, %v3416_v23 }
 0x149   : > { %v1546_v34 = vmax.f32 %v1146_v26, 0.0  ;;  %2243 = vst.msk [vmem:[#allocation2 + $0x2b8] sm:$0x1] %vm2156_vm3, %v1805_v29  ;;  %v1806_v36 = vrot.slane %v1548_v32, 7  ;;  %v6080_v43 = vpop.f32.mrb[40].mxu0 }
 0x14a   : > { %2242 = vst.msk [vmem:[#allocation2 + $0x2b0] sm:$0xff] %vm2154_vm2, %v2064_v35  ;;  %v2062_v40 = vsel %vm2024_vm1, 0.0, %v1803_v33  ;;  %v1167_v48 = vadd.f32 %v6080_v43, %v6792_v14  ;;  %v1158_v49 = vpop.f32.mrb[41].mxu0  ;;  %6261 = vmatpush3.bf16.msra.mxu1 %v6390_v9  ;;  %5893 = vmatpush3.bf16.msra.mxu0 %v6390_v9  ;;  %v7121_v35 = vld [vmem:[%s8777_s2] ss:$0 sm:$0xff] }
 0x14b   : > { %2239 = vst.msk [vmem:[#allocation2 + $0x298] sm:$0x1] %vm2156_vm3, %v1803_v33  ;;  %v1804_v42 = vrot.slane %v1546_v34, 7  ;;  %v2065_v45 = vsel %vm2024_vm1, 0.0, %v1806_v36  ;;  %2245 = vst.msk [vmem:[#allocation2 + $0x2c8] sm:$0x1] %vm2156_vm3, %v1806_v36  ;;  %3777 = vrot.lane.b32.xlu1 %v3514_v38, %s6545_s16  ;;  %v1159_v51 = vadd.f32 %v6792_v14, %v1158_v49 }
 0x14c   : > { %2238 = vst.msk [vmem:[#allocation2 + $0x290] sm:$0xff] %vm2154_vm2, %v2062_v40  ;;  %2747 = vrot.lane.b32.xlu0 %v2548_v39, %s6543_s9  ;;  %2244 = vst.msk [vmem:[#allocation2 + $0x2c0] sm:$0xff] %vm2154_vm2, %v2065_v45  ;;  %v6081_v52 = vpop.f32.mrb[42].mxu0  ;;  %v1551_v53 = vmax.f32 %v1167_v48, 0.0  ;;  %v3414_v34 = vld [vmem:[#allocation2 + $0x200] sm:$0xff]  ;;  %v3417_v49 = vld [vmem:[#allocation2 + $0x230] sm:$0xff] }
 0x14d   : > { %v2063_v50 = vsel %vm2024_vm1, 0.0, %v1804_v42  ;;  %2241 = vst.msk [vmem:[#allocation2 + $0x2a8] sm:$0x1] %vm2156_vm3, %v1804_v42  ;;  %v1170_v54 = vadd.f32 %v6081_v52, %v6792_v14  ;;  %v1161_v55 = vpop.f32.mrb[43].mxu0  ;;  %v1549_v58 = vmax.f32 %v1159_v51, 0.0  ;;  %v7134_v45 = vpack.c.bf16 %v3414_v34, %v3414_v34 }
 0x14e   : > { %2240 = vst.msk [vmem:[#allocation2 + $0x2a0] sm:$0xff] %vm2154_vm2, %v2063_v50  ;;  %v1162_v59 = vadd.f32 %v6792_v14, %v1161_v55  ;;  %v1809_v61 = vrot.slane %v1551_v53, 7 }
 0x14f   : > { %v1552_v62 = vmax.f32 %v1170_v54, 0.0  ;;  %3773 = vrot.lane.b32.xlu1 %v2548_v39, %s6545_s16  ;;  %v1807_v63 = vrot.slane %v1549_v58, 7  ;;  %v3449_v58 = vpack.c.bf16 %v3417_v49, %v3417_v49 }
 0x150   : > { %3671 = vrot.lane.b32.xlu0 %v7067_v57, %s6544_s13  ;;  %v1550_v1 = vmax.f32 %v1162_v59, 0.0  ;;  %v2068_v2 = vsel %vm2024_vm1, 0.0, %v1809_v61  ;;  %2253 = vst.msk [vmem:[#allocation2 + $0x308] sm:$0x1] %vm2156_vm3, %v1809_v61  ;;  %v3415_v61 = vld [vmem:[#allocation2 + $0x210] sm:$0xff] }
 0x151   : > { %v1810_v3 = vrot.slane %v1552_v62, 7  ;;  %2252 = vst.msk [vmem:[#allocation2 + $0x300] sm:$0xff] %vm2154_vm2, %v2068_v2  ;;  %v2066_v5 = vsel %vm2024_vm1, 0.0, %v1807_v63  ;;  %v6084_v8 = vpop.f32.mrb[44].mxu0 }
 0x152   : > { %2249 = vst.msk [vmem:[#allocation2 + $0x2e8] sm:$0x1] %vm2156_vm3, %v1807_v63  ;;  %v1808_v6 = vrot.slane %v1550_v1, 7  ;;  %v1183_v12 = vadd.f32 %v6084_v8, %v6792_v14  ;;  %v1174_v13 = vpop.f32.mrb[45].mxu0 }
 0x153   : > { %2248 = vst.msk [vmem:[#allocation2 + $0x2e0] sm:$0xff] %vm2154_vm2, %v2066_v5  ;;  %v2069_v10 = vsel %vm2024_vm1, 0.0, %v1810_v3  ;;  %2837 = vrot.lane.b32.xlu1 %v6956_v28, %s6544_s13  ;;  %v1175_v16 = vadd.f32 %v6792_v14, %v1174_v13  ;;  %v6085_v17 = vpop.f32.mrb[46].mxu0  ;;  %v7101_v28 = vpack.c.bf16 %v3413_v11, %v3413_v11  ;;  %v7163_v11 = vpack.c.bf16 %v3415_v61, %v3415_v61 }
 0x154   : > { %2255 = vst.msk [vmem:[#allocation2 + $0x318] sm:$0x1] %vm2156_vm3, %v1810_v3  ;;  %2839 = vrot.lane.b32.xlu0 %v6970_v41, %s6544_s13  ;;  %v2067_v15 = vsel %vm2024_vm1, 0.0, %v1808_v6  ;;  %2251 = vst.msk [vmem:[#allocation2 + $0x2f8] sm:$0x1] %vm2156_vm3, %v1808_v6  ;;  %v1555_v18 = vmax.f32 %v1183_v12, 0.0  ;;  %v1186_v20 = vadd.f32 %v6085_v17, %v6792_v14 }
 0x155   : > { %2254 = vst.msk [vmem:[#allocation2 + $0x310] sm:$0xff] %vm2154_vm2, %v2069_v10  ;;  %2250 = vst.msk [vmem:[#allocation2 + $0x2f0] sm:$0xff] %vm2154_vm2, %v2067_v15  ;;  %v1177_v21 = vpop.f32.mrb[47].mxu0  ;;  %v1553_v41 = vmax.f32 %v1175_v16, 0.0 }
 0x156   : > { %v1178_v22 = vadd.f32 %v6792_v14, %v1177_v21  ;;  %v1813_v24 = vrot.slane %v1555_v18, 7  ;;  %v1556_v25 = vmax.f32 %v1186_v20, 0.0 }
 0x157   : > { %3673 = vrot.lane.b32.xlu1 %v7101_v28, %s6544_s13  ;;  %v1811_v26 = vrot.slane %v1553_v41, 7 }
 0x158   : > { %2835 = vrot.lane.b32.xlu0 %v6979_v46, %s6544_s13  ;;  %v1554_v27 = vmax.f32 %v1178_v22, 0.0  ;;  %v2072_v29 = vsel %vm2024_vm1, 0.0, %v1813_v24  ;;  %2261 = vst.msk [vmem:[#allocation2 + $0x348] sm:$0x1] %vm2156_vm3, %v1813_v24  ;;  %v1814_v30 = vrot.slane %v1556_v25, 7  ;;  %v3355_v54 = vld [vmem:[#allocation2 + $0x301] sm:$0xff] }
 0x159   : > { %2260 = vst.msk [vmem:[#allocation2 + $0x340] sm:$0xff] %vm2154_vm2, %v2072_v29  ;;  %v2070_v14 = vsel %vm2024_vm1, 0.0, %v1811_v26  ;;  %v6088_v33 = vpop.f32.mrb[48].mxu0  ;;  %v3387_v2 = vpack.c.bf16 %v3355_v54, %v3355_v54  ;;  %v2649_v15 = vld [vmem:[#allocation2 + $0x300] sm:$0xff] }
 0x15a   : > { %2257 = vst.msk [vmem:[#allocation2 + $0x328] sm:$0x1] %vm2156_vm3, %v1811_v26  ;;  %v1812_v32 = vrot.slane %v1554_v27, 7  ;;  %v2073_v46 = vsel %vm2024_vm1, 0.0, %v1814_v30  ;;  %2263 = vst.msk [vmem:[#allocation2 + $0x358] sm:$0x1] %vm2156_vm3, %v1814_v30  ;;  %v1199_v36 = vadd.f32 %v7121_v35, %v6088_v33  ;;  %v2681_v23 = vpack.c.bf16 %v2649_v15, %v2649_v15 }
 0x15b   : > { %2256 = vst.msk [vmem:[#allocation2 + $0x320] sm:$0xff] %vm2154_vm2, %v2070_v14  ;;  %v1190_v37 = vpop.f32.mrb[49].mxu0  ;;  %2845 = vrot.lane.b32.xlu1 %v7001_v0, %s6544_s13  ;;  %2262 = vst.msk [vmem:[#allocation2 + $0x350] sm:$0xff] %vm2154_vm2, %v2073_v46  ;;  %v7136_v0 = vpop.permute.xlu0 %2751  ;;  %v3353_v30 = vld [vmem:[#allocation2 + $0x2e1] sm:$0xff] }
 0x15c   : > { %3679 = vrot.lane.b32.xlu0 %v7110_v31, %s6544_s13  ;;  %v2071_v38 = vsel %vm2024_vm1, 0.0, %v1812_v32  ;;  %2259 = vst.msk [vmem:[#allocation2 + $0x338] sm:$0x1] %vm2156_vm3, %v1812_v32  ;;  %v1191_v39 = vadd.f32 %v7121_v35, %v1190_v37  ;;  %v6089_v40 = vpop.f32.mrb[50].mxu0  ;;  %v1559_v42 = vmax.f32 %v1199_v36, 0.0  ;;  %v3356_v13 = vld [vmem:[#allocation2 + $0x311] sm:$0xff] }
 0x15d   : > { %2258 = vst.msk [vmem:[#allocation2 + $0x330] sm:$0xff] %vm2154_vm2, %v2071_v38  ;;  %v1202_v43 = vadd.f32 %v7121_v35, %v6089_v40  ;;  %v1193_v44 = vpop.f32.mrb[51].mxu0  ;;  %v3388_v22 = vpack.c.bf16 %v3356_v13, %v3356_v13  ;;  %v2650_v29 = vld [vmem:[#allocation2 + $0x310] sm:$0xff] }
 0x15e   : > { %v1557_v47 = vmax.f32 %v1191_v39, 0.0  ;;  %v1194_v48 = vadd.f32 %v7121_v35, %v1193_v44  ;;  %v1817_v50 = vrot.slane %v1559_v42, 7  ;;  %v2682_v40 = vpack.c.bf16 %v2650_v29, %v2650_v29 }
 0x15f   : > { %v1560_v51 = vmax.f32 %v1202_v43, 0.0  ;;  %2841 = vrot.lane.b32.xlu1 %v7009_v7, %s6544_s13  ;;  %v7155_v3 = vpop.permute.xlu0 %2847  ;;  %v3385_v42 = vpack.c.bf16 %v3353_v30, %v3353_v30 }
 0x160   : > { %3675 = vrot.lane.b32.xlu0 %v7134_v45, %s6544_s13  ;;  %v1815_v52 = vrot.slane %v1557_v47, 7  ;;  %v1558_v53 = vmax.f32 %v1194_v48, 0.0  ;;  %v2076_v55 = vsel %vm2024_vm1, 0.0, %v1817_v50  ;;  %2271 = vst.msk [vmem:[#allocation2 + $0x398] sm:$0x1] %vm2156_vm3, %v1817_v50  ;;  %v3354_v47 = vld [vmem:[#allocation2 + $0x2f1] sm:$0xff] }
 0x161   : > { %v1818_v56 = vrot.slane %v1560_v51, 7  ;;  %2270 = vst.msk [vmem:[#allocation2 + $0x390] sm:$0xff] %vm2154_vm2, %v2076_v55  ;;  %v6092_v7 = vpop.f32.mrb[52].mxu0  ;;  %v2647_v48 = vld [vmem:[#allocation2 + $0x2e0] sm:$0xff] }
 0x162   : > { %v2074_v59 = vsel %vm2024_vm1, 0.0, %v1815_v52  ;;  %2267 = vst.msk [vmem:[#allocation2 + $0x378] sm:$0x1] %vm2156_vm3, %v1815_v52  ;;  %v1816_v60 = vrot.slane %v1558_v53, 7  ;;  %v1215_v63 = vadd.f32 %v7121_v35, %v6092_v7  ;;  %v1206_v1 = vpop.f32.mrb[53].mxu0  ;;  %v3359_v54 = vld [vmem:[#allocation2 + $0x341] sm:$0xff] }
 0x163   : > { %2266 = vst.msk [vmem:[#allocation2 + $0x370] sm:$0xff] %vm2154_vm2, %v2074_v59  ;;  %v2077_v62 = vsel %vm2024_vm1, 0.0, %v1818_v56  ;;  %3681 = vrot.lane.b32.xlu1 %v3449_v58, %s6544_s13  ;;  %v1207_v5 = vadd.f32 %v7121_v35, %v1206_v1  ;;  %v6093_v6 = vpop.f32.mrb[54].mxu0  ;;  %v7171_v24 = vpop.permute.xlu0 %2767  ;;  %v3386_v58 = vpack.c.bf16 %v3354_v47, %v3354_v47  ;;  %v2679_v59 = vpack.c.bf16 %v2647_v48, %v2647_v48  ;;  %v2653_v13 = vld [vmem:[#allocation2 + $0x340] sm:$0xff] }
 0x164   : > { %2273 = vst.msk [vmem:[#allocation2 + $0x3a8] sm:$0x1] %vm2156_vm3, %v1818_v56  ;;  %2843 = vrot.lane.b32.xlu0 %v7025_v19, %s6544_s13  ;;  %v2075_v4 = vsel %vm2024_vm1, 0.0, %v1816_v60  ;;  %2269 = vst.msk [vmem:[#allocation2 + $0x388] sm:$0x1] %vm2156_vm3, %v1816_v60  ;;  %v1563_v8 = vmax.f32 %v1215_v63, 0.0  ;;  %v1218_v9 = vadd.f32 %v7121_v35, %v6093_v6 }
 0x165   : > { %2272 = vst.msk [vmem:[#allocation2 + $0x3a0] sm:$0xff] %vm2154_vm2, %v2077_v62  ;;  %2268 = vst.msk [vmem:[#allocation2 + $0x380] sm:$0xff] %vm2154_vm2, %v2075_v4  ;;  %v1209_v10 = vpop.f32.mrb[55].mxu0  ;;  %v1561_v19 = vmax.f32 %v1207_v5, 0.0  ;;  %v2648_v62 = vld [vmem:[#allocation2 + $0x2f0] sm:$0xff]  ;;  %v3391_v4 = vpack.c.bf16 %v3359_v54, %v3359_v54 }
 0x166   : > { %v1210_v12 = vadd.f32 %v7121_v35, %v1209_v10  ;;  %v1821_v16 = vrot.slane %v1563_v8, 7  ;;  %v1564_v17 = vmax.f32 %v1218_v9, 0.0 }
 0x167   : > { %3677 = vrot.lane.b32.xlu1 %v7163_v11, %s6544_s13  ;;  %v1819_v18 = vrot.slane %v1561_v19, 7  ;;  %v7191_v51 = vpop.permute.xlu0 %2863 }
 0x168   : > { %3591 = vrot.lane.b32.xlu0 %v3387_v2, %s6543_s9  ;;  %v1562_v20 = vmax.f32 %v1210_v12, 0.0  ;;  %v2080_v21 = vsel %vm2024_vm1, 0.0, %v1821_v16  ;;  %2279 = vst.msk [vmem:[#allocation2 + $0x3d8] sm:$0x1] %vm2156_vm3, %v1821_v16  ;;  %v1822_v41 = vrot.slane %v1564_v17, 7  ;;  %v2680_v12 = vpack.c.bf16 %v2648_v62, %v2648_v62 }
 0x169   : > { %2278 = vst.msk [vmem:[#allocation2 + $0x3d0] sm:$0xff] %vm2154_vm2, %v2080_v21  ;;  %v2078_v25 = vsel %vm2024_vm1, 0.0, %v1819_v18  ;;  %v6096_v27 = vpop.f32.mrb[56].mxu0 }
 0x16a   : > { %2275 = vst.msk [vmem:[#allocation2 + $0x3b8] sm:$0x1] %vm2156_vm3, %v1819_v18  ;;  %v1820_v26 = vrot.slane %v1562_v20, 7  ;;  %v2081_v14 = vsel %vm2024_vm1, 0.0, %v1822_v41  ;;  %2281 = vst.msk [vmem:[#allocation2 + $0x3e8] sm:$0x1] %vm2156_vm3, %v1822_v41  ;;  %v1231_v32 = vadd.f32 %v7121_v35, %v6096_v27 }
 0x16b   : > { %2274 = vst.msk [vmem:[#allocation2 + $0x3b0] sm:$0xff] %vm2154_vm2, %v2078_v25  ;;  %v1222_v33 = vpop.f32.mrb[57].mxu0  ;;  %3593 = vrot.lane.b32.xlu1 %v3388_v22, %s6543_s9  ;;  %2280 = vst.msk [vmem:[#allocation2 + $0x3e0] sm:$0xff] %vm2154_vm2, %v2081_v14  ;;  %v7210_v15 = vpop.permute.xlu0 %2783  ;;  %v3360_v18 = vld [vmem:[#allocation2 + $0x351] sm:$0xff] }
 0x16c   : > { %2947 = vrot.lane.b32.xlu0 %v2681_v23, %s6545_s16  ;;  %v2079_v34 = vsel %vm2024_vm1, 0.0, %v1820_v26  ;;  %2277 = vst.msk [vmem:[#allocation2 + $0x3c8] sm:$0x1] %vm2156_vm3, %v1820_v26  ;;  %v1223_v46 = vadd.f32 %v7121_v35, %v1222_v33  ;;  %v6097_v36 = vpop.f32.mrb[58].mxu0  ;;  %v1567_v37 = vmax.f32 %v1231_v32, 0.0  ;;  %v2685_v23 = vpack.c.bf16 %v2653_v13, %v2653_v13 }
 0x16d   : > { %2276 = vst.msk [vmem:[#allocation2 + $0x3c0] sm:$0xff] %vm2154_vm2, %v2079_v34  ;;  %v1234_v38 = vadd.f32 %v7121_v35, %v6097_v36  ;;  %v1225_v39 = vpop.f32.mrb[59].mxu0  ;;  %v3392_v29 = vpack.c.bf16 %v3360_v18, %v3360_v18  ;;  %v3357_v36 = vld [vmem:[#allocation2 + $0x321] sm:$0xff] }
 0x16e   : > { %v1565_v43 = vmax.f32 %v1223_v46, 0.0  ;;  %v1226_v44 = vadd.f32 %v7121_v35, %v1225_v39  ;;  %v1825_v49 = vrot.slane %v1567_v37, 7  ;;  %v2654_v46 = vld [vmem:[#allocation2 + $0x350] sm:$0xff] }
 0x16f   : > { %v1568_v50 = vmax.f32 %v1234_v38, 0.0  ;;  %2949 = vrot.lane.b32.xlu1 %v2682_v40, %s6545_s16 }
 0x170   : > { %3587 = vrot.lane.b32.xlu0 %v3385_v42, %s6543_s9  ;;  %v1823_v52 = vrot.slane %v1565_v43, 7  ;;  %v1566_v53 = vmax.f32 %v1226_v44, 0.0  ;;  %v2084_v55 = vsel %vm2024_vm1, 0.0, %v1825_v49  ;;  %2289 = vst.msk [vmem:[#allocation2 + $0x428] sm:$0x1] %vm2156_vm3, %v1825_v49  ;;  %v7230_v43 = vpop.permute.xlu0 %2879 }
 0x171   : > { %v1826_v56 = vrot.slane %v1568_v50, 7  ;;  %2288 = vst.msk [vmem:[#allocation2 + $0x420] sm:$0xff] %vm2154_vm2, %v2084_v55  ;;  %v6100_v61 = vpop.f32.mrb[60].mxu0 }
 0x172   : > { %v2082_v60 = vsel %vm2024_vm1, 0.0, %v1823_v52  ;;  %2285 = vst.msk [vmem:[#allocation2 + $0x408] sm:$0x1] %vm2156_vm3, %v1823_v52  ;;  %v1824_v7 = vrot.slane %v1566_v53, 7  ;;  %v1247_v1 = vadd.f32 %v7121_v35, %v6100_v61  ;;  %v1238_v2 = vpop.f32.mrb[61].mxu0  ;;  %v3358_v61 = vld [vmem:[#allocation2 + $0x331] sm:$0xff] }
 0x173   : > { %2284 = vst.msk [vmem:[#allocation2 + $0x400] sm:$0xff] %vm2154_vm2, %v2082_v60  ;;  %v2085_v63 = vsel %vm2024_vm1, 0.0, %v1826_v56  ;;  %3589 = vrot.lane.b32.xlu1 %v3386_v58, %s6543_s9  ;;  %v1239_v6 = vadd.f32 %v7121_v35, %v1238_v2  ;;  %v6101_v8 = vpop.f32.mrb[62].mxu0  ;;  %v3389_v58 = vpack.c.bf16 %v3357_v36, %v3357_v36 }
 0x174   : > { %2291 = vst.msk [vmem:[#allocation2 + $0x438] sm:$0x1] %vm2156_vm3, %v1826_v56  ;;  %2943 = vrot.lane.b32.xlu0 %v2679_v59, %s6545_s16  ;;  %v2083_v5 = vsel %vm2024_vm1, 0.0, %v1824_v7  ;;  %2287 = vst.msk [vmem:[#allocation2 + $0x418] sm:$0x1] %vm2156_vm3, %v1824_v7  ;;  %v1571_v9 = vmax.f32 %v1247_v1, 0.0  ;;  %v1250_v10 = vadd.f32 %v7121_v35, %v6101_v8  ;;  %v2686_v56 = vpack.c.bf16 %v2654_v46, %v2654_v46 }
 0x175   : > { %2290 = vst.msk [vmem:[#allocation2 + $0x430] sm:$0xff] %vm2154_vm2, %v2085_v63  ;;  %2286 = vst.msk [vmem:[#allocation2 + $0x410] sm:$0xff] %vm2154_vm2, %v2083_v5  ;;  %v1241_v19 = vpop.f32.mrb[63].mxu0  ;;  %v1569_v16 = vmax.f32 %v1239_v6, 0.0  ;;  %v2651_v59 = vld [vmem:[#allocation2 + $0x320] sm:$0xff]  ;;  %v3485_v5 = vld [vmem:[#allocation2 + $0x391] sm:$0xff] }
 0x176   : > { %v1242_v17 = vadd.f32 %v7121_v35, %v1241_v19  ;;  %v1829_v20 = vrot.slane %v1571_v9, 7  ;;  %v1572_v21 = vmax.f32 %v1250_v10, 0.0  ;;  %v3390_v10 = vpack.c.bf16 %v3358_v61, %v3358_v61  ;;  %v7255_v19 = vpop.permute.xlu0 %2735  ;;  %v2522_v61 = vld [vmem:[#allocation2 + $0x3a1] sm:$0xff] }
 0x177   : > { %2945 = vrot.lane.b32.xlu1 %v2680_v12, %s6545_s16  ;;  %v1827_v41 = vrot.slane %v1569_v16, 7  ;;  %8785 = vst [vmem:[#allocation7_spill] sm:$0xff] %v7255_v19 }
 0x178   : > { %3599 = vrot.lane.b32.xlu0 %v3391_v4, %s6543_s9  ;;  %v1570_v22 = vmax.f32 %v1242_v17, 0.0  ;;  %v4125_v25 = vld [vmem:[#allocation2 + $0x421] sm:$0xff]  ;;  %v2088_v26 = vsel %vm2024_vm1, 0.0, %v1829_v20  ;;  %2297 = vst.msk [vmem:[#allocation2 + $0x468] sm:$0x1] %vm2156_vm3, %v1829_v20  ;;  %v1830_v27 = vrot.slane %v1572_v21, 7  ;;  %v2683_v4 = vpack.c.bf16 %v2651_v59, %v2651_v59 }
 0x179   : > { %v7217_v30 = vpack.c.bf16 %v4125_v25, %v4125_v25  ;;  %2296 = vst.msk [vmem:[#allocation2 + $0x460] sm:$0xff] %vm2154_vm2, %v2088_v26  ;;  %v2086_v32 = vsel %vm2024_vm1, 0.0, %v1827_v41  ;;  %v6104_v34 = vpop.f32.mrb[64].mxu0  ;;  %v2652_v20 = vld [vmem:[#allocation2 + $0x330] sm:$0xff]  ;;  %v3517_v26 = vpack.c.bf16 %v3485_v5, %v3485_v5 }
 0x17a   : > { %v4123_v14 = vld [vmem:[#allocation2 + $0x401] sm:$0xff]  ;;  %2293 = vst.msk [vmem:[#allocation2 + $0x448] sm:$0x1] %vm2156_vm3, %v1827_v41  ;;  %v1828_v33 = vrot.slane %v1570_v22, 7  ;;  %v2089_v39 = vsel %vm2024_vm1, 0.0, %v1830_v27  ;;  %v1263_v40 = vadd.f32 %v7121_v35, %v6104_v34  ;;  %v1254_v42 = vpop.f32.mrb[65].mxu0 }
 0x17b   : > { %v7222_v37 = vpack.c.bf16 %v4123_v14, %v4123_v14  ;;  %2292 = vst.msk [vmem:[#allocation2 + $0x440] sm:$0xff] %vm2154_vm2, %v2086_v32  ;;  %3601 = vrot.lane.b32.xlu1 %v3392_v29, %s6543_s9  ;;  %2298 = vst.msk [vmem:[#allocation2 + $0x470] sm:$0xff] %vm2154_vm2, %v2089_v39  ;;  %v1255_v49 = vadd.f32 %v7121_v35, %v1254_v42  ;;  %v6105_v50 = vpop.f32.mrb[66].mxu0  ;;  %v3483_v34 = vld [vmem:[#allocation2 + $0x371] sm:$0xff] }
 0x17c   : > { %v4126_v38 = vld [vmem:[#allocation2 + $0x431] sm:$0xff]  ;;  %2299 = vst.msk [vmem:[#allocation2 + $0x478] sm:$0x1] %vm2156_vm3, %v1830_v27  ;;  %2955 = vrot.lane.b32.xlu0 %v2685_v23, %s6545_s16  ;;  %v2087_v48 = vsel %vm2024_vm1, 0.0, %v1828_v33  ;;  %2295 = vst.msk [vmem:[#allocation2 + $0x458] sm:$0x1] %vm2156_vm3, %v1828_v33  ;;  %v1266_v54 = vadd.f32 %v7121_v35, %v6105_v50  ;;  %v7288_v50 = vpop.permute.xlu0 %2831 }
 0x17d   : > { %4190 = vst.msk [vmem:[#allocation3 + $0x80] sm:$0xf] %vm4179_vm4, %v7217_v30  ;;  %v7234_v44 = vpack.c.bf16 %v4126_v38, %v4126_v38  ;;  %v4124_v47 = vld [vmem:[#allocation2 + $0x411] sm:$0xff]  ;;  %4188 = vst.msk [vmem:[#allocation3 + $0x68] sm:$0xf] %vm4179_vm4, %v7222_v37  ;;  %v1575_v53 = vmax.f32 %v1263_v40, 0.0  ;;  %v2684_v40 = vpack.c.bf16 %v2652_v20, %v2652_v20 }
 0x17e   : > { %v7242_v52 = vpack.c.bf16 %v4124_v47, %v4124_v47  ;;  %2294 = vst.msk [vmem:[#allocation2 + $0x450] sm:$0xff] %vm2154_vm2, %v2087_v48  ;;  %v1257_v55 = vpop.f32.mrb[67].mxu0  ;;  %v1573_v60 = vmax.f32 %v1255_v49, 0.0  ;;  %v1576_v63 = vmax.f32 %v1266_v54, 0.0  ;;  %8786 = vst [vmem:[#allocation8_spill] sm:$0xff] %v7288_v50  ;;  %v2520_v20 = vld [vmem:[#allocation2 + $0x381] sm:$0xff] }
 0x17f   : > { %4191 = vst.msk [vmem:[#allocation3 + $0x8c] sm:$0xf] %vm4179_vm4, %v7234_v44  ;;  %v1258_v7 = vadd.f32 %v7121_v35, %v1257_v55  ;;  %v1833_v62 = vrot.slane %v1575_v53, 7  ;;  %2957 = vrot.lane.b32.xlu1 %v2686_v56, %s6545_s16  ;;  %v3515_v53 = vpack.c.bf16 %v3483_v34, %v3483_v34 }
 0x180   : > { %4189 = vst.msk [vmem:[#allocation3 + $0x74] sm:$0xf] %vm4179_vm4, %v7242_v52  ;;  %3595 = vrot.lane.b32.xlu0 %v3389_v58, %s6543_s9  ;;  %v1831_v1 = vrot.slane %v1573_v60, 7  ;;  %v4129_v6 = vld [vmem:[#allocation2 + $0x461] sm:$0xff]  ;;  %v1834_v9 = vrot.slane %v1576_v63, 7 }
 0x181   : > { %v1574_v2 = vmax.f32 %v1258_v7, 0.0  ;;  %v2092_v8 = vsel %vm2024_vm1, 0.0, %v1833_v62  ;;  %2307 = vst.msk [vmem:[#allocation2 + $0x4b8] sm:$0x1] %vm2156_vm3, %v1833_v62  ;;  %v7257_v12 = vpack.c.bf16 %v4129_v6, %v4129_v6  ;;  %v6108_v18 = vpop.f32.mrb[68].mxu0 }
 0x182   : > { %v4127_v13 = vld [vmem:[#allocation2 + $0x441] sm:$0xff]  ;;  %2306 = vst.msk [vmem:[#allocation2 + $0x4b0] sm:$0xff] %vm2154_vm2, %v2092_v8  ;;  %v2090_v16 = vsel %vm2024_vm1, 0.0, %v1831_v1  ;;  %v2093_v22 = vsel %vm2024_vm1, 0.0, %v1834_v9  ;;  %v1279_v23 = vadd.f32 %v7121_v35, %v6108_v18  ;;  %v1270_v25 = vpop.f32.mrb[69].mxu0 }
 0x183   : > { %2303 = vst.msk [vmem:[#allocation2 + $0x498] sm:$0x1] %vm2156_vm3, %v1831_v1  ;;  %v1832_v17 = vrot.slane %v1574_v2, 7  ;;  %v7262_v21 = vpack.c.bf16 %v4127_v13, %v4127_v13  ;;  %v4130_v41 = vld [vmem:[#allocation2 + $0x471] sm:$0xff]  ;;  %2309 = vst.msk [vmem:[#allocation2 + $0x4c8] sm:$0x1] %vm2156_vm3, %v1834_v9  ;;  %3597 = vrot.lane.b32.xlu1 %v3390_v10, %s6543_s9  ;;  %v1271_v32 = vadd.f32 %v7121_v35, %v1270_v25 }
 0x184   : > { %2302 = vst.msk [vmem:[#allocation2 + $0x490] sm:$0xff] %vm2154_vm2, %v2090_v16  ;;  %2951 = vrot.lane.b32.xlu0 %v2683_v4, %s6545_s16  ;;  %v4162_v27 = vpack.c.bf16 %v4130_v41, %v4130_v41  ;;  %2308 = vst.msk [vmem:[#allocation2 + $0x4c0] sm:$0xff] %vm2154_vm2, %v2093_v22  ;;  %v6109_v33 = vpop.f32.mrb[70].mxu0  ;;  %v1579_v36 = vmax.f32 %v1279_v23, 0.0  ;;  %v2554_v16 = vpack.c.bf16 %v2522_v61, %v2522_v61 }
 0x185   : > { %4194 = vst.msk [vmem:[#allocation3 + $0xb0] sm:$0xf] %vm4179_vm4, %v7257_v12  ;;  %v4128_v29 = vld [vmem:[#allocation2 + $0x451] sm:$0xff]  ;;  %v2091_v14 = vsel %vm2024_vm1, 0.0, %v1832_v17  ;;  %4192 = vst.msk [vmem:[#allocation3 + $0x98] sm:$0xf] %vm4179_vm4, %v7262_v21  ;;  %v1282_v38 = vadd.f32 %v7121_v35, %v6109_v33  ;;  %v2552_v33 = vpack.c.bf16 %v2520_v20, %v2520_v20 }
 0x186   : > { %2305 = vst.msk [vmem:[#allocation2 + $0x4a8] sm:$0x1] %vm2156_vm3, %v1832_v17  ;;  %v7278_v46 = vpack.c.bf16 %v4128_v29, %v4128_v29  ;;  %v1273_v39 = vpop.f32.mrb[71].mxu0  ;;  %v1577_v42 = vmax.f32 %v1271_v32, 0.0  ;;  %v1837_v48 = vrot.slane %v1579_v36, 7 }
 0x187   : > { %2304 = vst.msk [vmem:[#allocation2 + $0x4a0] sm:$0xff] %vm2154_vm2, %v2091_v14  ;;  %v1274_v47 = vadd.f32 %v7121_v35, %v1273_v39  ;;  %v1580_v49 = vmax.f32 %v1282_v38, 0.0  ;;  %2953 = vrot.lane.b32.xlu1 %v2684_v40, %s6545_s16 }
 0x188   : > { %4195 = vst.msk [vmem:[#allocation3 + $0xbc] sm:$0xf] %vm4179_vm4, %v4162_v27  ;;  %4193 = vst.msk [vmem:[#allocation3 + $0xa4] sm:$0xf] %vm4179_vm4, %v7278_v46  ;;  %3783 = vrot.lane.b32.xlu0 %v3517_v26, %s6545_s16  ;;  %v1835_v54 = vrot.slane %v1577_v42, 7  ;;  %v2096_v56 = vsel %vm2024_vm1, 0.0, %v1837_v48 }
 0x189   : > { %v1578_v55 = vmax.f32 %v1274_v47, 0.0  ;;  %2315 = vst.msk [vmem:[#allocation2 + $0x4f8] sm:$0x1] %vm2156_vm3, %v1837_v48  ;;  %v1838_v58 = vrot.slane %v1580_v49, 7  ;;  %v6112_v7 = vpop.f32.mrb[72].mxu0  ;;  %v3487_v49 = vld [vmem:[#allocation2 + $0x3b1] sm:$0xff] }
 0x18a   : > { %2314 = vst.msk [vmem:[#allocation2 + $0x4f0] sm:$0xff] %vm2154_vm2, %v2096_v56  ;;  %v2094_v59 = vsel %vm2024_vm1, 0.0, %v1835_v54  ;;  %v1295_v63 = vadd.f32 %v7121_v35, %v6112_v7  ;;  %v1286_v1 = vpop.f32.mrb[73].mxu0  ;;  %v3519_v61 = vpack.c.bf16 %v3487_v49, %v3487_v49 }
 0x18b   : > { %2311 = vst.msk [vmem:[#allocation2 + $0x4d8] sm:$0x1] %vm2156_vm3, %v1835_v54  ;;  %v1836_v60 = vrot.slane %v1578_v55, 7  ;;  %v2097_v62 = vsel %vm2024_vm1, 0.0, %v1838_v58  ;;  %2317 = vst.msk [vmem:[#allocation2 + $0x508] sm:$0x1] %vm2156_vm3, %v1838_v58  ;;  %2757 = vrot.lane.b32.xlu1 %v3517_v26, %s6543_s9  ;;  %v1287_v4 = vadd.f32 %v7121_v35, %v1286_v1 }
 0x18c   : > { %2310 = vst.msk [vmem:[#allocation2 + $0x4d0] sm:$0xff] %vm2154_vm2, %v2094_v59  ;;  %3779 = vrot.lane.b32.xlu0 %v3515_v53, %s6545_s16  ;;  %2316 = vst.msk [vmem:[#allocation2 + $0x500] sm:$0xff] %vm2154_vm2, %v2097_v62  ;;  %v6113_v5 = vpop.f32.mrb[74].mxu0  ;;  %v1583_v6 = vmax.f32 %v1295_v63, 0.0  ;;  %v3489_v26 = vld [vmem:[#allocation2 + $0x3d1] sm:$0xff] }
 0x18d   : > { %v2095_v2 = vsel %vm2024_vm1, 0.0, %v1836_v60  ;;  %2313 = vst.msk [vmem:[#allocation2 + $0x4e8] sm:$0x1] %vm2156_vm3, %v1836_v60  ;;  %v1298_v8 = vadd.f32 %v7121_v35, %v6113_v5  ;;  %v1289_v9 = vpop.f32.mrb[75].mxu0  ;;  %v7307_v10 = vpop.permute.xlu1 %3575  ;;  %v1581_v17 = vmax.f32 %v1287_v4, 0.0  ;;  %v3521_v40 = vpack.c.bf16 %v3489_v26, %v3489_v26 }
 0x18e   : > { %2312 = vst.msk [vmem:[#allocation2 + $0x4e0] sm:$0xff] %vm2154_vm2, %v2095_v2  ;;  %v7309_v13 = vpop.permute.xlu0 %2931  ;;  %v1290_v18 = vadd.f32 %v7121_v35, %v1289_v9  ;;  %v1841_v41 = vrot.slane %v1583_v6, 7  ;;  %v2524_v9 = vld [vmem:[#allocation2 + $0x3c1] sm:$0xff] }
 0x18f   : > { %v1584_v22 = vmax.f32 %v1298_v8, 0.0  ;;  %2753 = vrot.lane.b32.xlu1 %v3515_v53, %s6543_s9  ;;  %v1839_v23 = vrot.slane %v1581_v17, 7 }
 0x190   : > { %2759 = vrot.lane.b32.xlu0 %v2554_v16, %s6543_s9  ;;  %v1582_v25 = vmax.f32 %v1290_v18, 0.0  ;;  %v2100_v27 = vsel %vm2024_vm1, 0.0, %v1841_v41  ;;  %2325 = vst.msk [vmem:[#allocation2 + $0x548] sm:$0x1] %vm2156_vm3, %v1841_v41 }
 0x191   : > { %v1842_v29 = vrot.slane %v1584_v22, 7  ;;  %v7316_v14 = vpop.permute.xlu1 %3577  ;;  %2324 = vst.msk [vmem:[#allocation2 + $0x540] sm:$0xff] %vm2154_vm2, %v2100_v27  ;;  %v2098_v34 = vsel %vm2024_vm1, 0.0, %v1839_v23  ;;  %v6116_v39 = vpop.f32.mrb[76].mxu0 }
 0x192   : > { %v7318_v32 = vpop.permute.xlu0 %3571  ;;  %2321 = vst.msk [vmem:[#allocation2 + $0x528] sm:$0x1] %vm2156_vm3, %v1839_v23  ;;  %v1840_v36 = vrot.slane %v1582_v25, 7  ;;  %v1311_v47 = vadd.f32 %v7121_v35, %v6116_v39  ;;  %v1302_v48 = vpop.f32.mrb[77].mxu0  ;;  %v3420_v23 = vld [vmem:[#allocation2 + $0x420] sm:$0xff] }
 0x193   : > { %8787 = vst [vmem:[#allocation9_spill] sm:$0xff] %v7318_v32  ;;  %2320 = vst.msk [vmem:[#allocation2 + $0x520] sm:$0xff] %vm2154_vm2, %v2098_v34  ;;  %v2101_v38 = vsel %vm2024_vm1, 0.0, %v1842_v29  ;;  %3785 = vrot.lane.b32.xlu1 %v2554_v16, %s6545_s16  ;;  %v1303_v53 = vadd.f32 %v7121_v35, %v1302_v48  ;;  %v6117_v54 = vpop.f32.mrb[78].mxu0  ;;  %v2556_v34 = vpack.c.bf16 %v2524_v9, %v2524_v9  ;;  %v3490_v39 = vld [vmem:[#allocation2 + $0x3e1] sm:$0xff] }
 0x194   : > { %2327 = vst.msk [vmem:[#allocation2 + $0x558] sm:$0x1] %vm2156_vm3, %v1842_v29  ;;  %2755 = vrot.lane.b32.xlu0 %v2552_v33, %s6543_s9  ;;  %v2099_v42 = vsel %vm2024_vm1, 0.0, %v1840_v36  ;;  %2323 = vst.msk [vmem:[#allocation2 + $0x538] sm:$0x1] %vm2156_vm3, %v1840_v36  ;;  %v1587_v58 = vmax.f32 %v1311_v47, 0.0  ;;  %v1314_v59 = vadd.f32 %v7121_v35, %v6117_v54  ;;  %v3452_v48 = vpack.c.bf16 %v3420_v23, %v3420_v23 }
 0x195   : > { %2326 = vst.msk [vmem:[#allocation2 + $0x550] sm:$0xff] %vm2154_vm2, %v2101_v38  ;;  %2322 = vst.msk [vmem:[#allocation2 + $0x530] sm:$0xff] %vm2154_vm2, %v2099_v42  ;;  %v7334_v55 = vpop.permute.xlu1 %2933  ;;  %v1585_v60 = vmax.f32 %v1303_v53, 0.0  ;;  %v1305_v7 = vpop.f32.mrb[79].mxu0 }
 0x196   : > { %v7336_v56 = vpop.permute.xlu0 %3583  ;;  %v1845_v62 = vrot.slane %v1587_v58, 7  ;;  %v1588_v63 = vmax.f32 %v1314_v59, 0.0  ;;  %v1306_v1 = vadd.f32 %v7121_v35, %v1305_v7  ;;  %v3418_v58 = vld [vmem:[#allocation2 + $0x400] sm:$0xff] }
 0x197   : > { %3781 = vrot.lane.b32.xlu1 %v2552_v33, %s6545_s16  ;;  %v1843_v2 = vrot.slane %v1585_v60, 7 }
 0x198   : > { %3791 = vrot.lane.b32.xlu0 %v3521_v40, %s6545_s16  ;;  %v2104_v6 = vsel %vm2024_vm1, 0.0, %v1845_v62  ;;  %2333 = vst.msk [vmem:[#allocation2 + $0x588] sm:$0x1] %vm2156_vm3, %v1845_v62  ;;  %v1846_v8 = vrot.slane %v1588_v63, 7  ;;  %v1586_v17 = vmax.f32 %v1306_v1, 0.0  ;;  %v3522_v62 = vpack.c.bf16 %v3490_v39, %v3490_v39 }
 0x199   : > { %v7342_v4 = vpop.permute.xlu1 %3573  ;;  %2332 = vst.msk [vmem:[#allocation2 + $0x580] sm:$0xff] %vm2154_vm2, %v2104_v6  ;;  %v2102_v16 = vsel %vm2024_vm1, 0.0, %v1843_v2  ;;  %v6120_v18 = vpop.f32.mrb[80].mxu0 }
 0x19a   : > { %8788 = vst [vmem:[#allocation10_spill] sm:$0xff] %v7342_v4  ;;  %v7344_v5 = vpop.permute.xlu0 %2939  ;;  %2329 = vst.msk [vmem:[#allocation2 + $0x568] sm:$0x1] %vm2156_vm3, %v1843_v2  ;;  %v2105_v20 = vsel %vm2024_vm1, 0.0, %v1846_v8  ;;  %v1327_v41 = vadd.f32 %v7121_v35, %v6120_v18  ;;  %v1318_v22 = vpop.f32.mrb[81].mxu0  ;;  %v1844_v25 = vrot.slane %v1586_v17, 7 }
 0x19b   : > { %2765 = vrot.lane.b32.xlu1 %v3521_v40, %s6543_s9  ;;  %2328 = vst.msk [vmem:[#allocation2 + $0x560] sm:$0xff] %vm2154_vm2, %v2102_v16  ;;  %2334 = vst.msk [vmem:[#allocation2 + $0x590] sm:$0xff] %vm2154_vm2, %v2105_v20  ;;  %v1319_v26 = vadd.f32 %v7121_v35, %v1318_v22  ;;  %v6121_v27 = vpop.f32.mrb[82].mxu0 }
 0x19c   : > { %3787 = vrot.lane.b32.xlu0 %v3519_v61, %s6545_s16  ;;  %2335 = vst.msk [vmem:[#allocation2 + $0x598] sm:$0x1] %vm2156_vm3, %v1846_v8  ;;  %v1591_v36 = vmax.f32 %v1327_v41, 0.0  ;;  %v1330_v38 = vadd.f32 %v7121_v35, %v6121_v27  ;;  %v2103_v40 = vsel %vm2024_vm1, 0.0, %v1844_v25  ;;  %2331 = vst.msk [vmem:[#allocation2 + $0x578] sm:$0x1] %vm2156_vm3, %v1844_v25  ;;  %v3450_v8 = vpack.c.bf16 %v3418_v58, %v3418_v58 }
 0x19d   : > { %v7359_v29 = vpop.permute.xlu1 %3585  ;;  %v1589_v42 = vmax.f32 %v1319_v26, 0.0  ;;  %v1321_v47 = vpop.f32.mrb[83].mxu0  ;;  %2330 = vst.msk [vmem:[#allocation2 + $0x570] sm:$0xff] %vm2154_vm2, %v2103_v40 }
 0x19e   : > { %v7361_v33 = vpop.permute.xlu0 %3579  ;;  %v1849_v49 = vrot.slane %v1591_v36, 7  ;;  %v1592_v53 = vmax.f32 %v1330_v38, 0.0  ;;  %v1322_v54 = vadd.f32 %v7121_v35, %v1321_v47 }
 0x19f   : > { %2761 = vrot.lane.b32.xlu1 %v3519_v61, %s6543_s9  ;;  %v1847_v59 = vrot.slane %v1589_v42, 7 }
 0x1a0   : > { %2763 = vrot.lane.b32.xlu0 %v2556_v34, %s6543_s9  ;;  %v2108_v63 = vsel %vm2024_vm1, 0.0, %v1849_v49  ;;  %2343 = vst.msk [vmem:[#allocation2 + $0x5d8] sm:$0x1] %vm2156_vm3, %v1849_v49  ;;  %v1850_v61 = vrot.slane %v1592_v53, 7  ;;  %v1590_v1 = vmax.f32 %v1322_v54, 0.0 }
 0x1a1   : > { %v7370_v60 = vpop.permute.xlu1 %2941  ;;  %2342 = vst.msk [vmem:[#allocation2 + $0x5d0] sm:$0xff] %vm2154_vm2, %v2108_v63  ;;  %v2106_v2 = vsel %vm2024_vm1, 0.0, %v1847_v59  ;;  %v6124_v6 = vpop.f32.mrb[84].mxu0 }
 0x1a2   : > { %v7372_v7 = vpop.permute.xlu0 %2935  ;;  %2339 = vst.msk [vmem:[#allocation2 + $0x5b8] sm:$0x1] %vm2156_vm3, %v1847_v59  ;;  %v2109_v9 = vsel %vm2024_vm1, 0.0, %v1850_v61  ;;  %2345 = vst.msk [vmem:[#allocation2 + $0x5e8] sm:$0x1] %vm2156_vm3, %v1850_v61  ;;  %v1848_v16 = vrot.slane %v1590_v1, 7  ;;  %v1343_v18 = vadd.f32 %v7121_v35, %v6124_v6 }
 0x1a3   : > { %3793 = vrot.lane.b32.xlu1 %v3522_v62, %s6545_s16  ;;  %2338 = vst.msk [vmem:[#allocation2 + $0x5b0] sm:$0xff] %vm2154_vm2, %v2106_v2  ;;  %v1334_v17 = vpop.f32.mrb[85].mxu0  ;;  %2344 = vst.msk [vmem:[#allocation2 + $0x5e0] sm:$0xff] %vm2154_vm2, %v2109_v9 }
 0x1a4   : > { %3687 = vrot.lane.b32.xlu0 %v3452_v48, %s6544_s13  ;;  %v1335_v20 = vadd.f32 %v7121_v35, %v1334_v17  ;;  %v6125_v41 = vpop.f32.mrb[86].mxu0  ;;  %v2107_v25 = vsel %vm2024_vm1, 0.0, %v1848_v16  ;;  %2341 = vst.msk [vmem:[#allocation2 + $0x5c8] sm:$0x1] %vm2156_vm3, %v1848_v16  ;;  %v1595_v27 = vmax.f32 %v1343_v18, 0.0  ;;  %v3424_v18 = vld [vmem:[#allocation2 + $0x460] sm:$0xff] }
 0x1a5   : > { %v7387_v22 = vpop.permute.xlu1 %3581  ;;  %v1346_v26 = vadd.f32 %v7121_v35, %v6125_v41  ;;  %2340 = vst.msk [vmem:[#allocation2 + $0x5c0] sm:$0xff] %vm2154_vm2, %v2107_v25  ;;  %v1337_v38 = vpop.f32.mrb[87].mxu0 }
 0x1a6   : > { %v7389_v23 = vpop.permute.xlu0 %2741  ;;  %v1593_v36 = vmax.f32 %v1335_v20, 0.0  ;;  %v1338_v40 = vadd.f32 %v7121_v35, %v1337_v38  ;;  %v1853_v42 = vrot.slane %v1595_v27, 7 }
 0x1a7   : > { %3789 = vrot.lane.b32.xlu1 %v2556_v34, %s6545_s16  ;;  %v1596_v39 = vmax.f32 %v1346_v26, 0.0 }
 0x1a8   : > { %3683 = vrot.lane.b32.xlu0 %v3450_v8, %s6544_s13  ;;  %v1851_v47 = vrot.slane %v1593_v36, 7  ;;  %v1594_v54 = vmax.f32 %v1338_v40, 0.0  ;;  %v2112_v58 = vsel %vm2024_vm1, 0.0, %v1853_v42  ;;  %2351 = vst.msk [vmem:[#allocation2 + $0x618] sm:$0x1] %vm2156_vm3, %v1853_v42  ;;  %v3421_v8 = vld [vmem:[#allocation2 + $0x430] sm:$0xff]  ;;  %v3456_v42 = vpack.c.bf16 %v3424_v18, %v3424_v18 }
 0x1a9   : > { %v7398_v48 = vpop.permute.xlu1 %2937  ;;  %v1854_v53 = vrot.slane %v1596_v39, 7  ;;  %v6128_v34 = vpop.f32.mrb[88].mxu0  ;;  %2350 = vst.msk [vmem:[#allocation2 + $0x610] sm:$0xff] %vm2154_vm2, %v2112_v58  ;;  %v3453_v36 = vpack.c.bf16 %v3421_v8, %v3421_v8  ;;  %v3422_v58 = vld [vmem:[#allocation2 + $0x440] sm:$0xff] }
 0x1aa   : > { %v7400_v49 = vpop.permute.xlu0 %3767  ;;  %v2110_v59 = vsel %vm2024_vm1, 0.0, %v1851_v47  ;;  %2347 = vst.msk [vmem:[#allocation2 + $0x5f8] sm:$0x1] %vm2156_vm3, %v1851_v47  ;;  %v1852_v63 = vrot.slane %v1594_v54, 7  ;;  %v1359_v61 = vadd.f32 %v7121_v35, %v6128_v34  ;;  %v1350_v1 = vpop.f32.mrb[89].mxu0  ;;  %v3419_v54 = vld [vmem:[#allocation2 + $0x410] sm:$0xff] }
 0x1ab   : > { %2853 = vrot.lane.b32.xlu1 %v7217_v30, %s6544_s13  ;;  %2346 = vst.msk [vmem:[#allocation2 + $0x5f0] sm:$0xff] %vm2154_vm2, %v2110_v59  ;;  %v2113_v62 = vsel %vm2024_vm1, 0.0, %v1854_v53  ;;  %v1351_v2 = vadd.f32 %v7121_v35, %v1350_v1  ;;  %v6129_v30 = vpop.f32.mrb[90].mxu0 }
 0x1ac   : > { %2855 = vrot.lane.b32.xlu0 %v7234_v44, %s6544_s13  ;;  %2353 = vst.msk [vmem:[#allocation2 + $0x628] sm:$0x1] %vm2156_vm3, %v1854_v53  ;;  %v2111_v9 = vsel %vm2024_vm1, 0.0, %v1852_v63  ;;  %2349 = vst.msk [vmem:[#allocation2 + $0x608] sm:$0x1] %vm2156_vm3, %v1852_v63  ;;  %v1599_v16 = vmax.f32 %v1359_v61, 0.0  ;;  %v1362_v17 = vadd.f32 %v7121_v35, %v6129_v30 }
 0x1ad   : > { %2352 = vst.msk [vmem:[#allocation2 + $0x620] sm:$0xff] %vm2154_vm2, %v2113_v62  ;;  %v7417_v6 = vpop.permute.xlu1 %2737  ;;  %2348 = vst.msk [vmem:[#allocation2 + $0x600] sm:$0xff] %vm2154_vm2, %v2111_v9  ;;  %v1597_v20 = vmax.f32 %v1351_v2, 0.0  ;;  %v1353_v41 = vpop.f32.mrb[91].mxu0  ;;  %v3451_v9 = vpack.c.bf16 %v3419_v54, %v3419_v54  ;;  %v7464_v54 = vld [vmem:[#allocation2 + $0x71] sm:$0xff] }
 0x1ae   : > { %8789 = vst [vmem:[#allocation11_spill] sm:$0xff] %v7417_v6  ;;  %v7419_v44 = vpop.permute.xlu0 %2743  ;;  %v1857_v25 = vrot.slane %v1599_v16, 7  ;;  %v1600_v26 = vmax.f32 %v1362_v17, 0.0  ;;  %v1354_v27 = vadd.f32 %v7121_v35, %v1353_v41  ;;  %v3454_v16 = vpack.c.bf16 %v3422_v58, %v3422_v58 }
 0x1af   : > { %2849 = vrot.lane.b32.xlu1 %v7222_v37, %s6544_s13  ;;  %v1855_v38 = vrot.slane %v1597_v20, 7  ;;  %v7454_v20 = vld [vmem:[#allocation2 + $0x31] sm:$0xff] }
 0x1b0   : > { %2851 = vrot.lane.b32.xlu0 %v7242_v52, %s6544_s13  ;;  %v2116_v47 = vsel %vm2024_vm1, 0.0, %v1857_v25  ;;  %2361 = vst.msk [vmem:[#allocation2 + $0x668] sm:$0x1] %vm2156_vm3, %v1857_v25  ;;  %v1858_v53 = vrot.slane %v1600_v26, 7  ;;  %v1598_v37 = vmax.f32 %v1354_v27, 0.0  ;;  %v7457_v27 = vld [vmem:[#allocation2 + $0x41] sm:$0xff] }
 0x1b1   : > { %v7430_v39 = vpop.permute.xlu1 %3769  ;;  %2360 = vst.msk [vmem:[#allocation2 + $0x660] sm:$0xff] %vm2154_vm2, %v2116_v47  ;;  %v2114_v52 = vsel %vm2024_vm1, 0.0, %v1855_v38  ;;  %v6132_v59 = vpop.f32.mrb[92].mxu0 }
 0x1b2   : > { %v7432_v40 = vpop.permute.xlu0 %2739  ;;  %2357 = vst.msk [vmem:[#allocation2 + $0x648] sm:$0x1] %vm2156_vm3, %v1855_v38  ;;  %v2117_v34 = vsel %vm2024_vm1, 0.0, %v1858_v53  ;;  %2363 = vst.msk [vmem:[#allocation2 + $0x678] sm:$0x1] %vm2156_vm3, %v1858_v53  ;;  %v1856_v62 = vrot.slane %v1598_v37, 7  ;;  %v1375_v61 = vadd.f32 %v7121_v35, %v6132_v59 }
 0x1b3   : > { %3689 = vrot.lane.b32.xlu1 %v3453_v36, %s6544_s13  ;;  %2356 = vst.msk [vmem:[#allocation2 + $0x640] sm:$0xff] %vm2154_vm2, %v2114_v52  ;;  %v1366_v63 = vpop.f32.mrb[93].mxu0  ;;  %2362 = vst.msk [vmem:[#allocation2 + $0x670] sm:$0xff] %vm2154_vm2, %v2117_v34 }
 0x1b4   : > { %3695 = vrot.lane.b32.xlu0 %v3456_v42, %s6544_s13  ;;  %v1367_v1 = vadd.f32 %v7121_v35, %v1366_v63  ;;  %v6133_v2 = vpop.f32.mrb[94].mxu0  ;;  %v2115_v17 = vsel %vm2024_vm1, 0.0, %v1856_v62  ;;  %2359 = vst.msk [vmem:[#allocation2 + $0x658] sm:$0x1] %vm2156_vm3, %v1856_v62  ;;  %v1603_v41 = vmax.f32 %v1375_v61, 0.0  ;;  %v3363_v42 = vld [vmem:[#allocation2 + $0x541] sm:$0xff] }
 0x1b5   : > { %v7447_v30 = vpop.permute.xlu1 %2749  ;;  %v1378_v18 = vadd.f32 %v7121_v35, %v6133_v2  ;;  %2358 = vst.msk [vmem:[#allocation2 + $0x650] sm:$0xff] %vm2154_vm2, %v2115_v17  ;;  %v1369_v26 = vpop.f32.mrb[95].mxu0  ;;  %v7472_v61 = vld [vmem:[#allocation2 + $0x81] sm:$0xff] }
 0x1b6   : > { %v7449_v8 = vpop.permute.xlu0 %3775  ;;  %v1601_v25 = vmax.f32 %v1367_v1, 0.0  ;;  %v1370_v38 = vadd.f32 %v7121_v35, %v1369_v26  ;;  %v1861_v47 = vrot.slane %v1603_v41, 7  ;;  %v7474_v35 = vld [vmem:[#allocation2 + $0x51] sm:$0xff]  ;;  %v3395_v41 = vpack.c.bf16 %v3363_v42, %v3363_v42  ;;  %v7504_v42 = vld [vmem:[%s8777_s2] ss:$0 sm:$0xff] }
 0x1b7   : > { %3685 = vrot.lane.b32.xlu1 %v3451_v9, %s6544_s13  ;;  %v1604_v36 = vmax.f32 %v1378_v18, 0.0  ;;  %v7482_v18 = vld [vmem:[#allocation2 + $0x1d0] sm:$0xff] }
 0x1b8   : > { %3691 = vrot.lane.b32.xlu0 %v3454_v16, %s6544_s13  ;;  %v1859_v53 = vrot.slane %v1601_v25, 7  ;;  %v4133_v59 = vld [vmem:[#allocation2 + $0x661] sm:$0xff]  ;;  %v1602_v62 = vmax.f32 %v1370_v38, 0.0  ;;  %v2120_v9 = vsel %vm2024_vm1, 0.0, %v1861_v47  ;;  %2369 = vst.msk [vmem:[#allocation2 + $0x6a8] sm:$0x1] %vm2156_vm3, %v1861_v47 }
 0x1b9   : > { %v7466_v58 = vpop.permute.xlu1 %2745  ;;  %v1862_v34 = vrot.slane %v1604_v36, 7  ;;  %v7476_v1 = vpack.c.bf16 %v4133_v59, %v4133_v59  ;;  %v6136_v17 = vpop.f32.mrb[96].mxu0  ;;  %2368 = vst.msk [vmem:[#allocation2 + $0x6a0] sm:$0xff] %vm2154_vm2, %v2120_v9 }
 0x1ba   : > { %v7468_v52 = vpop.permute.xlu0 %3771  ;;  %v4131_v2 = vld [vmem:[#allocation2 + $0x641] sm:$0xff]  ;;  %v2118_v16 = vsel %vm2024_vm1, 0.0, %v1859_v53  ;;  %2365 = vst.msk [vmem:[#allocation2 + $0x688] sm:$0x1] %vm2156_vm3, %v1859_v53  ;;  %v4134_v26 = vld [vmem:[#allocation2 + $0x671] sm:$0xff]  ;;  %v1860_v38 = vrot.slane %v1602_v62, 7  ;;  %v1391_v59 = vadd.f32 %v7504_v42, %v6136_v17 }
 0x1bb   : > { %2861 = vrot.lane.b32.xlu1 %v7257_v12, %s6544_s13  ;;  %v7488_v25 = vpack.c.bf16 %v4131_v2, %v4131_v2  ;;  %2364 = vst.msk [vmem:[#allocation2 + $0x680] sm:$0xff] %vm2154_vm2, %v2118_v16  ;;  %v2121_v36 = vsel %vm2024_vm1, 0.0, %v1862_v34  ;;  %v1382_v47 = vpop.f32.mrb[97].mxu0  ;;  %v2657_v53 = vld [vmem:[#allocation2 + $0x540] sm:$0xff]  ;;  %v3423_v12 = vld [vmem:[#allocation2 + $0x450] sm:$0xff] }
 0x1bc   : > { %2859 = vrot.lane.b32.xlu0 %v7278_v46, %s6544_s13  ;;  %2371 = vst.msk [vmem:[#allocation2 + $0x6b8] sm:$0x1] %vm2156_vm3, %v1862_v34  ;;  %v7498_v46 = vpack.c.bf16 %v4134_v26, %v4134_v26  ;;  %v1383_v34 = vadd.f32 %v7504_v42, %v1382_v47  ;;  %v6137_v62 = vpop.f32.mrb[98].mxu0  ;;  %v4132_v63 = vld [vmem:[#allocation2 + $0x651] sm:$0xff]  ;;  %v2119_v17 = vsel %vm2024_vm1, 0.0, %v1860_v38  ;;  %v1607_v37 = vmax.f32 %v1391_v59, 0.0 }
 0x1bd   : > { %4198 = vst.msk [vmem:[#allocation3 + $0xe0] sm:$0xf] %vm4179_vm4, %v7476_v1  ;;  %v7512_v16 = vpop.permute.xlu1 %3777  ;;  %4196 = vst.msk [vmem:[#allocation3 + $0xc8] sm:$0xf] %vm4179_vm4, %v7488_v25  ;;  %v1394_v47 = vadd.f32 %v7504_v42, %v6137_v62  ;;  %v7525_v9 = vpack.c.bf16 %v4132_v63, %v4132_v63  ;;  %v1385_v6 = vpop.f32.mrb[99].mxu0  ;;  %v7531_v62 = vld [vmem:[#allocation2 + $0x521] sm:$0xff]  ;;  %v7534_v63 = vpack.c.bf16 %v3423_v12, %v3423_v12 }
 0x1be   : > { %2370 = vst.msk [vmem:[#allocation2 + $0x6b0] sm:$0xff] %vm2154_vm2, %v2121_v36  ;;  %v7514_v26 = vpop.permute.xlu0 %2747  ;;  %v3425_v36 = vld [vmem:[#allocation2 + $0x470] sm:$0xff]  ;;  %2366 = vst.msk [vmem:[#allocation2 + $0x690] sm:$0xff] %vm2154_vm2, %v2119_v17  ;;  %v1605_v4 = vmax.f32 %v1383_v34, 0.0  ;;  %v1386_v32 = vadd.f32 %v7504_v42, %v1385_v6  ;;  %v1865_v59 = vrot.slane %v1607_v37, 7  ;;  %v3393_v37 = vpack.c.bf16 %v7531_v62, %v7531_v62 }
 0x1bf   : > { %2367 = vst.msk [vmem:[#allocation2 + $0x698] sm:$0x1] %vm2156_vm3, %v1860_v38  ;;  %2857 = vrot.lane.b32.xlu1 %v7262_v21, %s6544_s13  ;;  %v2689_v38 = vpack.c.bf16 %v2657_v53, %v2657_v53  ;;  %v1608_v2 = vmax.f32 %v1394_v47, 0.0  ;;  %v3457_v50 = vpack.c.bf16 %v3425_v36, %v3425_v36  ;;  %v8790_v21 = vpack.c.bf16 %v7454_v20, %v7454_v20 }
 0x1c0   : > { %4199 = vst.msk [vmem:[#allocation3 + $0xec] sm:$0xf] %vm4179_vm4, %v7498_v46  ;;  %3607 = vrot.lane.b32.xlu0 %v3395_v41, %s6543_s9  ;;  %4197 = vst.msk [vmem:[#allocation3 + $0xd4] sm:$0xf] %vm4179_vm4, %v7525_v9  ;;  %v1863_v34 = vrot.slane %v1605_v4, 7  ;;  %v8791_v53 = vpack.c.bf16 %v7457_v27, %v7457_v27  ;;  %v1606_v47 = vmax.f32 %v1386_v32, 0.0 }
 0x1c1   : > { %v3835_v41 = vsel %vm2154_vm2, %v8790_v21, %v7307_v10  ;;  %v7550_v12 = vpop.permute.xlu1 %3773  ;;  %v1866_v17 = vrot.slane %v1608_v2, 7  ;;  %v4137_v20 = vld [vmem:[#allocation2 + $0x6a1] sm:$0xff]  ;;  %v2124_v10 = vsel %vm2024_vm1, 0.0, %v1865_v59  ;;  %2379 = vst.msk [vmem:[#allocation2 + $0x6f8] sm:$0x1] %vm2156_vm3, %v1865_v59 }
 0x1c2   : > { %v7548_v6 = vsel %vm2154_vm2, %v8791_v53, %v7316_v14  ;;  %v3672_v36 = vpop.permute.xlu0 %3671  ;;  %v4135_v19 = vld [vmem:[#allocation2 + $0x681] sm:$0xff]  ;;  %v2122_v27 = vsel %vm2024_vm1, 0.0, %v1863_v34  ;;  %2375 = vst.msk [vmem:[#allocation2 + $0x6d8] sm:$0x1] %vm2156_vm3, %v1863_v34  ;;  %v6140_v14 = vpop.f32.mrb[100].mxu0  ;;  %v7565_v62 = vpack.c.bf16 %v4137_v20, %v4137_v20 }
 0x1c3   : > { %v3928_v4 = vsel %vm771_vm0, %v3835_v41, %v3672_v36  ;;  %3697 = vrot.lane.b32.xlu1 %v3457_v50, %s6544_s13  ;;  %v7563_v32 = vld [vmem:[#allocation2 + $0x520] sm:$0xff]  ;;  %v7567_v21 = vpack.c.bf16 %v4135_v19, %v4135_v19  ;;  %2378 = vst.msk [vmem:[#allocation2 + $0x6f0] sm:$0xff] %vm2154_vm2, %v2124_v10  ;;  %2374 = vst.msk [vmem:[#allocation2 + $0x6d0] sm:$0xff] %vm2154_vm2, %v2122_v27  ;;  %v2125_v59 = vsel %vm2024_vm1, 0.0, %v1866_v17  ;;  %v3364_v27 = vld [vmem:[#allocation2 + $0x551] sm:$0xff] }
 0x1c4   : > { %v3994_v2 = vsel %vm3151_vm5, %v3928_v4, %v7400_v49  ;;  %2963 = vrot.lane.b32.xlu0 %v2689_v38, %s6545_s16  ;;  %2381 = vst.msk [vmem:[#allocation2 + $0x708] sm:$0x1] %vm2156_vm3, %v1866_v17  ;;  %v1398_v49 = vpop.f32.mrb[101].mxu0  ;;  %v1864_v38 = vrot.slane %v1606_v47, 7  ;;  %v1407_v34 = vadd.f32 %v7504_v42, %v6140_v14  ;;  %v8792_v36 = vpack.c.bf16 %v7464_v54, %v7464_v54 }
 0x1c5   : > { %v4138_v41 = vld [vmem:[#allocation2 + $0x6b1] sm:$0xff]  ;;  %4085 = vst [vmem:[#allocation3 + $0x1c] sm:$0xf] %v3994_v2  ;;  %2380 = vst.msk [vmem:[#allocation2 + $0x700] sm:$0xff] %vm2154_vm2, %v2125_v59  ;;  %v1399_v19 = vadd.f32 %v7504_v42, %v1398_v49  ;;  %v6141_v53 = vpop.f32.mrb[102].mxu0  ;;  %v3002_v17 = vsel %vm2154_vm2, %v7067_v57, %v7389_v23  ;;  %v3005_v47 = vsel %vm2154_vm2, %v7101_v28, %v7419_v44  ;;  %v2838_v20 = vpop.permute.xlu1 %2837  ;;  %v7596_v23 = vld [vmem:[#allocation2 + $0x581] sm:$0xff] }
 0x1c6   : > { %v4170_v50 = vpack.c.bf16 %v4138_v41, %v4138_v41  ;;  %v7581_v4 = vsel %vm2154_vm2, %v8792_v36, %v7336_v56  ;;  %v2840_v10 = vpop.permute.xlu0 %2839  ;;  %4202 = vst.msk [vmem:[#allocation3 + $0x110] sm:$0xf] %vm4179_vm4, %v7565_v62  ;;  %4200 = vst.msk [vmem:[#allocation3 + $0xf8] sm:$0xf] %vm4179_vm4, %v7567_v21  ;;  %v4136_v54 = vld [vmem:[#allocation2 + $0x691] sm:$0xff]  ;;  %v1410_v56 = vadd.f32 %v7504_v42, %v6141_v53  ;;  %v2123_v44 = vsel %vm2024_vm1, 0.0, %v1864_v38 }
 0x1c7   : > { %v3094_v14 = vsel %vm771_vm0, %v3002_v17, %v2838_v20  ;;  %v3096_v57 = vsel %vm771_vm0, %v3005_v47, %v2840_v10  ;;  %v7599_v28 = vpack.c.bf16 %v4136_v54, %v4136_v54  ;;  %2377 = vst.msk [vmem:[#allocation2 + $0x6e8] sm:$0x1] %vm2156_vm3, %v1864_v38  ;;  %v1401_v2 = vpop.f32.mrb[103].mxu0  ;;  %3693 = vrot.lane.b32.xlu1 %v7534_v63, %s6544_s13  ;;  %v1611_v49 = vmax.f32 %v1407_v34, 0.0  ;;  %v7626_v54 = vld [vmem:[#allocation2 + $0x580] sm:$0xff] }
 0x1c8   : > { %4203 = vst.msk [vmem:[#allocation3 + $0x11c] sm:$0xf] %vm4179_vm4, %v4170_v50  ;;  %v3162_v41 = vsel %vm3151_vm5, %v3094_v14, %v7334_v55  ;;  %v3165_v59 = vsel %vm3151_vm5, %v3096_v57, %v7372_v7  ;;  %3603 = vrot.lane.b32.xlu0 %v3393_v37, %s6543_s9  ;;  %v1609_v50 = vmax.f32 %v1399_v19, 0.0  ;;  %v3396_v53 = vpack.c.bf16 %v3364_v27, %v3364_v27  ;;  %v2658_v27 = vld [vmem:[#allocation2 + $0x550] sm:$0xff] }
 0x1c9   : > { %2376 = vst.msk [vmem:[#allocation2 + $0x6e0] sm:$0xff] %vm2154_vm2, %v2123_v44  ;;  %3251 = vst [vmem:[#allocation3 + $0x24] sm:$0xf] %v3162_v41  ;;  %v2687_v38 = vpack.c.bf16 %v7563_v32, %v7563_v32  ;;  %v1612_v55 = vmax.f32 %v1410_v56, 0.0  ;;  %v1402_v7 = vadd.f32 %v7504_v42, %v1401_v2  ;;  %v8793_v37 = vpack.c.bf16 %v7482_v18, %v7482_v18  ;;  %v3674_v34 = vpop.permute.xlu1 %3673  ;;  %v6144_v18 = vpop.f32.mrb[104].mxu0 }
 0x1ca   : > { %3252 = vst [vmem:[#allocation3 + $0x30] sm:$0xf] %v3165_v59  ;;  %4201 = vst.msk [vmem:[#allocation3 + $0x104] sm:$0xf] %vm4179_vm4, %v7599_v28  ;;  %v2836_v19 = vpop.permute.xlu0 %2835  ;;  %v3399_v17 = vpack.c.bf16 %v7596_v23, %v7596_v23  ;;  %v1869_v47 = vrot.slane %v1611_v49, 7  ;;  %v1867_v20 = vrot.slane %v1609_v50, 7  ;;  %v3930_v32 = vsel %vm771_vm0, %v7548_v6, %v3674_v34 }
 0x1cb   : > { %v2999_v36 = vsel %vm2154_vm2, %v8793_v37, %v7432_v40  ;;  %v1870_v56 = vrot.slane %v1612_v55, 7  ;;  %v1610_v14 = vmax.f32 %v1402_v7, 0.0  ;;  %v3997_v40 = vsel %vm3151_vm5, %v3930_v32, %v7430_v39  ;;  %3609 = vrot.lane.b32.xlu1 %v3396_v53, %s6543_s9  ;;  %v1414_v44 = vpop.f32.mrb[105].mxu0  ;;  %v3362_v55 = vld [vmem:[#allocation2 + $0x531] sm:$0xff] }
 0x1cc   : > { %v3092_v10 = vsel %vm771_vm0, %v2999_v36, %v2836_v19  ;;  %2959 = vrot.lane.b32.xlu0 %v2687_v38, %s6545_s16  ;;  %v2128_v6 = vsel %vm2024_vm1, 0.0, %v1869_v47  ;;  %2387 = vst.msk [vmem:[#allocation2 + $0x738] sm:$0x1] %vm2156_vm3, %v1869_v47  ;;  %v2126_v23 = vsel %vm2024_vm1, 0.0, %v1867_v20  ;;  %2383 = vst.msk [vmem:[#allocation2 + $0x718] sm:$0x1] %vm2156_vm3, %v1867_v20  ;;  %v1423_v2 = vadd.f32 %v7504_v42, %v6144_v18 }
 0x1cd   : > { %v3159_v57 = vsel %vm3151_vm5, %v3092_v10, %v7309_v13  ;;  %4086 = vst [vmem:[#allocation3 + $0x28] sm:$0xf] %v3997_v40  ;;  %2386 = vst.msk [vmem:[#allocation2 + $0x730] sm:$0xff] %vm2154_vm2, %v2128_v6  ;;  %v2129_v13 = vsel %vm2024_vm1, 0.0, %v1870_v56  ;;  %v1868_v39 = vrot.slane %v1610_v14, 7  ;;  %v1415_v41 = vadd.f32 %v7504_v42, %v1414_v44  ;;  %v6145_v59 = vpop.f32.mrb[106].mxu0  ;;  %v2846_v50 = vpop.permute.xlu1 %2845 }
 0x1ce   : > { %3250 = vst [vmem:[#allocation3 + $0x18] sm:$0xf] %v3159_v57  ;;  %2382 = vst.msk [vmem:[#allocation2 + $0x710] sm:$0xff] %vm2154_vm2, %v2126_v23  ;;  %v3014_v49 = vsel %vm2154_vm2, %v7110_v31, %v7447_v30  ;;  %v3680_v53 = vpop.permute.xlu0 %3679  ;;  %v2690_v38 = vpack.c.bf16 %v2658_v27, %v2658_v27  ;;  %v2693_v7 = vpack.c.bf16 %v7626_v54, %v7626_v54  ;;  %v7654_v19 = vld [vmem:[#allocation2 + $0x561] sm:$0xff]  ;;  %v1615_v30 = vmax.f32 %v1423_v2, 0.0  ;;  %v1417_v47 = vpop.f32.mrb[107].mxu0 }
 0x1cf   : > { %2389 = vst.msk [vmem:[#allocation2 + $0x748] sm:$0x1] %vm2156_vm3, %v1870_v56  ;;  %v1426_v37 = vadd.f32 %v7504_v42, %v6145_v59  ;;  %v3102_v36 = vsel %vm771_vm0, %v3014_v49, %v2846_v50  ;;  %v3936_v34 = vsel %vm771_vm0, %v7581_v4, %v3680_v53  ;;  %v2127_v31 = vsel %vm2024_vm1, 0.0, %v1868_v39  ;;  %2385 = vst.msk [vmem:[#allocation2 + $0x728] sm:$0x1] %vm2156_vm3, %v1868_v39  ;;  %v7671_v14 = vld [vmem:[#allocation2 + $0x61] sm:$0xff] }
 0x1d0   : > { %2388 = vst.msk [vmem:[#allocation2 + $0x740] sm:$0xff] %vm2154_vm2, %v2129_v13  ;;  %v3174_v20 = vsel %vm3151_vm5, %v3102_v36, %v7370_v60  ;;  %v4006_v32 = vsel %vm3151_vm5, %v3936_v34, %v7449_v8  ;;  %2965 = vrot.lane.b32.xlu1 %v2690_v38, %s6545_s16  ;;  %3615 = vrot.lane.b32.xlu0 %v3399_v17, %s6543_s9  ;;  %2384 = vst.msk [vmem:[#allocation2 + $0x720] sm:$0xff] %vm2154_vm2, %v2127_v31  ;;  %v1613_v4 = vmax.f32 %v1415_v41, 0.0  ;;  %v2656_v44 = vld [vmem:[#allocation2 + $0x530] sm:$0xff]  ;;  %v2659_v31 = vld [vmem:[#allocation2 + $0x560] sm:$0xff] }
 0x1d1   : > { %v1616_v10 = vmax.f32 %v1426_v37, 0.0  ;;  %v8794_v27 = vpack.c.bf16 %v7474_v35, %v7474_v35  ;;  %3255 = vst [vmem:[#allocation3 + $0x54] sm:$0xf] %v3174_v20  ;;  %4089 = vst [vmem:[#allocation3 + $0x4c] sm:$0xf] %v4006_v32  ;;  %v3394_v60 = vpack.c.bf16 %v3362_v55, %v3362_v55  ;;  %v1873_v56 = vrot.slane %v1615_v30, 7  ;;  %v2842_v18 = vpop.permute.xlu1 %2841 }
 0x1d2   : > { %v1418_v8 = vadd.f32 %v7504_v42, %v1417_v47  ;;  %v3008_v17 = vsel %vm2154_vm2, %v7134_v45, %v7466_v58  ;;  %v3676_v40 = vpop.permute.xlu0 %3675  ;;  %v3397_v57 = vpack.c.bf16 %v7654_v19, %v7654_v19  ;;  %v1871_v35 = vrot.slane %v1613_v4, 7  ;;  %v6148_v2 = vpop.f32.mrb[108].mxu0  ;;  %v3368_v32 = vld [vmem:[#allocation2 + $0x591] sm:$0xff] }
 0x1d3   : > { %v3841_v54 = vsel %vm2154_vm2, %v8794_v27, %v7361_v33  ;;  %v1874_v6 = vrot.slane %v1616_v10, 7  ;;  %v3098_v33 = vsel %vm771_vm0, %v3008_v17, %v2842_v18  ;;  %v2132_v13 = vsel %vm2024_vm1, 0.0, %v1873_v56  ;;  %2397 = vst.msk [vmem:[#allocation2 + $0x788] sm:$0x1] %vm2156_vm3, %v1873_v56  ;;  %v1430_v38 = vpop.f32.mrb[109].mxu0  ;;  %v3493_v56 = vld [vmem:[#allocation2 + $0x5d1] sm:$0xff] }
 0x1d4   : > { %v3932_v23 = vsel %vm771_vm0, %v3841_v54, %v3676_v40  ;;  %v1614_v39 = vmax.f32 %v1418_v8, 0.0  ;;  %v3168_v45 = vsel %vm3151_vm5, %v3098_v33, %v7398_v48  ;;  %3605 = vrot.lane.b32.xlu1 %v3394_v60, %s6543_s9  ;;  %2971 = vrot.lane.b32.xlu0 %v2693_v7, %s6545_s16  ;;  %2396 = vst.msk [vmem:[#allocation2 + $0x780] sm:$0xff] %vm2154_vm2, %v2132_v13  ;;  %v2130_v41 = vsel %vm2024_vm1, 0.0, %v1871_v35  ;;  %v6393_v49 = vld [vmem:[#allocation3 + $0x1c] ss:$12 sps:$4 sm:$0xff]   ;;  %v6149_v4 = vpop.f32.mrb[110].mxu0 }
 0x1d5   : > { %v4000_v58 = vsel %vm3151_vm5, %v3932_v23, %v7468_v52  ;;  %2393 = vst.msk [vmem:[#allocation2 + $0x768] sm:$0x1] %vm2156_vm3, %v1871_v35  ;;  %v2133_v59 = vsel %vm2024_vm1, 0.0, %v1874_v6  ;;  %2399 = vst.msk [vmem:[#allocation2 + $0x798] sm:$0x1] %vm2156_vm3, %v1874_v6  ;;  %v3318_v48 = vpack.c.bf16 %v7671_v14, %v7671_v14  ;;  %v1439_v53 = vadd.f32 %v7504_v42, %v6148_v2  ;;  %v3682_v36 = vpop.permute.xlu1 %3681  ;;  %v1433_v54 = vpop.f32.mrb[111].mxu0 }
 0x1d6   : > { %3253 = vst [vmem:[#allocation3 + $0x3c] sm:$0xf] %v3168_v45  ;;  %4087 = vst [vmem:[#allocation3 + $0x34] sm:$0xf] %v4000_v58  ;;  %v6391_v52 = vld [vmem:[#allocation3 + $0x18] ss:$12 sps:$4 sm:$0xff]   ;;  %v8795_v55 = vpack.c.bf16 %v7472_v61, %v7472_v61  ;;  %v3011_v37 = vsel %vm2154_vm2, %v7163_v11, %v7514_v26  ;;  %v2844_v34 = vpop.permute.xlu0 %2843  ;;  %v2688_v19 = vpack.c.bf16 %v2656_v44, %v2656_v44  ;;  %4755 = vmatprep.mubr.bf16.mxu1 %v6393_v49 }
 0x1d7   : > { %2392 = vst.msk [vmem:[#allocation2 + $0x760] sm:$0xff] %vm2154_vm2, %v2130_v41  ;;  %2398 = vst.msk [vmem:[#allocation2 + $0x790] sm:$0xff] %vm2154_vm2, %v2133_v59  ;;  %v1872_v50 = vrot.slane %v1614_v39, 7  ;;  %v1431_v30 = vadd.f32 %v7504_v42, %v1430_v38  ;;  %v3100_v20 = vsel %vm771_vm0, %v3011_v37, %v2844_v34  ;;  %v1442_v27 = vadd.f32 %v7504_v42, %v6149_v4  ;;  %v2662_v6 = vld [vmem:[#allocation2 + $0x590] sm:$0xff] }
 0x1d8   : > { %v3850_v7 = vsel %vm2154_vm2, %v8795_v55, %v7359_v29  ;;  %v1619_v29 = vmax.f32 %v1439_v53, 0.0  ;;  %v3171_v26 = vsel %vm3151_vm5, %v3100_v20, %v7344_v5  ;;  %2961 = vrot.lane.b32.xlu1 %v2688_v19, %s6545_s16  ;;  %3611 = vrot.lane.b32.xlu0 %v3397_v57, %s6543_s9  ;;  %v2691_v60 = vpack.c.bf16 %v2659_v31, %v2659_v31  ;;  %v2453_v13 = vld [vmem:[#allocation2 + $0x3f0] sm:$0xff]  ;;  %v2530_v20 = vld [vmem:[#allocation2 + $0x5e1] sm:$0xff] }
 0x1d9   : > { %v3938_v47 = vsel %vm771_vm0, %v3850_v7, %v3682_v36  ;;  %v2131_v61 = vsel %vm2024_vm1, 0.0, %v1872_v50  ;;  %2395 = vst.msk [vmem:[#allocation2 + $0x778] sm:$0x1] %vm2156_vm3, %v1872_v50  ;;  %v1617_v10 = vmax.f32 %v1431_v30, 0.0  ;;  %3254 = vst [vmem:[#allocation3 + $0x48] sm:$0xf] %v3171_v26  ;;  %4756 = vmatmul.mubr.bf16.vlgmr.msra.gmra.mrb[0].mxu1 %v6391_v52  ;;  %v3844_v5 = vsel %vm2154_vm2, %v3318_v48, %v7387_v22  ;;  %v3678_v14 = vpop.permute.xlu1 %3677 }
 0x1da   : > { %v4009_v11 = vsel %vm3151_vm5, %v3938_v47, %v7512_v16  ;;  %2394 = vst.msk [vmem:[#allocation2 + $0x770] sm:$0xff] %vm2154_vm2, %v2131_v61  ;;  %v1877_v8 = vrot.slane %v1619_v29, 7  ;;  %v1434_v16 = vadd.f32 %v7504_v42, %v1433_v54  ;;  %v7722_v17 = vpop.permute.xlu0 %3591  ;;  %v3400_v18 = vpack.c.bf16 %v3368_v32, %v3368_v32  ;;  %v6152_v44 = vpop.f32.mrb[112].mxu0  ;;  %v3491_v58 = vld [vmem:[#allocation2 + $0x5b1] sm:$0xff] }
 0x1db   : > { %4090 = vst [vmem:[#allocation3 + $0x58] sm:$0xf] %v4009_v11  ;;  %v1875_v40 = vrot.slane %v1617_v10, 7  ;;  %v1620_v57 = vmax.f32 %v1442_v27, 0.0  ;;  %v3934_v35 = vsel %vm771_vm0, %v3844_v5, %v3678_v14  ;;  %v7731_v22 = vpack.c.bf16 %v3493_v56, %v3493_v56  ;;  %v1446_v45 = vpop.f32.mrb[113].mxu0  ;;  %v3366_v7 = vld [vmem:[#allocation2 + $0x571] sm:$0xff] }
 0x1dc   : > { %v2136_v33 = vsel %vm2024_vm1, 0.0, %v1877_v8  ;;  %2405 = vst.msk [vmem:[#allocation2 + $0x7c8] sm:$0x1] %vm2156_vm3, %v1877_v8  ;;  %v1618_v23 = vmax.f32 %v1434_v16, 0.0  ;;  %v4003_v39 = vsel %vm3151_vm5, %v3934_v35, %v7550_v12  ;;  %3617 = vrot.lane.b32.xlu1 %v3400_v18, %s6543_s9  ;;  %2967 = vrot.lane.b32.xlu0 %v2691_v60, %s6545_s16  ;;  %v6153_v12 = vpop.f32.mrb[114].mxu0  ;;  %v2694_v49 = vpack.c.bf16 %v2662_v6, %v2662_v6  ;;  %v2660_v54 = vld [vmem:[#allocation2 + $0x570] sm:$0xff] }
 0x1dd   : > { %2404 = vst.msk [vmem:[#allocation2 + $0x7c0] sm:$0xff] %vm2154_vm2, %v2136_v33  ;;  %v2134_v2 = vsel %vm2024_vm1, 0.0, %v1875_v40  ;;  %4088 = vst [vmem:[#allocation3 + $0x40] sm:$0xf] %v4003_v39  ;;  %v1878_v41 = vrot.slane %v1620_v57, 7  ;;  %v7737_v48 = vpop.permute.xlu1 %3593  ;;  %v1455_v50 = vadd.f32 %v7504_v42, %v6152_v44  ;;  %v1447_v53 = vadd.f32 %v7504_v42, %v1446_v45  ;;  %v1449_v34 = vpop.f32.mrb[115].mxu0 }
 0x1de   : > { %2401 = vst.msk [vmem:[#allocation2 + $0x7a8] sm:$0x1] %vm2156_vm3, %v1875_v40  ;;  %v1876_v59 = vrot.slane %v1618_v23, 7  ;;  %v7739_v52 = vpop.permute.xlu0 %2947  ;;  %v1458_v38 = vadd.f32 %v7504_v42, %v6153_v12  ;;  %v2485_v55 = vpack.c.bf16 %v2453_v13, %v2453_v13  ;;  %v7751_v19 = vpack.c.bf16 %v3491_v58, %v3491_v58  ;;  %v6396_v5 = vld [vmem:[#allocation3 + $0x30] ss:$12 sps:$4 sm:$0xff]   ;;  %v2528_v18 = vld [vmem:[#allocation2 + $0x5c1] sm:$0xff] }
 0x1df   : > { %2400 = vst.msk [vmem:[#allocation2 + $0x7a0] sm:$0xff] %vm2154_vm2, %v2134_v2  ;;  %v2137_v37 = vsel %vm2024_vm1, 0.0, %v1878_v41  ;;  %v1623_v31 = vmax.f32 %v1455_v50, 0.0  ;;  %v1621_v30 = vmax.f32 %v1447_v53, 0.0  ;;  %v1450_v47 = vadd.f32 %v7504_v42, %v1449_v34 }
 0x1e0   : > { %2407 = vst.msk [vmem:[#allocation2 + $0x7d8] sm:$0x1] %vm2156_vm3, %v1878_v41  ;;  %v2135_v36 = vsel %vm2024_vm1, 0.0, %v1876_v59  ;;  %2403 = vst.msk [vmem:[#allocation2 + $0x7b8] sm:$0x1] %vm2156_vm3, %v1876_v59  ;;  %2973 = vrot.lane.b32.xlu1 %v2694_v49, %s6545_s16  ;;  %3799 = vrot.lane.b32.xlu0 %v7731_v22, %s6545_s16  ;;  %v1624_v32 = vmax.f32 %v1458_v38, 0.0  ;;  %v3398_v4 = vpack.c.bf16 %v3366_v7, %v3366_v7 }
 0x1e1   : > { %2406 = vst.msk [vmem:[#allocation2 + $0x7d0] sm:$0xff] %vm2154_vm2, %v2137_v37  ;;  %2402 = vst.msk [vmem:[#allocation2 + $0x7b0] sm:$0xff] %vm2154_vm2, %v2135_v36  ;;  %v7756_v61 = vpop.permute.xlu1 %2949  ;;  %v1881_v11 = vrot.slane %v1623_v31, 7  ;;  %v1879_v26 = vrot.slane %v1621_v30, 7  ;;  %v1622_v10 = vmax.f32 %v1450_v47, 0.0  ;;  %v3017_v27 = vsel %vm2154_vm2, %v2485_v55, %v7136_v0  ;;  %v6156_v56 = vpop.f32.mrb[116].mxu0 }
 0x1e2   : > { %v7758_v29 = vpop.permute.xlu0 %3587  ;;  %v1882_v60 = vrot.slane %v1624_v32, 7  ;;  %v7765_v16 = vpack.c.bf16 %v2530_v20, %v2530_v20  ;;  %v1471_v0 = vadd.f32 %v7504_v42, %v6156_v56  ;;  %v1462_v6 = vpop.f32.mrb[117].mxu0  ;;  %v3104_v33 = vsel %vm771_vm0, %v3017_v27, %v7155_v3  ;;  %v6397_v58 = vld [vmem:[#allocation3 + $0x4c] ss:$12 sps:$4 sm:$0xff]  }
 0x1e3   : > { %v2140_v14 = vsel %vm2024_vm1, 0.0, %v1881_v11  ;;  %2415 = vst.msk [vmem:[#allocation2 + $0x818] sm:$0x1] %vm2156_vm3, %v1881_v11  ;;  %2411 = vst.msk [vmem:[#allocation2 + $0x7f8] sm:$0x1] %vm2156_vm3, %v1879_v26  ;;  %v2138_v40 = vsel %vm2024_vm1, 0.0, %v1879_v26  ;;  %v2692_v13 = vpack.c.bf16 %v2660_v54, %v2660_v54  ;;  %v1463_v2 = vadd.f32 %v7504_v42, %v1462_v6 }
 0x1e4   : > { %3613 = vrot.lane.b32.xlu1 %v3398_v4, %s6543_s9  ;;  %3795 = vrot.lane.b32.xlu0 %v7751_v19, %s6545_s16  ;;  %v6394_v8 = vld [vmem:[#allocation3 + $0x34] ss:$12 sps:$4 sm:$0xff]   ;;  %2414 = vst.msk [vmem:[#allocation2 + $0x810] sm:$0xff] %vm2154_vm2, %v2140_v14  ;;  %v2141_v57 = vsel %vm2024_vm1, 0.0, %v1882_v60  ;;  %v1880_v35 = vrot.slane %v1622_v10, 7  ;;  %2410 = vst.msk [vmem:[#allocation2 + $0x7f0] sm:$0xff] %vm2154_vm2, %v2138_v40  ;;  %v7788_v59 = vpack.c.bf16 %v2528_v18, %v2528_v18 }
 0x1e5   : > { %2417 = vst.msk [vmem:[#allocation2 + $0x828] sm:$0x1] %vm2156_vm3, %v1882_v60  ;;  %v7777_v23 = vpop.permute.xlu1 %3589  ;;  %4763 = vmatprep.mubr.bf16.mxu1 %v6394_v8  ;;  %v1627_v39 = vmax.f32 %v1471_v0, 0.0  ;;  %v6157_v3 = vpop.f32.mrb[118].mxu0  ;;  %v1625_v49 = vmax.f32 %v1463_v2, 0.0  ;;  %v3497_v38 = vld [vmem:[#allocation2 + $0x611] sm:$0xff] }
 0x1e6   : > { %v2944_v44 = vpop.permute.xlu0 %2943  ;;  %2416 = vst.msk [vmem:[#allocation2 + $0x820] sm:$0xff] %vm2154_vm2, %v2141_v57  ;;  %4764 = vmatmul.mubr.bf16.gmra.mrb[4].mxu1 %v6396_v5  ;;  %v2139_v41 = vsel %vm2024_vm1, 0.0, %v1880_v35  ;;  %v1474_v50 = vadd.f32 %v7504_v42, %v6157_v3  ;;  %v1465_v53 = vpop.f32.mrb[119].mxu0  ;;  %v4224_v7 = vld [vmem:[#allocation3 + $0x48] sm:$0xff]  ;;  %v4226_v37 = vld [vmem:[#allocation3 + $0x54] sm:$0xff]  ;;  %v7804_v4 = vpack.c.bf16 %v3497_v38, %v3497_v38 }
 0x1e7   : > { %v3177_v45 = vsel %vm3151_vm5, %v3104_v33, %v2944_v44  ;;  %2413 = vst.msk [vmem:[#allocation2 + $0x808] sm:$0x1] %vm2156_vm3, %v1880_v35  ;;  %v1885_v12 = vrot.slane %v1627_v39, 7  ;;  %4771 = vmatprep.mubr.bf16.mxu1 %v6397_v58  ;;  %v1466_v55 = vadd.f32 %v7504_v42, %v1465_v53  ;;  %v1883_v30 = vrot.slane %v1625_v49, 7  ;;  %v3495_v60 = vld [vmem:[#allocation2 + $0x5f1] sm:$0xff]  ;;  %v2532_v39 = vld [vmem:[#allocation2 + $0x601] sm:$0xff] }
 0x1e8   : > { %3256 = vst [vmem:[#allocation3 + $0x60] sm:$0xf] %v3177_v45  ;;  %2969 = vrot.lane.b32.xlu1 %v2692_v13, %s6545_s16  ;;  %2775 = vrot.lane.b32.xlu0 %v7765_v16, %s6543_s9  ;;  %2412 = vst.msk [vmem:[#allocation2 + $0x800] sm:$0xff] %vm2154_vm2, %v2139_v41  ;;  %v1628_v47 = vmax.f32 %v1474_v50, 0.0  ;;  %v5705_v54 = vcombine.low %v4224_v7, %v4226_v37  ;;  %v7825_v33 = vpack.c.bf16 %v3495_v60, %v3495_v60  ;;  %v3428_v37 = vld [vmem:[#allocation2 + $0x660] sm:$0xff] }
 0x1e9   : > { %v7793_v36 = vpop.permute.xlu1 %2945  ;;  %v2144_v31 = vsel %vm2024_vm1, 0.0, %v1885_v12  ;;  %2423 = vst.msk [vmem:[#allocation2 + $0x858] sm:$0x1] %vm2156_vm3, %v1885_v12  ;;  %v1626_v20 = vmax.f32 %v1466_v55, 0.0  ;;  %v6160_v32 = vpop.f32.mrb[120].mxu0  ;;  %v2142_v11 = vsel %vm2024_vm1, 0.0, %v1883_v30  ;;  %v7842_v53 = vpack.c.bf16 %v2532_v39, %v2532_v39 }
 0x1ea   : > { %v7795_v34 = vpop.permute.xlu0 %3599  ;;  %2422 = vst.msk [vmem:[#allocation2 + $0x850] sm:$0xff] %vm2154_vm2, %v2144_v31  ;;  %v1886_v26 = vrot.slane %v1628_v47, 7  ;;  %v1487_v10 = vadd.f32 %v7504_v42, %v6160_v32  ;;  %v1478_v27 = vpop.f32.mrb[121].mxu0  ;;  %2418 = vst.msk [vmem:[#allocation2 + $0x830] sm:$0xff] %vm2154_vm2, %v2142_v11 }
 0x1eb   : > { %2419 = vst.msk [vmem:[#allocation2 + $0x838] sm:$0x1] %vm2156_vm3, %v1883_v30  ;;  %v1884_v56 = vrot.slane %v1626_v20, 7  ;;  %v6161_v8 = vpop.f32.mrb[122].mxu0 }
 0x1ec   : > { %2773 = vrot.lane.b32.xlu1 %v7731_v22, %s6543_s9  ;;  %2771 = vrot.lane.b32.xlu0 %v7788_v59, %s6543_s9  ;;  %v1479_v22 = vadd.f32 %v7504_v42, %v1478_v27  ;;  %v2145_v0 = vsel %vm2024_vm1, 0.0, %v1886_v26  ;;  %2425 = vst.msk [vmem:[#allocation2 + $0x868] sm:$0x1] %vm2156_vm3, %v1886_v26  ;;  %v1631_v18 = vmax.f32 %v1487_v10, 0.0  ;;  %v1490_v35 = vadd.f32 %v7504_v42, %v6161_v8  ;;  %v1481_v6 = vpop.f32.mrb[123].mxu0  ;;  %v3426_v8 = vld [vmem:[#allocation2 + $0x640] sm:$0xff] }
 0x1ed   : > { %v7811_v5 = vpop.permute.xlu1 %3601  ;;  %2424 = vst.msk [vmem:[#allocation2 + $0x860] sm:$0xff] %vm2154_vm2, %v2145_v0  ;;  %v2143_v40 = vsel %vm2024_vm1, 0.0, %v1884_v56  ;;  %v1482_v13 = vadd.f32 %v7504_v42, %v1481_v6  ;;  %v3458_v39 = vpack.c.bf16 %v3426_v8, %v3426_v8  ;;  %v3430_v8 = vld [vmem:[#allocation2 + $0x680] sm:$0xff] }
 0x1ee   : > { %v7813_v14 = vpop.permute.xlu0 %2955  ;;  %4772 = vmatmul.mubr.bf16.gmra.mrb[8].mxu1 %v5705_v54  ;;  %2421 = vst.msk [vmem:[#allocation2 + $0x848] sm:$0x1] %vm2156_vm3, %v1884_v56  ;;  %v1629_v57 = vmax.f32 %v1479_v22, 0.0  ;;  %v1889_v44 = vrot.slane %v1631_v18, 7  ;;  %v1632_v45 = vmax.f32 %v1490_v35, 0.0  ;;  %v3460_v54 = vpack.c.bf16 %v3428_v37, %v3428_v37 }
 0x1ef   : > { %2420 = vst.msk [vmem:[#allocation2 + $0x840] sm:$0xff] %vm2154_vm2, %v2143_v40 }
 0x1f0   : > { %2769 = vrot.lane.b32.xlu1 %v7751_v19, %s6543_s9  ;;  %3807 = vrot.lane.b32.xlu0 %v7804_v4, %s6545_s16  ;;  %v1887_v2 = vrot.slane %v1629_v57, 7  ;;  %v2148_v3 = vsel %vm2024_vm1, 0.0, %v1889_v44  ;;  %2433 = vst.msk [vmem:[#allocation2 + $0x8a8] sm:$0x1] %vm2156_vm3, %v1889_v44  ;;  %v1630_v19 = vmax.f32 %v1482_v13, 0.0  ;;  %v1890_v49 = vrot.slane %v1632_v45, 7 }
 0x1f1   : > { %v7829_v58 = vpop.permute.xlu1 %2957  ;;  %2432 = vst.msk [vmem:[#allocation2 + $0x8a0] sm:$0xff] %vm2154_vm2, %v2148_v3  ;;  %v6164_v50 = vpop.f32.mrb[124].mxu0 }
 0x1f2   : > { %v7831_v41 = vpop.permute.xlu0 %3595  ;;  %v2146_v12 = vsel %vm2024_vm1, 0.0, %v1887_v2  ;;  %2429 = vst.msk [vmem:[#allocation2 + $0x888] sm:$0x1] %vm2156_vm3, %v1887_v2  ;;  %v1888_v38 = vrot.slane %v1630_v19, 7  ;;  %v1503_v55 = vadd.f32 %v7504_v42, %v6164_v50  ;;  %v1494_v7 = vpop.f32.mrb[125].mxu0  ;;  %v2149_v31 = vsel %vm2024_vm1, 0.0, %v1890_v49 }
 0x1f3   : > { %2428 = vst.msk [vmem:[#allocation2 + $0x880] sm:$0xff] %vm2154_vm2, %v2146_v12  ;;  %v1495_v30 = vadd.f32 %v7504_v42, %v1494_v7  ;;  %v6165_v47 = vpop.f32.mrb[126].mxu0  ;;  %2434 = vst.msk [vmem:[#allocation2 + $0x8b0] sm:$0xff] %vm2154_vm2, %v2149_v31 }
 0x1f4   : > { %3801 = vrot.lane.b32.xlu1 %v7765_v16, %s6545_s16  ;;  %3803 = vrot.lane.b32.xlu0 %v7825_v33, %s6545_s16  ;;  %2435 = vst.msk [vmem:[#allocation2 + $0x8b8] sm:$0x1] %vm2156_vm3, %v1890_v49  ;;  %v2147_v32 = vsel %vm2024_vm1, 0.0, %v1888_v38  ;;  %2431 = vst.msk [vmem:[#allocation2 + $0x898] sm:$0x1] %vm2156_vm3, %v1888_v38  ;;  %v1635_v11 = vmax.f32 %v1503_v55, 0.0  ;;  %v1506_v26 = vadd.f32 %v7504_v42, %v6165_v47 }
 0x1f5   : > { %v7849_v16 = vpop.permute.xlu1 %3597  ;;  %2430 = vst.msk [vmem:[#allocation2 + $0x890] sm:$0xff] %vm2154_vm2, %v2147_v32  ;;  %v1633_v10 = vmax.f32 %v1495_v30, 0.0  ;;  %v1497_v27 = vpop.f32.mrb[127].mxu0  ;;  %v3498_v55 = vld [vmem:[#allocation2 + $0x621] sm:$0xff] }
 0x1f6   : > { %v7851_v20 = vpop.permute.xlu0 %2951  ;;  %v1893_v60 = vrot.slane %v1635_v11, 7  ;;  %v1636_v56 = vmax.f32 %v1506_v26, 0.0  ;;  %v1498_v22 = vadd.f32 %v7504_v42, %v1497_v27  ;;  %v3530_v30 = vpack.c.bf16 %v3498_v55, %v3498_v55 }
 0x1f7   : > { %v1891_v0 = vrot.slane %v1633_v10, 7  ;;  %v3432_v10 = vld [vmem:[#allocation2 + $0x6a0] sm:$0xff] }
 0x1f8   : > { %3797 = vrot.lane.b32.xlu1 %v7788_v59, %s6545_s16  ;;  %2779 = vrot.lane.b32.xlu0 %v7842_v53, %s6543_s9  ;;  %v4141_v57 = vld [vmem:[#allocation2 + $0x8a1] sm:$0xff]  ;;  %v2152_v35 = vsel %vm2024_vm1, 0.0, %v1893_v60  ;;  %2441 = vst.msk [vmem:[#allocation2 + $0x8e8] sm:$0x1] %vm2156_vm3, %v1893_v60  ;;  %v1894_v59 = vrot.slane %v1636_v56, 7  ;;  %v1634_v6 = vmax.f32 %v1498_v22, 0.0 }
 0x1f9   : > { %v7863_v18 = vpop.permute.xlu1 %2953  ;;  %v7869_v44 = vpack.c.bf16 %v4141_v57, %v4141_v57  ;;  %2440 = vst.msk [vmem:[#allocation2 + $0x8e0] sm:$0xff] %vm2154_vm2, %v2152_v35  ;;  %v2150_v42 = vsel %vm2024_vm1, 0.0, %v1891_v0 }
 0x1fa   : > { %v7865_v40 = vpop.permute.xlu0 %3783  ;;  %v4139_v13 = vld [vmem:[#allocation2 + $0x881] sm:$0xff]  ;;  %2437 = vst.msk [vmem:[#allocation2 + $0x8c8] sm:$0x1] %vm2156_vm3, %v1891_v0  ;;  %v2153_v45 = vsel %vm2024_vm1, 0.0, %v1894_v59  ;;  %2443 = vst.msk [vmem:[#allocation2 + $0x8f8] sm:$0x1] %vm2156_vm3, %v1894_v59 }
 0x1fb   : > { %v7877_v2 = vpack.c.bf16 %v4139_v13, %v4139_v13  ;;  %2436 = vst.msk [vmem:[#allocation2 + $0x8c0] sm:$0xff] %vm2154_vm2, %v2150_v42  ;;  %v1892_v3 = vrot.slane %v1634_v6, 7  ;;  %v4142_v19 = vld [vmem:[#allocation2 + $0x8b1] sm:$0xff]  ;;  %2442 = vst.msk [vmem:[#allocation2 + $0x8f0] sm:$0xff] %vm2154_vm2, %v2153_v45  ;;  %v3371_v13 = vld [vmem:[#allocation2 + $0x781] sm:$0xff] }
 0x1fc   : > { %2781 = vrot.lane.b32.xlu1 %v7804_v4, %s6543_s9  ;;  %3703 = vrot.lane.b32.xlu0 %v3460_v54, %s6544_s13  ;;  %4206 = vst.msk [vmem:[#allocation3 + $0x140] sm:$0xf] %vm4179_vm4, %v7869_v44  ;;  %v7891_v49 = vpack.c.bf16 %v4142_v19, %v4142_v19  ;;  %v4140_v50 = vld [vmem:[#allocation2 + $0x891] sm:$0xff] }
 0x1fd   : > { %v7885_v12 = vpop.permute.xlu1 %2757  ;;  %4204 = vst.msk [vmem:[#allocation3 + $0x128] sm:$0xf] %vm4179_vm4, %v7877_v2  ;;  %v2151_v38 = vsel %vm2024_vm1, 0.0, %v1892_v3  ;;  %v7895_v7 = vpack.c.bf16 %v4140_v50, %v4140_v50  ;;  %v3429_v59 = vld [vmem:[#allocation2 + $0x670] sm:$0xff]  ;;  %v2665_v50 = vld [vmem:[#allocation2 + $0x780] sm:$0xff] }
 0x1fe   : > { %v7887_v4 = vpop.permute.xlu0 %3779  ;;  %2439 = vst.msk [vmem:[#allocation2 + $0x8d8] sm:$0x1] %vm2156_vm3, %v1892_v3  ;;  %v3291_v6 = vld [vmem:[#allocation2 + $0x271] sm:$0xff] }
 0x1ff   : > { %2438 = vst.msk [vmem:[#allocation2 + $0x8d0] sm:$0xff] %vm2154_vm2, %v2151_v38  ;;  %v3427_v45 = vld [vmem:[#allocation2 + $0x650] sm:$0xff]  ;;  %v3323_v3 = vpack.c.bf16 %v3291_v6, %v3291_v6 }
 0x200   : > { %2777 = vrot.lane.b32.xlu1 %v7825_v33, %s6543_s9  ;;  %3699 = vrot.lane.b32.xlu0 %v3458_v39, %s6544_s13  ;;  %4207 = vst.msk [vmem:[#allocation3 + $0x14c] sm:$0xf] %vm4179_vm4, %v7891_v49  ;;  %4205 = vst.msk [vmem:[#allocation3 + $0x134] sm:$0xf] %vm4179_vm4, %v7895_v7  ;;  %v4145_v47 = vld [vmem:[#allocation2 + $0x8e1] sm:$0xff]  ;;  %v7957_v39 = vpack.c.bf16 %v3429_v59, %v3429_v59  ;;  %v3289_v19 = vld [vmem:[#allocation2 + $0x251] sm:$0xff] }
 0x201   : > { %v7905_v37 = vpop.permute.xlu1 %2753  ;;  %v7909_v32 = vpack.c.bf16 %v4145_v47, %v4145_v47  ;;  %v3859_v38 = vsel %vm2154_vm2, %v3323_v3, %v7722_v17  ;;  %v7967_v47 = vpack.c.bf16 %v3427_v45, %v3427_v45  ;;  %v3369_v17 = vld [vmem:[#allocation2 + $0x761] sm:$0xff] }
 0x202   : > { %v7907_v31 = vpop.permute.xlu0 %2759  ;;  %v4143_v11 = vld [vmem:[#allocation2 + $0x8c1] sm:$0xff]  ;;  %v4146_v26 = vld [vmem:[#allocation2 + $0x8f1] sm:$0xff] }
 0x203   : > { %v7914_v33 = vpack.c.bf16 %v4143_v11, %v4143_v11  ;;  %4210 = vst.msk [vmem:[#allocation3 + $0x170] sm:$0xf] %vm4179_vm4, %v7909_v32  ;;  %v4178_v27 = vpack.c.bf16 %v4146_v26, %v4146_v26  ;;  %v3321_v26 = vpack.c.bf16 %v3289_v19, %v3289_v19  ;;  %v2454_v3 = vld [vmem:[#allocation2 + $0x400] sm:$0xff]  ;;  %v2455_v19 = vld [vmem:[#allocation2 + $0x410] sm:$0xff] }
 0x204   : > { %3809 = vrot.lane.b32.xlu1 %v3530_v30, %s6545_s16  ;;  %2871 = vrot.lane.b32.xlu0 %v7498_v46, %s6544_s13  ;;  %v7931_v46 = vpack.c.bf16 %v3432_v10, %v3432_v10  ;;  %v2456_v10 = vld [vmem:[#allocation2 + $0x420] sm:$0xff] }
 0x205   : > { %v7918_v54 = vpop.permute.xlu1 %3785  ;;  %4208 = vst.msk [vmem:[#allocation3 + $0x158] sm:$0xf] %vm4179_vm4, %v7914_v33  ;;  %4211 = vst.msk [vmem:[#allocation3 + $0x17c] sm:$0xf] %vm4179_vm4, %v4178_v27 }
 0x206   : > { %v7920_v60 = vpop.permute.xlu0 %2755  ;;  %v4144_v56 = vld [vmem:[#allocation2 + $0x8d1] sm:$0xff] }
 0x207   : > { %v7925_v22 = vpack.c.bf16 %v4144_v56, %v4144_v56  ;;  %v2457_v56 = vld [vmem:[#allocation2 + $0x430] sm:$0xff] }
 0x208   : > { %3805 = vrot.lane.b32.xlu1 %v7842_v53, %s6545_s16  ;;  %2867 = vrot.lane.b32.xlu0 %v7525_v9, %s6544_s13  ;;  %v7943_v53 = vpack.c.bf16 %v3430_v8, %v3430_v8  ;;  %v3853_v8 = vsel %vm2154_vm2, %v3321_v26, %v7758_v29  ;;  %v2663_v29 = vld [vmem:[#allocation2 + $0x760] sm:$0xff] }
 0x209   : > { %4209 = vst.msk [vmem:[#allocation3 + $0x164] sm:$0xf] %vm4179_vm4, %v7925_v22  ;;  %v7935_v0 = vpop.permute.xlu1 %3781 }
 0x20a   : > { %v7937_v57 = vpop.permute.xlu0 %3791 }
 0x20c   : > { %2869 = vrot.lane.b32.xlu1 %v7476_v1, %s6544_s13  ;;  %3711 = vrot.lane.b32.xlu0 %v7931_v46, %s6544_s13 }
 0x20d   : > { %v7945_v35 = vpop.permute.xlu1 %2765 }
 0x20e   : > { %v7947_v9 = vpop.permute.xlu0 %3787 }
 0x210   : > { %2865 = vrot.lane.b32.xlu1 %v7488_v25, %s6544_s13  ;;  %3707 = vrot.lane.b32.xlu0 %v7943_v53, %s6544_s13  ;;  %v3403_v25 = vpack.c.bf16 %v3371_v13, %v3371_v13  ;;  %v2488_v13 = vpack.c.bf16 %v2456_v10, %v2456_v10  ;;  %v2486_v10 = vpack.c.bf16 %v2454_v3, %v2454_v3 }
 0x211   : > { %v7953_v42 = vpop.permute.xlu1 %2761 }
 0x212   : > { %v7955_v1 = vpop.permute.xlu0 %2763 }
 0x214   : > { %3705 = vrot.lane.b32.xlu1 %v7957_v39, %s6544_s13  ;;  %2875 = vrot.lane.b32.xlu0 %v7599_v28, %s6544_s13  ;;  %v2697_v28 = vpack.c.bf16 %v2665_v50, %v2665_v50  ;;  %v3026_v50 = vsel %vm2154_vm2, %v2488_v13, %v7885_v12  ;;  %v3375_v13 = vld [vmem:[#allocation2 + $0x7c1] sm:$0xff] }
 0x215   : > { %v7965_v55 = vpop.permute.xlu1 %3793 }
 0x216   : > { %v3688_v30 = vpop.permute.xlu0 %3687 }
 0x217   : > { %v3944_v11 = vsel %vm771_vm0, %v3859_v38, %v3688_v30 }
 0x218   : > { %v4018_v27 = vsel %vm3151_vm5, %v3944_v11, %v7865_v40  ;;  %3701 = vrot.lane.b32.xlu1 %v7967_v47, %s6544_s13  ;;  %3623 = vrot.lane.b32.xlu0 %v3403_v25, %s6543_s9  ;;  %v2489_v40 = vpack.c.bf16 %v2457_v56, %v2457_v56  ;;  %v3401_v25 = vpack.c.bf16 %v3369_v17, %v3369_v17  ;;  %v3292_v17 = vld [vmem:[#allocation2 + $0x281] sm:$0xff] }
 0x219   : > { %4093 = vst [vmem:[#allocation3 + $0x7c] sm:$0xf] %v4018_v27  ;;  %v7977_v59 = vpop.permute.xlu1 %3789  ;;  %v2487_v27 = vpack.c.bf16 %v2455_v19, %v2455_v19 }
 0x21a   : > { %v3684_v6 = vpop.permute.xlu0 %3683  ;;  %v3029_v30 = vsel %vm2154_vm2, %v2489_v40, %v7907_v31 }
 0x21b   : > { %v3940_v45 = vsel %vm771_vm0, %v3853_v8, %v3684_v6  ;;  %v3295_v8 = vld [vmem:[#allocation2 + $0x2b1] sm:$0xff]  ;;  %v2695_v6 = vpack.c.bf16 %v2663_v29, %v2663_v29  ;;  %v3023_v3 = vsel %vm2154_vm2, %v2487_v27, %v7920_v60  ;;  %v3407_v60 = vpack.c.bf16 %v3375_v13, %v3375_v13 }
 0x21c   : > { %v4012_v38 = vsel %vm3151_vm5, %v3940_v45, %v7887_v4  ;;  %2877 = vrot.lane.b32.xlu1 %v7565_v62, %s6544_s13  ;;  %2979 = vrot.lane.b32.xlu0 %v2697_v28, %s6545_s16  ;;  %v3433_v62 = vld [vmem:[#allocation2 + $0x6b0] sm:$0xff]  ;;  %v6415_v28 = vld [vmem:[%s8778_s3 + $0x80] sm:$0xff]   ;;  %v3020_v45 = vsel %vm2154_vm2, %v2486_v10, %v7905_v37 }
 0x21d   : > { %4091 = vst [vmem:[#allocation3 + $0x64] sm:$0xf] %v4012_v38  ;;  %v2854_v11 = vpop.permute.xlu1 %2853  ;;  %6166 = vmatprep.subr.bf16.mxu1 %v6415_v28  ;;  %v3465_v19 = vpack.c.bf16 %v3433_v62, %v3433_v62  ;;  %v3327_v38 = vpack.c.bf16 %v3295_v8, %v3295_v8  ;;  %v3431_v29 = vld [vmem:[#allocation2 + $0x690] sm:$0xff] }
 0x21e   : > { %v2856_v26 = vpop.permute.xlu0 %2855  ;;  %v3110_v4 = vsel %vm771_vm0, %v3026_v50, %v2854_v11  ;;  %6167 = vmatpush3.bf16.msra.mxu1 %v6415_v28  ;;  %v3290_v50 = vld [vmem:[#allocation2 + $0x261] sm:$0xff]  ;;  %v3372_v8 = vld [vmem:[#allocation2 + $0x791] sm:$0xff] }
 0x21f   : > { %v3112_v56 = vsel %vm771_vm0, %v3029_v30, %v2856_v26  ;;  %v3186_v12 = vsel %vm3151_vm5, %v3110_v4, %v7756_v61  ;;  %v3293_v30 = vld [vmem:[#allocation2 + $0x291] sm:$0xff]  ;;  %v2669_v26 = vld [vmem:[#allocation2 + $0x7c0] sm:$0xff]  ;;  %v3871_v27 = vsel %vm2154_vm2, %v3327_v38, %v7795_v34  ;;  %v3322_v62 = vpack.c.bf16 %v3290_v50, %v3290_v50 }
 0x220   : > { %v3189_v31 = vsel %vm3151_vm5, %v3112_v56, %v7851_v20  ;;  %2873 = vrot.lane.b32.xlu1 %v7567_v21, %s6544_s13  ;;  %3619 = vrot.lane.b32.xlu0 %v3401_v25, %s6543_s9  ;;  %3259 = vst [vmem:[#allocation3 + $0x84] sm:$0xf] %v3186_v12  ;;  %v3324_v20 = vpack.c.bf16 %v3292_v17, %v3292_v17  ;;  %v2460_v12 = vld [vmem:[#allocation2 + $0x460] sm:$0xff] }
 0x221   : > { %3260 = vst [vmem:[#allocation3 + $0x90] sm:$0xf] %v3189_v31  ;;  %v2850_v61 = vpop.permute.xlu1 %2849  ;;  %v2701_v34 = vpack.c.bf16 %v2669_v26, %v2669_v26  ;;  %v3856_v13 = vsel %vm2154_vm2, %v3322_v62, %v7777_v23  ;;  %v2458_v38 = vld [vmem:[#allocation2 + $0x440] sm:$0xff]  ;;  %v3035_v50 = vsel %vm2154_vm2, %v7534_v63, %v7955_v1  ;;  %v3370_v26 = vld [vmem:[#allocation2 + $0x771] sm:$0xff] }
 0x222   : > { %v2852_v40 = vpop.permute.xlu0 %2851  ;;  %v3106_v21 = vsel %vm771_vm0, %v3020_v45, %v2850_v61  ;;  %v3862_v10 = vsel %vm2154_vm2, %v3324_v20, %v7737_v48  ;;  %v3404_v61 = vpack.c.bf16 %v3372_v8, %v3372_v8  ;;  %v2666_v20 = vld [vmem:[#allocation2 + $0x790] sm:$0xff] }
 0x223   : > { %v3108_v25 = vsel %vm771_vm0, %v3023_v3, %v2852_v40  ;;  %v3180_v11 = vsel %vm3151_vm5, %v3106_v21, %v7793_v36  ;;  %v8017_v36 = vpack.c.bf16 %v3431_v29, %v3431_v29  ;;  %v2492_v40 = vpack.c.bf16 %v2460_v12, %v2460_v12  ;;  %v3501_v1 = vld [vmem:[#allocation2 + $0x811] sm:$0xff] }
 0x224   : > { %v3183_v37 = vsel %vm3151_vm5, %v3108_v25, %v7739_v52  ;;  %3713 = vrot.lane.b32.xlu1 %v3465_v19, %s6544_s13  ;;  %2975 = vrot.lane.b32.xlu0 %v2695_v6, %s6545_s16  ;;  %3257 = vst [vmem:[#allocation3 + $0x6c] sm:$0xf] %v3180_v11  ;;  %v3325_v52 = vpack.c.bf16 %v3293_v30, %v3293_v30  ;;  %v3373_v6 = vld [vmem:[#allocation2 + $0x7a1] sm:$0xff] }
 0x225   : > { %3258 = vst [vmem:[#allocation3 + $0x78] sm:$0xf] %v3183_v37  ;;  %v3690_v4 = vpop.permute.xlu1 %3689  ;;  %v3405_v23 = vpack.c.bf16 %v3373_v6, %v3373_v6  ;;  %v3038_v29 = vsel %vm2154_vm2, %v2492_v40, %v7945_v35  ;;  %v2698_v11 = vpack.c.bf16 %v2666_v20, %v2666_v20  ;;  %v2490_v37 = vpack.c.bf16 %v2458_v38, %v2458_v38  ;;  %v3296_v35 = vld [vmem:[#allocation2 + $0x2c1] sm:$0xff]  ;;  %v3376_v40 = vld [vmem:[#allocation2 + $0x7d1] sm:$0xff] }
 0x226   : > { %v3696_v56 = vpop.permute.xlu0 %3695  ;;  %v3946_v28 = vsel %vm771_vm0, %v3862_v10, %v3690_v4  ;;  %v3865_v45 = vsel %vm2154_vm2, %v3325_v52, %v7831_v41  ;;  %v2667_v41 = vld [vmem:[#allocation2 + $0x7a0] sm:$0xff]  ;;  %v3402_v52 = vpack.c.bf16 %v3370_v26, %v3370_v26 }
 0x227   : > { %v3952_v17 = vsel %vm771_vm0, %v3871_v27, %v3696_v56  ;;  %v4021_v31 = vsel %vm3151_vm5, %v3946_v28, %v7918_v54  ;;  %v2699_v63 = vpack.c.bf16 %v2667_v41, %v2667_v41  ;;  %v3032_v4 = vsel %vm2154_vm2, %v2490_v37, %v7953_v42  ;;  %v2538_v20 = vld [vmem:[#allocation2 + $0x821] sm:$0xff] }
 0x228   : > { %v4030_v48 = vsel %vm3151_vm5, %v3952_v17, %v7937_v57  ;;  %3709 = vrot.lane.b32.xlu1 %v8017_v36, %s6544_s13  ;;  %3631 = vrot.lane.b32.xlu0 %v3407_v60, %s6543_s9  ;;  %4094 = vst [vmem:[#allocation3 + $0x88] sm:$0xf] %v4021_v31  ;;  %v3328_v17 = vpack.c.bf16 %v3296_v35, %v3296_v35  ;;  %v2536_v37 = vld [vmem:[#allocation2 + $0x801] sm:$0xff] }
 0x229   : > { %4097 = vst [vmem:[#allocation3 + $0xac] sm:$0xf] %v4030_v48  ;;  %v3686_v3 = vpop.permute.xlu1 %3685  ;;  %v8062_v31 = vpack.c.bf16 %v3501_v1, %v3501_v1  ;;  %v3294_v48 = vld [vmem:[#allocation2 + $0x2a1] sm:$0xff]  ;;  %v3408_v41 = vpack.c.bf16 %v3376_v40, %v3376_v40 }
 0x22a   : > { %v3692_v54 = vpop.permute.xlu0 %3691  ;;  %v3942_v57 = vsel %vm771_vm0, %v3856_v13, %v3686_v3  ;;  %v3874_v6 = vsel %vm2154_vm2, %v3328_v17, %v7811_v5 }
 0x22b   : > { %v3948_v19 = vsel %vm771_vm0, %v3865_v45, %v3692_v54  ;;  %v4015_v21 = vsel %vm3151_vm5, %v3942_v57, %v7935_v0  ;;  %v6401_v42 = vld [vmem:[#allocation3 + $0x60] ss:$12 sps:$4 sm:$0xff]   ;;  %v3326_v57 = vpack.c.bf16 %v3294_v48, %v3294_v48 }
 0x22c   : > { %v4024_v25 = vsel %vm3151_vm5, %v3948_v19, %v7947_v9  ;;  %3625 = vrot.lane.b32.xlu1 %v3404_v61, %s6543_s9  ;;  %2987 = vrot.lane.b32.xlu0 %v2701_v34, %s6545_s16  ;;  %4092 = vst [vmem:[#allocation3 + $0x70] sm:$0xf] %v4015_v21  ;;  %v3499_v34 = vld [vmem:[#allocation2 + $0x7f1] sm:$0xff]  ;;  %v2540_v48 = vld [vmem:[#allocation2 + $0x841] sm:$0xff] }
 0x22d   : > { %4095 = vst [vmem:[#allocation3 + $0x94] sm:$0xf] %v4024_v25  ;;  %v2862_v30 = vpop.permute.xlu1 %2861  ;;  %v8074_v5 = vpack.c.bf16 %v3499_v34, %v3499_v34  ;;  %v3868_v38 = vsel %vm2154_vm2, %v3326_v57, %v7849_v16  ;;  %v2570_v16 = vpack.c.bf16 %v2538_v20, %v2538_v20  ;;  %v3434_v20 = vld [vmem:[#allocation2 + $0x880] sm:$0xff] }
 0x22e   : > { %v2860_v0 = vpop.permute.xlu0 %2859  ;;  %v3118_v9 = vsel %vm771_vm0, %v3038_v29, %v2862_v30  ;;  %v4232_v30 = vld [vmem:[#allocation3 + $0x78] sm:$0xff] }
 0x22f   : > { %v3116_v60 = vsel %vm771_vm0, %v3035_v50, %v2860_v0  ;;  %v3198_v10 = vsel %vm3151_vm5, %v3118_v9, %v7829_v58  ;;  %v2461_v58 = vld [vmem:[#allocation2 + $0x630] sm:$0xff]  ;;  %v6402_v61 = vld [vmem:[#allocation3 + $0x7c] ss:$12 sps:$4 sm:$0xff]  }
 0x230   : > { %v3195_v27 = vsel %vm3151_vm5, %v3116_v60, %v7813_v14  ;;  %2981 = vrot.lane.b32.xlu1 %v2698_v11, %s6545_s16  ;;  %3627 = vrot.lane.b32.xlu0 %v3405_v23, %s6543_s9  ;;  %3263 = vst [vmem:[#allocation3 + $0xb4] sm:$0xf] %v3198_v10  ;;  %v2664_v14 = vld [vmem:[#allocation2 + $0x770] sm:$0xff]  ;;  %v4234_v21 = vld [vmem:[#allocation3 + $0x84] sm:$0xff] }
 0x231   : > { %3262 = vst [vmem:[#allocation3 + $0xa8] sm:$0xf] %v3195_v27  ;;  %v2858_v56 = vpop.permute.xlu1 %2857  ;;  %v2696_v3 = vpack.c.bf16 %v2664_v14, %v2664_v14  ;;  %v2670_v50 = vld [vmem:[#allocation2 + $0x7d0] sm:$0xff]  ;;  %v5711_v11 = vcombine.low %v4232_v30, %v4234_v21  ;;  %v2568_v27 = vpack.c.bf16 %v2536_v37, %v2536_v37  ;;  %v8128_v21 = vpack.c.bf16 %v3434_v20, %v3434_v20  ;;  %v6422_v37 = vld [vmem:[%s8778_s3 + $0x88] sm:$0xff]  }
 0x232   : > { %v8055_v62 = vpop.permute.xlu0 %3607  ;;  %v3114_v28 = vsel %vm771_vm0, %v3032_v4, %v2858_v56  ;;  %v2702_v26 = vpack.c.bf16 %v2670_v50, %v2670_v50  ;;  %v2668_v4 = vld [vmem:[#allocation2 + $0x7b0] sm:$0xff]  ;;  %6168 = vmatprep.subr.bf16.mxu1 %v6422_v37 }
 0x233   : > { %v3192_v8 = vsel %vm3151_vm5, %v3114_v28, %v7863_v18  ;;  %v6399_v12 = vld [vmem:[#allocation3 + $0x64] ss:$12 sps:$4 sm:$0xff]   ;;  %v2493_v18 = vpack.c.bf16 %v2461_v58, %v2461_v58  ;;  %6169 = vmatpush3.bf16.msra.mxu1 %v6422_v37 }
 0x234   : > { %3621 = vrot.lane.b32.xlu1 %v3402_v52, %s6543_s9  ;;  %2983 = vrot.lane.b32.xlu0 %v2699_v63, %s6545_s16  ;;  %3261 = vst [vmem:[#allocation3 + $0x9c] sm:$0xf] %v3192_v8  ;;  %v3505_v63 = vld [vmem:[#allocation2 + $0x851] sm:$0xff]  ;;  %v2700_v8 = vpack.c.bf16 %v2668_v4, %v2668_v4 }
 0x235   : > { %v3698_v13 = vpop.permute.xlu1 %3697  ;;  %4779 = vmatprep.mubr.bf16.mxu1 %v6399_v12  ;;  %v3537_v52 = vpack.c.bf16 %v3505_v63, %v3505_v63  ;;  %v3503_v28 = vld [vmem:[#allocation2 + $0x831] sm:$0xff] }
 0x236   : > { %v8066_v45 = vpop.permute.xlu0 %2963  ;;  %v3954_v54 = vsel %vm771_vm0, %v3874_v6, %v3698_v13  ;;  %4780 = vmatmul.mubr.bf16.gmra.mrb[12].mxu1 %v6401_v42  ;;  %v3535_v42 = vpack.c.bf16 %v3503_v28, %v3503_v28 }
 0x237   : > { %v4033_v19 = vsel %vm3151_vm5, %v3954_v54, %v7965_v55  ;;  %4787 = vmatprep.mubr.bf16.mxu1 %v6402_v61  ;;  %v3041_v55 = vsel %vm2154_vm2, %v2493_v18, %v7171_v24  ;;  %v2572_v18 = vpack.c.bf16 %v2540_v48, %v2540_v48  ;;  %v3436_v61 = vld [vmem:[#allocation2 + $0x8a0] sm:$0xff] }
 0x238   : > { %2977 = vrot.lane.b32.xlu1 %v2696_v3, %s6545_s16  ;;  %3815 = vrot.lane.b32.xlu0 %v8062_v31, %s6545_s16  ;;  %4098 = vst [vmem:[#allocation3 + $0xb8] sm:$0xf] %v4033_v19  ;;  %v3120_v9 = vsel %vm771_vm0, %v3041_v55, %v7191_v51  ;;  %v4240_v3 = vld [vmem:[#allocation3 + $0xa8] sm:$0xff]  ;;  %v8121_v19 = vpack.c.bf16 %v3436_v61, %v3436_v61  ;;  %v2639_v48 = vld [vmem:[#allocation2 + $0xa0] sm:$0xff] }
 0x239   : > { %v3694_v25 = vpop.permute.xlu1 %3693  ;;  %v2671_v61 = vpack.c.bf16 %v2639_v48, %v2639_v48 }
 0x23a   : > { %v8078_v23 = vpop.permute.xlu0 %3603  ;;  %v3950_v29 = vsel %vm771_vm0, %v3868_v38, %v3694_v25 }
 0x23b   : > { %v4027_v0 = vsel %vm3151_vm5, %v3950_v29, %v7977_v59  ;;  %v3374_v59 = vld [vmem:[#allocation2 + $0x7b1] sm:$0xff]  ;;  %v3440_v29 = vld [vmem:[#allocation2 + $0x8e0] sm:$0xff] }
 0x23c   : > { %3633 = vrot.lane.b32.xlu1 %v3408_v41, %s6543_s9  ;;  %3811 = vrot.lane.b32.xlu0 %v8074_v5, %s6545_s16  ;;  %4096 = vst [vmem:[#allocation3 + $0xa0] sm:$0xf] %v4027_v0  ;;  %v3406_v51 = vpack.c.bf16 %v3374_v59, %v3374_v59  ;;  %v6406_v58 = vld [vmem:[#allocation3 + $0x90] ss:$12 sps:$4 sm:$0xff]   ;;  %v3506_v0 = vld [vmem:[#allocation2 + $0x861] sm:$0xff] }
 0x23d   : > { %v8090_v24 = vpop.permute.xlu1 %3609  ;;  %v3410_v59 = vld [vmem:[#allocation2 + $0x1c0] sm:$0xff] }
 0x23e   : > { %v2960_v60 = vpop.permute.xlu0 %2959  ;;  %4788 = vmatmul.mubr.bf16.gmra.mrb[16].mxu1 %v5711_v11  ;;  %v3438_v11 = vld [vmem:[#allocation2 + $0x8c0] sm:$0xff]  ;;  %v3442_v4 = vpack.c.bf16 %v3410_v59, %v3410_v59  ;;  %v3303_v59 = vld [vmem:[#allocation2 + $0x4f1] sm:$0xff] }
 0x23f   : > { %v3201_v10 = vsel %vm3151_vm5, %v3120_v9, %v2960_v60  ;;  %v6407_v12 = vld [vmem:[#allocation3 + $0xac] ss:$12 sps:$4 sm:$0xff]   ;;  %v3538_v60 = vpack.c.bf16 %v3506_v0, %v3506_v0 }
 0x240   : > { %3264 = vst [vmem:[#allocation3 + $0xc0] sm:$0xf] %v3201_v10  ;;  %2989 = vrot.lane.b32.xlu1 %v2702_v26, %s6545_s16  ;;  %2791 = vrot.lane.b32.xlu0 %v2570_v16, %s6543_s9  ;;  %v4242_v34 = vld [vmem:[#allocation3 + $0xb4] sm:$0xff]  ;;  %v8159_v26 = vpack.c.bf16 %v3438_v11, %v3438_v11 }
 0x241   : > { %v5717_v54 = vcombine.low %v4240_v3, %v4242_v34 }
 0x242   : > { %v8095_v35 = vpop.permute.xlu1 %2965  ;;  %v8097_v1 = vpop.permute.xlu0 %3615 }
 0x243   : > { %v6404_v56 = vld [vmem:[#allocation3 + $0x94] ss:$12 sps:$4 sm:$0xff]  }
 0x244   : > { %3629 = vrot.lane.b32.xlu1 %v3406_v51, %s6543_s9  ;;  %2787 = vrot.lane.b32.xlu0 %v2568_v27, %s6543_s9 }
 0x245   : > { %4795 = vmatprep.mubr.bf16.mxu1 %v6404_v56 }
 0x246   : > { %v8101_v14 = vpop.permute.xlu1 %3605  ;;  %v8103_v17 = vpop.permute.xlu0 %2971  ;;  %4796 = vmatmul.mubr.bf16.gmra.mrb[20].mxu1 %v6406_v58 }
 0x247   : > { %4803 = vmatprep.mubr.bf16.mxu1 %v6407_v12 }
 0x248   : > { %2985 = vrot.lane.b32.xlu1 %v2700_v8, %s6545_s16  ;;  %3823 = vrot.lane.b32.xlu0 %v3537_v52, %s6545_s16 }
 0x24a   : > { %v8107_v6 = vpop.permute.xlu1 %2961  ;;  %v8109_v13 = vpop.permute.xlu0 %3611 }
 0x24c   : > { %2789 = vrot.lane.b32.xlu1 %v8062_v31, %s6543_s9  ;;  %3819 = vrot.lane.b32.xlu0 %v3535_v42, %s6545_s16 }
 0x24e   : > { %v8114_v40 = vpop.permute.xlu1 %3617  ;;  %v8116_v57 = vpop.permute.xlu0 %2967  ;;  %4804 = vmatmul.mubr.bf16.gmra.mrb[24].mxu1 %v5717_v54 }
 0x250   : > { %2785 = vrot.lane.b32.xlu1 %v8074_v5, %s6543_s9  ;;  %2795 = vrot.lane.b32.xlu0 %v2572_v18, %s6543_s9 }
 0x252   : > { %v8123_v38 = vpop.permute.xlu1 %2973  ;;  %v3800_v31 = vpop.permute.xlu0 %3799 }
 0x254   : > { %3817 = vrot.lane.b32.xlu1 %v2570_v16, %s6545_s16  ;;  %3719 = vrot.lane.b32.xlu0 %v8121_v19, %s6544_s13  ;;  %v8147_v16 = vpack.c.bf16 %v3440_v29, %v3440_v29  ;;  %v3435_v29 = vld [vmem:[#allocation2 + $0x890] sm:$0xff] }
 0x255   : > { %v8200_v11 = vpack.c.bf16 %v3435_v29, %v3435_v29 }
 0x256   : > { %v8130_v25 = vpop.permute.xlu1 %3613  ;;  %v3796_v41 = vpop.permute.xlu0 %3795 }
 0x258   : > { %3813 = vrot.lane.b32.xlu1 %v2568_v27, %s6545_s16  ;;  %3715 = vrot.lane.b32.xlu0 %v8128_v21, %s6544_s13  ;;  %v3299_v27 = vld [vmem:[#allocation2 + $0x4b1] sm:$0xff] }
 0x259   : > { %v3331_v56 = vpack.c.bf16 %v3299_v27, %v3299_v27  ;;  %v2464_v27 = vld [vmem:[#allocation2 + $0x660] sm:$0xff] }
 0x25a   : > { %v8135_v5 = vpop.permute.xlu1 %2969  ;;  %v2776_v55 = vpop.permute.xlu0 %2775 }
 0x25b   : > { %v3883_v58 = vsel %vm2154_vm2, %v3331_v56, %v8055_v62 }
 0x25c   : > { %2797 = vrot.lane.b32.xlu1 %v3537_v52, %s6543_s9  ;;  %2887 = vrot.lane.b32.xlu0 %v7891_v49, %s6544_s13  ;;  %v3297_v52 = vld [vmem:[#allocation2 + $0x491] sm:$0xff] }
 0x25d   : > { %v3329_v34 = vpack.c.bf16 %v3297_v52, %v3297_v52  ;;  %v3335_v52 = vpack.c.bf16 %v3303_v59, %v3303_v59 }
 0x25e   : > { %v8140_v50 = vpop.permute.xlu1 %2773  ;;  %v8142_v30 = vpop.permute.xlu0 %2771 }
 0x260   : > { %2793 = vrot.lane.b32.xlu1 %v3535_v42, %s6543_s9  ;;  %2883 = vrot.lane.b32.xlu0 %v7895_v7, %s6544_s13  ;;  %v3437_v42 = vld [vmem:[#allocation2 + $0x8b0] sm:$0xff] }
 0x261   : > { %v8189_v54 = vpack.c.bf16 %v3437_v42, %v3437_v42  ;;  %v2462_v42 = vld [vmem:[#allocation2 + $0x640] sm:$0xff] }
 0x262   : > { %v8152_v9 = vpop.permute.xlu1 %2769  ;;  %v8154_v49 = vpop.permute.xlu0 %3807 }
 0x264   : > { %3825 = vrot.lane.b32.xlu1 %v3538_v60, %s6545_s16  ;;  %3727 = vrot.lane.b32.xlu0 %v8147_v16, %s6544_s13 }
 0x266   : > { %v8161_v7 = vpop.permute.xlu1 %3801  ;;  %v8163_v10 = vpop.permute.xlu0 %3803 }
 0x268   : > { %3821 = vrot.lane.b32.xlu1 %v2572_v18, %s6545_s16  ;;  %3723 = vrot.lane.b32.xlu0 %v8159_v26, %s6544_s13 }
 0x26a   : > { %v8168_v63 = vpop.permute.xlu1 %3797  ;;  %v8170_v51 = vpop.permute.xlu0 %2779 }
 0x26c   : > { %2885 = vrot.lane.b32.xlu1 %v7869_v44, %s6544_s13  ;;  %3667 = vrot.lane.b32.xlu0 %v3442_v4, %s6544_s13  ;;  %v3877_v44 = vsel %vm2154_vm2, %v3329_v34, %v8078_v23 }
 0x26e   : > { %v8177_v28 = vpop.permute.xlu1 %2781  ;;  %v3704_v8 = vpop.permute.xlu0 %3703 }
 0x26f   : > { %v3960_v12 = vsel %vm771_vm0, %v3883_v58, %v3704_v8  ;;  %v3301_v58 = vld [vmem:[#allocation2 + $0x4d1] sm:$0xff] }
 0x270   : > { %v4042_v3 = vsel %vm3151_vm5, %v3960_v12, %v3800_v31  ;;  %2881 = vrot.lane.b32.xlu1 %v7877_v2, %s6544_s13  ;;  %2891 = vrot.lane.b32.xlu0 %v7925_v22, %s6544_s13  ;;  %v3475_v31 = vld [vmem:[#allocation2 + $0x131] sm:$0xff]  ;;  %v3053_v2 = vsel %vm2154_vm2, %v7957_v39, %v2776_v55  ;;  %v3047_v39 = vsel %vm2154_vm2, %v7967_v47, %v8142_v30  ;;  %v6462_v12 = vld [vmem:[%s6650_s23] sm:$0xff]  }
 0x271   : > { %4101 = vst [vmem:[#allocation3 + $0xdc] sm:$0xf] %v4042_v3  ;;  %v3507_v37 = vpack.c.bf16 %v3475_v31, %v3475_v31  ;;  %v3895_v47 = vsel %vm2154_vm2, %v3335_v52, %v8097_v1  ;;  %v3333_v3 = vpack.c.bf16 %v3301_v58, %v3301_v58  ;;  %v6463_v1 = vld [vmem:[%s6650_s23 + $0x10] sm:$0xff]   ;;  %v2575_v52 = vld [vmem:[#allocation2 + $0x1c1] sm:$0xff] }
 0x272   : > { %v8187_v62 = vpop.permute.xlu1 %2777  ;;  %v3700_v18 = vpop.permute.xlu0 %3699 }
 0x273   : > { %v3956_v20 = vsel %vm771_vm0, %v3877_v44, %v3700_v18  ;;  %v2494_v18 = vpack.c.bf16 %v2462_v42, %v2462_v42  ;;  %v3889_v29 = vsel %vm2154_vm2, %v3333_v3, %v8109_v13  ;;  %v6464_v13 = vld [vmem:[%s6650_s23 + $0x80] sm:$0xff]   ;;  %v2607_v42 = vpack.c.bf16 %v2575_v52, %v2575_v52 }
 0x274   : > { %v4036_v0 = vsel %vm3151_vm5, %v3956_v20, %v3796_v41  ;;  %3721 = vrot.lane.b32.xlu1 %v8189_v54, %s6544_s13  ;;  %2927 = vrot.lane.b32.xlu0 %v2671_v61, %s6545_s16 }
 0x275   : > { %4099 = vst [vmem:[#allocation3 + $0xc4] sm:$0xf] %v4036_v0  ;;  %v3044_v31 = vsel %vm2154_vm2, %v2494_v18, %v8152_v9  ;;  %v3298_v9 = vld [vmem:[#allocation2 + $0x4a1] sm:$0xff]  ;;  %v2640_v18 = vld [vmem:[#allocation2 + $0xb0] sm:$0xff] }
 0x276   : > { %v8198_v22 = vpop.permute.xlu1 %3809  ;;  %v2872_v23 = vpop.permute.xlu0 %2871  ;;  %v3330_v58 = vpack.c.bf16 %v3298_v9, %v3298_v9 }
 0x277   : > { %v3128_v60 = vsel %vm771_vm0, %v3053_v2, %v2872_v23  ;;  %v3439_v23 = vld [vmem:[#allocation2 + $0x8d0] sm:$0xff] }
 0x278   : > { %v3213_v41 = vsel %vm3151_vm5, %v3128_v60, %v8116_v57  ;;  %3717 = vrot.lane.b32.xlu1 %v8200_v11, %s6544_s13  ;;  %3763 = vrot.lane.b32.xlu0 %v3507_v37, %s6545_s16  ;;  %v2496_v57 = vpack.c.bf16 %v2464_v27, %v2464_v27  ;;  %v3059_v27 = vsel %vm2154_vm2, %v8017_v36, %v8170_v51  ;;  %v6465_v36 = vld [vmem:[%s6650_s23 + $0x90] sm:$0xff]  }
 0x279   : > { %3268 = vst [vmem:[#allocation3 + $0xf0] sm:$0xf] %v3213_v41  ;;  %v3880_v51 = vsel %vm2154_vm2, %v3330_v58, %v8101_v14  ;;  %v3062_v14 = vsel %vm2154_vm2, %v7931_v46, %v8177_v28  ;;  %v3056_v46 = vsel %vm2154_vm2, %v7943_v53, %v8187_v62  ;;  %v3302_v53 = vld [vmem:[#allocation2 + $0x4e1] sm:$0xff] }
 0x27a   : > { %v8211_v55 = vpop.permute.xlu1 %3805  ;;  %v2868_v4 = vpop.permute.xlu0 %2867  ;;  %v3050_v30 = vsel %vm2154_vm2, %v2496_v57, %v8140_v50  ;;  %v3300_v50 = vld [vmem:[#allocation2 + $0x4c1] sm:$0xff]  ;;  %v3334_v9 = vpack.c.bf16 %v3302_v53, %v3302_v53 }
 0x27b   : > { %v3124_v56 = vsel %vm771_vm0, %v3047_v39, %v2868_v4  ;;  %v3332_v37 = vpack.c.bf16 %v3300_v50, %v3300_v50  ;;  %v8252_v4 = vpack.c.bf16 %v3439_v23, %v3439_v23  ;;  %v2672_v50 = vpack.c.bf16 %v2640_v18, %v2640_v18 }
 0x27c   : > { %v3207_v8 = vsel %vm3151_vm5, %v3124_v56, %v8066_v45  ;;  %2893 = vrot.lane.b32.xlu1 %v7909_v32, %s6544_s13  ;;  %5085 = vrot.lane.b32.xlu0 %v6462_v12, %s6543_s9  ;;  %v3441_v32 = vld [vmem:[#allocation2 + $0x8f0] sm:$0xff] }
 0x27d   : > { %3266 = vst [vmem:[#allocation3 + $0xd8] sm:$0xf] %v3207_v8  ;;  %v3473_v2 = vpack.c.bf16 %v3441_v32, %v3441_v32  ;;  %v3886_v59 = vsel %vm2154_vm2, %v3332_v37, %v8090_v24 }
 0x27e   : > { %v2870_v48 = vpop.permute.xlu1 %2869  ;;  %v3712_v34 = vpop.permute.xlu0 %3711 }
 0x27f   : > { %v3126_v45 = vsel %vm771_vm0, %v3050_v30, %v2870_v48  ;;  %v3968_v44 = vsel %vm771_vm0, %v3895_v47, %v3712_v34  ;;  %v3411_v47 = vld [vmem:[#allocation2 + $0x1d0] sm:$0xff]  ;;  %v6466_v48 = vld [vmem:[%s6650_s23 + $0x100] sm:$0xff]  }
 0x280   : > { %v3210_v61 = vsel %vm3151_vm5, %v3126_v45, %v8095_v35  ;;  %v4054_v20 = vsel %vm3151_vm5, %v3968_v44, %v8154_v49  ;;  %2889 = vrot.lane.b32.xlu1 %v7914_v33, %s6544_s13  ;;  %5089 = vrot.lane.b32.xlu0 %v6463_v1, %s6543_s9  ;;  %v3443_v45 = vpack.c.bf16 %v3411_v47, %v3411_v47  ;;  %v6473_v47 = vld [vmem:[%s6650_s23 + $0x98] sm:$0xff]  }
 0x281   : > { %3267 = vst [vmem:[#allocation3 + $0xe4] sm:$0xf] %v3210_v61  ;;  %4105 = vst [vmem:[#allocation3 + $0x10c] sm:$0xf] %v4054_v20  ;;  %v6467_v61 = vld [vmem:[%s6650_s23 + $0x110] sm:$0xff]   ;;  %v3304_v20 = vld [vmem:[#allocation2 + $0x501] sm:$0xff] }
 0x282   : > { %v2866_v35 = vpop.permute.xlu1 %2865  ;;  %v3708_v0 = vpop.permute.xlu0 %3707 }
 0x283   : > { %v3122_v49 = vsel %vm771_vm0, %v3044_v31, %v2866_v35  ;;  %v3964_v33 = vsel %vm771_vm0, %v3889_v29, %v3708_v0  ;;  %v3476_v31 = vld [vmem:[#allocation2 + $0x141] sm:$0xff]  ;;  %v3336_v35 = vpack.c.bf16 %v3304_v20, %v3304_v20 }
 0x284   : > { %v3204_v60 = vsel %vm3151_vm5, %v3122_v49, %v8107_v6  ;;  %v4048_v41 = vsel %vm3151_vm5, %v3964_v33, %v8163_v10  ;;  %3729 = vrot.lane.b32.xlu1 %v3473_v2, %s6544_s13  ;;  %5093 = vrot.lane.b32.xlu0 %v6464_v13, %s6543_s9  ;;  %v6468_v33 = vld [vmem:[%s6650_s23 + $0x180] sm:$0xff]  }
 0x285   : > { %3265 = vst [vmem:[#allocation3 + $0xcc] sm:$0xf] %v3204_v60  ;;  %4103 = vst [vmem:[#allocation3 + $0xf4] sm:$0xf] %v4048_v41 }
 0x286   : > { %v3706_v6 = vpop.permute.xlu1 %3705  ;;  %v2876_v39 = vpop.permute.xlu0 %2875 }
 0x287   : > { %v3962_v10 = vsel %vm771_vm0, %v3886_v59, %v3706_v6  ;;  %v3132_v56 = vsel %vm771_vm0, %v3059_v27, %v2876_v39 }
 0x288   : > { %v4045_v57 = vsel %vm3151_vm5, %v3962_v10, %v8161_v7  ;;  %v3219_v24 = vsel %vm3151_vm5, %v3132_v56, %v8103_v17  ;;  %3725 = vrot.lane.b32.xlu1 %v8252_v4, %s6544_s13  ;;  %5097 = vrot.lane.b32.xlu0 %v6465_v36, %s6543_s9  ;;  %v2469_v17 = vld [vmem:[#allocation2 + $0x870] sm:$0xff]  ;;  %v6470_v10 = vld [vmem:[%s6650_s23 + $0x8] sm:$0xff]   ;;  %v6414_v56 = vld [vmem:[#allocation3 + $0xd8] ss:$12 sps:$4 sm:$0xff]  }
 0x289   : > { %4102 = vst [vmem:[#allocation3 + $0xe8] sm:$0xf] %v4045_v57  ;;  %3270 = vst [vmem:[#allocation3 + $0x108] sm:$0xf] %v3219_v24  ;;  %v2501_v44 = vpack.c.bf16 %v2469_v17, %v2469_v17 }
 0x28a   : > { %v3702_v8 = vpop.permute.xlu1 %3701  ;;  %v8266_v12 = vpop.permute.xlu0 %3623 }
 0x28b   : > { %v3958_v7 = vsel %vm771_vm0, %v3880_v51, %v3702_v8  ;;  %v3065_v29 = vsel %vm2154_vm2, %v2501_v44, %v7210_v15  ;;  %v3898_v15 = vsel %vm2154_vm2, %v3336_v35, %v8114_v40  ;;  %v3892_v40 = vsel %vm2154_vm2, %v3334_v9, %v8130_v25  ;;  %v6471_v25 = vld [vmem:[%s6650_s23 + $0x18] sm:$0xff]   ;;  %v6472_v51 = vld [vmem:[%s6650_s23 + $0x88] sm:$0xff]  }
 0x28c   : > { %v4039_v30 = vsel %vm3151_vm5, %v3958_v7, %v8168_v63  ;;  %2833 = vrot.lane.b32.xlu1 %v2607_v42, %s6544_s13  ;;  %5101 = vrot.lane.b32.xlu0 %v6466_v48, %s6543_s9  ;;  %v6411_v49 = vld [vmem:[#allocation3 + $0xc0] ss:$12 sps:$4 sm:$0xff]   ;;  %v3136_v62 = vsel %vm771_vm0, %v3065_v29, %v7230_v43  ;;  %v6469_v43 = vld [vmem:[%s6650_s23 + $0x190] sm:$0xff]   ;;  %v6477_v35 = vld [vmem:[%s6650_s23 + $0x198] sm:$0xff]  }
 0x28d   : > { %4100 = vst [vmem:[#allocation3 + $0xd0] sm:$0xf] %v4039_v30  ;;  %v6476_v29 = vld [vmem:[%s6650_s23 + $0x188] sm:$0xff]  }
 0x28e   : > { %v2878_v34 = vpop.permute.xlu1 %2877  ;;  %v8277_v3 = vpop.permute.xlu0 %2979 }
 0x28f   : > { %v3134_v32 = vsel %vm771_vm0, %v3062_v14, %v2878_v34  ;;  %v6474_v14 = vld [vmem:[%s6650_s23 + $0x108] sm:$0xff]  }
 0x290   : > { %v3222_v63 = vsel %vm3151_vm5, %v3134_v32, %v8123_v38  ;;  %3669 = vrot.lane.b32.xlu1 %v3443_v45, %s6544_s13  ;;  %5105 = vrot.lane.b32.xlu0 %v6467_v61, %s6543_s9  ;;  %v6412_v60 = vld [vmem:[#allocation3 + $0xdc] ss:$12 sps:$4 sm:$0xff]  }
 0x291   : > { %3271 = vst [vmem:[#allocation3 + $0x114] sm:$0xf] %v3222_v63 }
 0x292   : > { %v2874_v28 = vpop.permute.xlu1 %2873  ;;  %v8288_v1 = vpop.permute.xlu0 %3619 }
 0x293   : > { %v3130_v38 = vsel %vm771_vm0, %v3056_v46, %v2874_v28  ;;  %v6475_v46 = vld [vmem:[%s6650_s23 + $0x118] sm:$0xff]   ;;  %s272_s23 = sand.u32 1, %s6532_s25  }
 0x294   : > { %v3216_v0 = vsel %vm3151_vm5, %v3130_v38, %v8135_v5  ;;  %2929 = vrot.lane.b32.xlu1 %v2672_v50, %s6545_s16  ;;  %v6409_v2 = vld [vmem:[#allocation3 + $0xc4] ss:$12 sps:$4 sm:$0xff]   ;;  %5109 = vrot.lane.b32.xlu0 %v6468_v33, %s6543_s9  ;;  %v3508_v5 = vpack.c.bf16 %v3476_v31, %v3476_v31  ;;  %s8734_s28 = scalar_lea.sflag [#allocation5], %s272_s23 }
 0x295   : > { %3269 = vst [vmem:[#allocation3 + $0xfc] sm:$0xf] %v3216_v0  ;;  %4811 = vmatprep.mubr.bf16.mxu1 %v6409_v2 }
 0x296   : > { %v3714_v23 = vpop.permute.xlu1 %3713  ;;  %v2976_v37 = vpop.permute.xlu0 %2975  ;;  %4812 = vmatmul.mubr.bf16.gmra.mrb[28].mxu1 %v6411_v49 }
 0x297   : > { %v3970_v41 = vsel %vm771_vm0, %v3898_v15, %v3714_v23  ;;  %v3225_v13 = vsel %vm3151_vm5, %v3136_v62, %v2976_v37  ;;  %4819 = vmatprep.mubr.bf16.mxu1 %v6412_v60  ;;  %v3307_v60 = vld [vmem:[#allocation2 + $0x6f1] sm:$0xff] }
 0x298   : > { %v4057_v59 = vsel %vm3151_vm5, %v3970_v41, %v8198_v22  ;;  %3272 = vst [vmem:[#allocation3 + $0x120] sm:$0xf] %v3225_v13  ;;  %3765 = vrot.lane.b32.xlu1 %v3508_v5, %s6545_s16  ;;  %5113 = vrot.lane.b32.xlu0 %v6469_v43, %s6543_s9  ;;  %v6421_v45 = vld [vmem:[#allocation3 + $0x108] ss:$12 sps:$4 sm:$0xff]   ;;  %s5558_s16 = sshll.u32 %s272_s23, 8 }
 0x299   : > { %4106 = vst [vmem:[#allocation3 + $0x118] sm:$0xf] %v4057_v59  ;;  %s8661_s17 = scalar_lea.vmem [#allocation4], %s5558_s16 }
 0x29a   : > { %v3710_v27 = vpop.permute.xlu1 %3709  ;;  %v8311_v6 = vpop.permute.xlu0 %3631  ;;  %s5492_s19 = sshll.u32 %s8661_s17, 4  ;;  %s8727_s19 = int_to_ptr.vmem [resolvable:$true] %s5492_s19 }
 0x29b   : > { %v3966_v39 = vsel %vm771_vm0, %v3892_v40, %v3710_v27  ;;  %v3339_v27 = vpack.c.bf16 %v3307_v60, %v3307_v60  ;;  %s6478_s29 = scalar_lea.vmem %s8727_s19, 4096  ;;  %p6485_p0 = scmp.lt.s32.totalorder %s8727_s19, %s6483_s14 }
 0x29c   : > { %v4051_v22 = vsel %vm3151_vm5, %v3966_v39, %v8211_v55  ;;  %5087 = vrot.lane.b32.xlu1 %v6470_v10, %s6543_s9  ;;  %v6418_v36 = vld [vmem:[#allocation3 + $0xf0] ss:$12 sps:$4 sm:$0xff]   ;;  %p6479_p11 = scmp.ne.s32.totalorder %s8727_s19, %s6478_s29  ;;  %p6486_p1 = scmp.lt.s32.totalorder %s6484_s15, %s6478_s29 }
 0x29d   : > { %4104 = vst [vmem:[#allocation3 + $0x100] sm:$0xf] %v4051_v22  ;;  %v3305_v22 = vld [vmem:[#allocation2 + $0x6d1] sm:$0xff] }
 0x29e   : > { %v8318_v52 = vpop.permute.xlu1 %3625  ;;  %v8320_v58 = vpop.permute.xlu0 %2987  ;;  %4820 = vmatmul.mubr.bf16.gmra.mrb[32].mxu1 %v6414_v56  ;;  %p6480_p12 = pnand %p6479_p11, %p6627_p5  ;;  %p6487_p2 = por %p6486_p1, %p6485_p0 }
 0x2a0   : > { %5091 = vrot.lane.b32.xlu1 %v6471_v25, %s6543_s9  ;;  %v6419_v7 = vld [vmem:[#allocation3 + $0x10c] ss:$12 sps:$4 sm:$0xff]   ;;  %v3907_v25 = vsel %vm2154_vm2, %v3339_v27, %v8266_v12  ;;  %v2445_v27 = vld [vmem:[#allocation2 + $0x1b0] sm:$0xff]  ;;  %p6481_p13 = pneg %p6480_p12 }
 0x2a2   : > { %v8324_v57 = vpop.permute.xlu1 %2981  ;;  %v8326_v24 = vpop.permute.xlu0 %3627  ;;  %p6488_p3 = pnand %p6487_p2, %p6481_p13 }
 0x2a4   : > { %v6416_v55 = vld [vmem:[#allocation3 + $0xf4] ss:$12 sps:$4 sm:$0xff]   ;;  %5095 = vrot.lane.b32.xlu1 %v6472_v51, %s6543_s9  ;;  %v3337_v51 = vpack.c.bf16 %v3305_v22, %v3305_v22 }
 0x2a5   : > { %4827 = vmatprep.mubr.bf16.mxu1 %v6416_v55 }
 0x2a6   : > { %v8330_v8 = vpop.permute.xlu1 %3621  ;;  %v8332_v42 = vpop.permute.xlu0 %2983  ;;  %4828 = vmatmul.mubr.bf16.gmra.mrb[36].mxu1 %v6418_v36 }
 0x2a7   : > { %4835 = vmatprep.mubr.bf16.mxu1 %v6419_v7 }
 0x2a8   : > { %5099 = vrot.lane.b32.xlu1 %v6473_v47, %s6543_s9 }
 0x2aa   : > { %v8336_v17 = vpop.permute.xlu1 %2977  ;;  %v3816_v30 = vpop.permute.xlu0 %3815 }
 0x2ac   : > { %v5900_v48 = vpop.f32.mrb[0].mxu1  ;;  %5103 = vrot.lane.b32.xlu1 %v6474_v14, %s6543_s9 }
 0x2ad   : > { %v5901_v34 = vpop.f32.mrb[1].mxu1 }
 0x2ae   : > { %v8340_v44 = vadd.f32 %v5901_v34, %v5900_v48  ;;  %v5903_v32 = vpop.f32.mrb[2].mxu1  ;;  %v8342_v18 = vpop.permute.xlu1 %3633  ;;  %4836 = vmatmul.mubr.bf16.gmra.mrb[40].mxu1 %v6421_v45  ;;  %v3901_v48 = vsel %vm2154_vm2, %v3337_v51, %v8288_v1  ;;  %v3308_v51 = vld [vmem:[#allocation2 + $0x701] sm:$0xff] }
 0x2af   : > { %v5904_v63 = vpop.f32.mrb[3].mxu1  ;;  %v3812_v61 = vpop.permute.xlu0 %3811 }
 0x2b0   : > { %v8344_v20 = vadd.f32 %v5904_v63, %v5903_v32  ;;  %5107 = vrot.lane.b32.xlu1 %v6475_v46, %s6543_s9 }
 0x2b2   : > { %v8348_v28 = vpop.permute.xlu1 %2989 }
 0x2b3   : > { %v2792_v50 = vpop.permute.xlu0 %2791 }
 0x2b4   : > { %5111 = vrot.lane.b32.xlu1 %v6476_v29, %s6543_s9  ;;  %v3077_v12 = vsel %vm2154_vm2, %v8189_v54, %v2792_v50  ;;  %v3311_v29 = vld [vmem:[#allocation2 + $0x731] sm:$0xff] }
 0x2b5   : > { %v3309_v50 = vld [vmem:[#allocation2 + $0x711] sm:$0xff] }
 0x2b6   : > { %v8352_v38 = vpop.permute.xlu1 %3629 }
 0x2b7   : > { %v2788_v31 = vpop.permute.xlu0 %2787 }
 0x2b8   : > { %5115 = vrot.lane.b32.xlu1 %v6477_v35, %s6543_s9  ;;  %v3071_v35 = vsel %vm2154_vm2, %v8200_v11, %v2788_v31 }
 0x2b9   : > { %v5906_v2 = vpop.f32.mrb[4].mxu1 }
 0x2ba   : > { %v8356_v0 = vpop.permute.xlu1 %2985  ;;  %v5907_v33 = vpop.f32.mrb[5].mxu1 }
 0x2bb   : > { %v3824_v49 = vpop.permute.xlu0 %3823  ;;  %v8358_v53 = vadd.f32 %v5907_v33, %v5906_v2  ;;  %v5909_v62 = vpop.f32.mrb[6].mxu1  ;;  %v3343_v33 = vpack.c.bf16 %v3311_v29, %v3311_v29 }
 0x2bc   : > { %v5910_v15 = vpop.f32.mrb[7].mxu1 }
 0x2bd   : > { %v8360_v37 = vadd.f32 %v5910_v15, %v5909_v62 }
 0x2be   : > { %v2790_v23 = vpop.permute.xlu1 %2789 }
 0x2bf   : > { %v3820_v5 = vpop.permute.xlu0 %3819 }
 0x2c1   : > { %v5912_v13 = vpop.f32.mrb[8].mxu1 }
 0x2c2   : > { %v2786_v41 = vpop.permute.xlu1 %2785  ;;  %v5913_v59 = vpop.f32.mrb[9].mxu1 }
 0x2c3   : > { %v2796_v9 = vpop.permute.xlu0 %2795  ;;  %v8362_v43 = vadd.f32 %v5913_v59, %v5912_v13  ;;  %v5915_v40 = vpop.f32.mrb[10].mxu1  ;;  %v3341_v13 = vpack.c.bf16 %v3309_v50, %v3309_v50 }
 0x2c4   : > { %v5916_v39 = vpop.f32.mrb[11].mxu1 }
 0x2c5   : > { %v8366_v56 = vadd.f32 %v5916_v39, %v5915_v40  ;;  %v3913_v59 = vsel %vm2154_vm2, %v3341_v13, %v8326_v24  ;;  %v3068_v24 = vsel %vm2154_vm2, %v8128_v21, %v2786_v41 }
 0x2c6   : > { %v8364_v10 = vpop.permute.xlu1 %3817 }
 0x2c7   : > { %v3720_v55 = vpop.permute.xlu0 %3719 }
 0x2c8   : > { %v3976_v36 = vsel %vm771_vm0, %v3907_v25, %v3720_v55  ;;  %v2477_v55 = vpack.c.bf16 %v2445_v27, %v2445_v27 }
 0x2c9   : > { %v4066_v7 = vsel %vm3151_vm5, %v3976_v36, %v3816_v30 }
 0x2ca   : > { %4109 = vst [vmem:[#allocation3 + $0x13c] sm:$0xf] %v4066_v7  ;;  %v8372_v47 = vpop.permute.xlu1 %3813 }
 0x2cb   : > { %v3716_v14 = vpop.permute.xlu0 %3715 }
 0x2cc   : > { %v3972_v34 = vsel %vm771_vm0, %v3901_v48, %v3716_v14  ;;  %v8796_v48 = vld [vmem:[#allocation7_spill] sm:$0xff] }
 0x2cd   : > { %v4060_v45 = vsel %vm3151_vm5, %v3972_v34, %v3812_v61  ;;  %v2993_v14 = vsel %vm2154_vm2, %v2477_v55, %v8796_v48  ;;  %v3340_v34 = vpack.c.bf16 %v3308_v51, %v3308_v51 }
 0x2ce   : > { %4107 = vst [vmem:[#allocation3 + $0x124] sm:$0xf] %v4060_v45  ;;  %v8378_v32 = vpop.permute.xlu1 %2797 }
 0x2cf   : > { %v2888_v63 = vpop.permute.xlu0 %2887  ;;  %v3086_v13 = vsel %vm2154_vm2, %v8147_v16, %v8378_v32 }
 0x2d0   : > { %v3144_v30 = vsel %vm771_vm0, %v3077_v12, %v2888_v63  ;;  %v3281_v12 = vld [vmem:[#allocation2 + $0x11] sm:$0xff]  ;;  %v3306_v63 = vld [vmem:[#allocation2 + $0x6e1] sm:$0xff] }
 0x2d1   : > { %v3237_v46 = vsel %vm3151_vm5, %v3144_v30, %v8332_v42  ;;  %v3919_v42 = vsel %vm2154_vm2, %v3343_v33, %v8311_v6  ;;  %v3074_v6 = vsel %vm2154_vm2, %v8121_v19, %v2790_v23 }
 0x2d2   : > { %3276 = vst [vmem:[#allocation3 + $0x150] sm:$0xf] %v3237_v46  ;;  %v8385_v1 = vpop.permute.xlu1 %2793 }
 0x2d3   : > { %v2884_v61 = vpop.permute.xlu0 %2883 }
 0x2d4   : > { %v3140_v2 = vsel %vm771_vm0, %v3071_v35, %v2884_v61  ;;  %v3338_v35 = vpack.c.bf16 %v3306_v63, %v3306_v63 }
 0x2d5   : > { %v3231_v54 = vsel %vm3151_vm5, %v3140_v2, %v8277_v3 }
 0x2d6   : > { %3274 = vst [vmem:[#allocation3 + $0x138] sm:$0xf] %v3231_v54  ;;  %v8392_v62 = vpop.permute.xlu1 %3825  ;;  %v3904_v33 = vsel %vm2154_vm2, %v3338_v35, %v8330_v8 }
 0x2d7   : > { %v3728_v15 = vpop.permute.xlu0 %3727 }
 0x2d8   : > { %v3984_v60 = vsel %vm771_vm0, %v3919_v42, %v3728_v15 }
 0x2d9   : > { %v4078_v11 = vsel %vm3151_vm5, %v3984_v60, %v3824_v49 }
 0x2da   : > { %4113 = vst [vmem:[#allocation3 + $0x16c] sm:$0xf] %v4078_v11  ;;  %v8398_v31 = vpop.permute.xlu1 %3821 }
 0x2db   : > { %v3724_v3 = vpop.permute.xlu0 %3723 }
 0x2dc   : > { %v3980_v40 = vsel %vm771_vm0, %v3913_v59, %v3724_v3  ;;  %v3312_v3 = vld [vmem:[#allocation2 + $0x741] sm:$0xff] }
 0x2dd   : > { %v4072_v39 = vsel %vm3151_vm5, %v3980_v40, %v3820_v5  ;;  %v3083_v5 = vsel %vm2154_vm2, %v8252_v4, %v2796_v9  ;;  %v3910_v4 = vsel %vm2154_vm2, %v3340_v34, %v8318_v52  ;;  %v8797_v9 = vld [vmem:[#allocation8_spill] sm:$0xff]  ;;  %v8799_v34 = vld [vmem:[#allocation11_spill] sm:$0xff] }
 0x2de   : > { %4111 = vst [vmem:[#allocation3 + $0x154] sm:$0xf] %v4072_v39  ;;  %v2886_v22 = vpop.permute.xlu1 %2885  ;;  %v3088_v30 = vsel %vm771_vm0, %v2993_v14, %v8797_v9  ;;  %v3344_v39 = vpack.c.bf16 %v3312_v3, %v3312_v3  ;;  %v6440_v3 = vld [vmem:[#allocation3 + $0x38] ss:$12 sps:$4 sm:$0xff]  }
 0x2df   : > { %v3142_v25 = vsel %vm771_vm0, %v3074_v6, %v2886_v22  ;;  %v3668_v49 = vpop.permute.xlu0 %3667  ;;  %v3310_v22 = vld [vmem:[#allocation2 + $0x721] sm:$0xff] }
 0x2e0   : > { %v3234_v36 = vsel %vm3151_vm5, %v3142_v25, %v8324_v57 }
 0x2e1   : > { %3275 = vst [vmem:[#allocation3 + $0x144] sm:$0xf] %v3234_v36 }
 0x2e2   : > { %v2882_v7 = vpop.permute.xlu1 %2881 }
 0x2e3   : > { %v3138_v19 = vsel %vm771_vm0, %v3068_v24, %v2882_v7  ;;  %v2892_v23 = vpop.permute.xlu0 %2891 }
 0x2e4   : > { %v3228_v45 = vsel %vm3151_vm5, %v3138_v19, %v8336_v17  ;;  %v3148_v57 = vsel %vm771_vm0, %v3083_v5, %v2892_v23  ;;  %v3313_v17 = vpack.c.bf16 %v3281_v12, %v3281_v12  ;;  %v2446_v5 = vld [vmem:[#allocation2 + $0x1c0] sm:$0xff] }
 0x2e5   : > { %3273 = vst [vmem:[#allocation3 + $0x12c] sm:$0xf] %v3228_v45  ;;  %v3243_v21 = vsel %vm3151_vm5, %v3148_v57, %v8320_v58  ;;  %v8798_v58 = vld [vmem:[#allocation9_spill] sm:$0xff]  ;;  %v3282_v23 = vld [vmem:[#allocation2 + $0x21] sm:$0xff]  ;;  %v2478_v48 = vpack.c.bf16 %v2446_v5, %v2446_v5 }
 0x2e6   : > { %3278 = vst [vmem:[#allocation3 + $0x168] sm:$0xf] %v3243_v21  ;;  %v3722_v41 = vpop.permute.xlu1 %3721  ;;  %v3829_v52 = vsel %vm2154_vm2, %v3313_v17, %v8798_v58  ;;  %v3314_v63 = vpack.c.bf16 %v3282_v23, %v3282_v23  ;;  %v6449_v5 = vld [vmem:[#allocation3 + $0x110] ss:$12 sps:$4 sm:$0xff]   ;;  %v6451_v23 = vld [vmem:[#allocation3 + $0x140] ss:$12 sps:$4 sm:$0xff]  }
 0x2e7   : > { %v3978_v46 = vsel %vm771_vm0, %v3910_v4, %v3722_v41  ;;  %v2928_v29 = vpop.permute.xlu0 %2927  ;;  %v3924_v50 = vsel %vm771_vm0, %v3829_v52, %v3668_v49  ;;  %v2996_v45 = vsel %vm2154_vm2, %v2478_v48, %v8799_v34  ;;  %v8800_v4 = vld [vmem:[#allocation10_spill] sm:$0xff] }
 0x2e8   : > { %v4069_v61 = vsel %vm3151_vm5, %v3978_v46, %v8364_v10  ;;  %v3153_v2 = vsel %vm3151_vm5, %v3088_v30, %v2928_v29  ;;  %v6428_v24 = vld [vmem:[#allocation3 + $0x138] ss:$12 sps:$4 sm:$0xff]   ;;  %v3832_v41 = vsel %vm2154_vm2, %v3314_v63, %v8800_v4 }
 0x2e9   : > { %4110 = vst [vmem:[#allocation3 + $0x148] sm:$0xf] %v4069_v61  ;;  %3248 = vst [vmem:[#allocation3] sm:$0xf] %v3153_v2  ;;  %v6452_v48 = vld [vmem:[#allocation3 + $0x158] ss:$12 sps:$4 sm:$0xff]  }
 0x2ea   : > { %v3718_v54 = vpop.permute.xlu1 %3717  ;;  %v6457_v34 = vld [vmem:[%s8780_s5 + $0x18] sm:$0xff]  }
 0x2eb   : > { %v3974_v42 = vsel %vm771_vm0, %v3904_v33, %v3718_v54  ;;  %v3764_v15 = vpop.permute.xlu0 %3763  ;;  %v6435_v33 = vld [vmem:[#allocation3 + $0x8] ss:$12 sps:$4 sm:$0xff]  }
 0x2ec   : > { %v4063_v60 = vsel %vm3151_vm5, %v3974_v42, %v8372_v47  ;;  %v3988_v10 = vsel %vm3151_vm5, %v3924_v50, %v3764_v15  ;;  %v3080_v47 = vsel %vm2154_vm2, %v8159_v26, %v8385_v1  ;;  %v6425_v32 = vld [vmem:[#allocation3 + $0x120] ss:$12 sps:$4 sm:$0xff]   ;;  %v3342_v26 = vpack.c.bf16 %v3310_v22, %v3310_v22  ;;  %v6442_v22 = vld [vmem:[#allocation3 + $0x68] ss:$12 sps:$4 sm:$0xff]  }
 0x2ed   : > { %4108 = vst [vmem:[#allocation3 + $0x130] sm:$0xf] %v4063_v60  ;;  %4083 = vst [vmem:[#allocation3 + $0x4] sm:$0xf] %v3988_v10 }
 0x2ee   : > { %v2894_v11 = vpop.permute.xlu1 %2893 }
 0x2ef   : > { %v3150_v8 = vsel %vm771_vm0, %v3086_v13, %v2894_v11  ;;  %v6439_v11 = vld [vmem:[#allocation3 + $0x20] ss:$12 sps:$4 sm:$0xff]  }
 0x2f0   : > { %v3246_v59 = vsel %vm3151_vm5, %v3150_v8, %v8348_v28  ;;  %v3922_v28 = vsel %vm2154_vm2, %v3344_v39, %v8342_v18  ;;  %v6426_v49 = vld [vmem:[#allocation3 + $0x13c] ss:$12 sps:$4 sm:$0xff]  }
 0x2f1   : > { %3279 = vst [vmem:[#allocation3 + $0x174] sm:$0xf] %v3246_v59  ;;  %v6455_v8 = vld [vmem:[%s8780_s5 + $0x8] sm:$0xff]  }
 0x2f2   : > { %v2890_v40 = vpop.permute.xlu1 %2889 }
 0x2f3   : > { %v3146_v27 = vsel %vm771_vm0, %v3080_v47, %v2890_v40 }
 0x2f4   : > { %v3240_v6 = vsel %vm3151_vm5, %v3146_v27, %v8356_v0  ;;  %v6423_v16 = vld [vmem:[#allocation3 + $0x124] ss:$12 sps:$4 sm:$0xff]   ;;  %v3916_v0 = vsel %vm2154_vm2, %v3342_v26, %v8352_v38 }
 0x2f5   : > { %3277 = vst [vmem:[#allocation3 + $0x15c] sm:$0xf] %v3240_v6  ;;  %4843 = vmatprep.mubr.bf16.mxu1 %v6423_v16  ;;  %v6441_v16 = vld [vmem:[#allocation3 + $0x50] ss:$12 sps:$4 sm:$0xff]  }
 0x2f6   : > { %v3730_v25 = vpop.permute.xlu1 %3729  ;;  %4844 = vmatmul.mubr.bf16.gmra.mrb[44].mxu1 %v6425_v32 }
 0x2f7   : > { %v3986_v55 = vsel %vm771_vm0, %v3922_v28, %v3730_v25  ;;  %4851 = vmatprep.mubr.bf16.mxu1 %v6426_v49 }
 0x2f8   : > { %v4081_v1 = vsel %vm3151_vm5, %v3986_v55, %v8392_v62  ;;  %v6434_v58 = vld [vmem:[#allocation3 + $0x168] ss:$12 sps:$4 sm:$0xff]  }
 0x2f9   : > { %4114 = vst [vmem:[#allocation3 + $0x178] sm:$0xf] %v4081_v1  ;;  %v6443_v1 = vld [vmem:[#allocation3 + $0x80] ss:$12 sps:$4 sm:$0xff]  }
 0x2fa   : > { %v3726_v36 = vpop.permute.xlu1 %3725 }
 0x2fb   : > { %v3982_v51 = vsel %vm771_vm0, %v3916_v0, %v3726_v36  ;;  %v6444_v36 = vld [vmem:[#allocation3 + $0x98] ss:$12 sps:$4 sm:$0xff]  }
 0x2fc   : > { %v4075_v18 = vsel %vm3151_vm5, %v3982_v51, %v8398_v31  ;;  %v6431_v14 = vld [vmem:[#allocation3 + $0x150] ss:$12 sps:$4 sm:$0xff]   ;;  %v6454_v31 = vld [vmem:[%s8780_s5] sm:$0xff]  }
 0x2fd   : > { %4112 = vst [vmem:[#allocation3 + $0x160] sm:$0xf] %v4075_v18  ;;  %6202 = vmatprep.subr.bf16.mxu1 %v6454_v31  ;;  %v6445_v51 = vld [vmem:[#allocation3 + $0xb0] ss:$12 sps:$4 sm:$0xff]   ;;  %v6446_v18 = vld [vmem:[#allocation3 + $0xc8] ss:$12 sps:$4 sm:$0xff]  }
 0x2fe   : > { %v2834_v7 = vpop.permute.xlu1 %2833  ;;  %4852 = vmatmul.mubr.bf16.gmra.mrb[48].mxu1 %v6428_v24  ;;  %v6447_v24 = vld [vmem:[#allocation3 + $0xe0] ss:$12 sps:$4 sm:$0xff]  }
 0x2ff   : > { %v3090_v38 = vsel %vm771_vm0, %v2996_v45, %v2834_v7  ;;  %v6448_v7 = vld [vmem:[#allocation3 + $0xf8] ss:$12 sps:$4 sm:$0xff]  }
 0x300   : > { %v6432_v12 = vld [vmem:[#allocation3 + $0x16c] ss:$12 sps:$4 sm:$0xff]   ;;  %v6458_v45 = vld [vmem:[%s8780_s5 + $0x20] sm:$0xff]  }
 0x302   : > { %v3670_v19 = vpop.permute.xlu1 %3669 }
 0x303   : > { %v3926_v9 = vsel %vm771_vm0, %v3832_v41, %v3670_v19  ;;  %v6450_v19 = vld [vmem:[#allocation3 + $0x128] ss:$12 sps:$4 sm:$0xff]  }
 0x304   : > { %v6429_v62 = vld [vmem:[#allocation3 + $0x154] ss:$12 sps:$4 sm:$0xff]  }
 0x305   : > { %4859 = vmatprep.mubr.bf16.mxu1 %v6429_v62  ;;  %v6453_v62 = vld [vmem:[#allocation3 + $0x170] ss:$12 sps:$4 sm:$0xff]  }
 0x306   : > { %v2930_v57 = vpop.permute.xlu1 %2929  ;;  %4860 = vmatmul.mubr.bf16.gmra.mrb[52].mxu1 %v6431_v14  ;;  %v6456_v14 = vld [vmem:[%s8780_s5 + $0x10] sm:$0xff]  }
 0x307   : > { %v3156_v21 = vsel %vm3151_vm5, %v3090_v38, %v2930_v57  ;;  %4867 = vmatprep.mubr.bf16.mxu1 %v6432_v12 }
 0x308   : > { %3249 = vst [vmem:[#allocation3 + $0xc] sm:$0xf] %v3156_v21 }
 0x309   : > { %v5918_v46 = vpop.f32.mrb[12].mxu1 }
 0x30a   : > { %v3766_v30 = vpop.permute.xlu1 %3765  ;;  %v5919_v17 = vpop.f32.mrb[13].mxu1 }
 0x30b   : > { %v3991_v29 = vsel %vm3151_vm5, %v3926_v9, %v3766_v30  ;;  %v8471_v35 = vadd.f32 %v5919_v17, %v5918_v46  ;;  %v5921_v61 = vpop.f32.mrb[14].mxu1 }
 0x30c   : > { %4084 = vst [vmem:[#allocation3 + $0x10] sm:$0xf] %v3991_v29  ;;  %v5922_v2 = vpop.f32.mrb[15].mxu1  ;;  %v6459_v29 = vld [vmem:[%s8780_s5 + $0x28] sm:$0xff]  }
 0x30d   : > { %v8473_v52 = vadd.f32 %v5922_v2, %v5921_v61 }
 0x30e   : > { %4868 = vmatmul.mubr.bf16.gmra.mrb[56].mxu1 %v6434_v58 }
 0x30f   : > { %6170 = vmatprep.mubr.msk.bf16.mxu1 %vm2154_vm2, %v6435_v33  ;;  %v6436_v42 = vld [vmem:[#allocation3] ss:$12 sps:$4 sm:$0xff]  }
 0x311   : > { %v5924_v54 = vpop.f32.mrb[16].mxu1 }
 0x312   : > { %v5925_v50 = vpop.f32.mrb[17].mxu1 }
 0x313   : > { %v6438_v15 = vld [vmem:[#allocation3 + $0x4] ss:$12 sps:$4 sm:$0xff]   ;;  %v8476_v60 = vadd.f32 %v5925_v50, %v5924_v54  ;;  %v5927_v10 = vpop.f32.mrb[18].mxu1 }
 0x314   : > { %4747 = vmatprep.mubr.bf16.mxu0 %v6438_v15  ;;  %v5928_v13 = vpop.f32.mrb[19].mxu1 }
 0x315   : > { %v8481_v59 = vadd.f32 %v5928_v13, %v5927_v10  ;;  %4748 = vmatmul.mubr.bf16.vlgmr.msra.gmra.mrb[128].mxu0 %v6436_v42 }
 0x316   : > { %6171 = vmatmul.mubr.msk.bf16.vlgmr.msra.gmra.mrb[60].mxu1 %vm2154_vm2, %v6439_v11 }
 0x317   : > { %6174 = vmatprep.mubr.msk.bf16.mxu1 %vm2154_vm2, %v6440_v3  ;;  %6203 = vmatpush3.bf16.msra.mxu1 %v6454_v31 }
 0x318   : > { %6204 = vmatprep.subr.bf16.mxu1 %v6455_v8 }
 0x319   : > { %v5930_v47 = vpop.f32.mrb[20].mxu1 }
 0x31a   : > { %v5931_v40 = vpop.f32.mrb[21].mxu1 }
 0x31b   : > { %v8485_v27 = vadd.f32 %v5931_v40, %v5930_v47  ;;  %v5933_v39 = vpop.f32.mrb[22].mxu1  ;;  %6205 = vmatpush3.bf16.msra.mxu1 %v6455_v8 }
 0x31c   : > { %v5934_v6 = vpop.f32.mrb[23].mxu1  ;;  %6206 = vmatprep.subr.bf16.mxu1 %v6456_v14 }
 0x31d   : > { %v8487_v32 = vadd.f32 %v5934_v6, %v5933_v39 }
 0x31e   : > { %6175 = vmatmul.mubr.msk.bf16.gmra.mrb[64].mxu1 %vm2154_vm2, %v6441_v16 }
 0x31f   : > { %6178 = vmatprep.mubr.msk.bf16.mxu1 %vm2154_vm2, %v6442_v22  ;;  %6207 = vmatpush3.bf16.msra.mxu1 %v6456_v14 }
 0x320   : > { %6208 = vmatprep.subr.bf16.mxu1 %v6457_v34 }
 0x321   : > { %v5936_v28 = vpop.f32.mrb[24].mxu1 }
 0x322   : > { %v5937_v25 = vpop.f32.mrb[25].mxu1 }
 0x323   : > { %v8491_v49 = vadd.f32 %v5937_v25, %v5936_v28  ;;  %v5939_v55 = vpop.f32.mrb[26].mxu1  ;;  %6209 = vmatpush3.bf16.msra.mxu1 %v6457_v34 }
 0x324   : > { %v5940_v26 = vpop.f32.mrb[27].mxu1  ;;  %6210 = vmatprep.subr.bf16.mxu1 %v6458_v45 }
 0x325   : > { %v8493_v0 = vadd.f32 %v5940_v26, %v5939_v55 }
 0x326   : > { %6179 = vmatmul.mubr.msk.bf16.gmra.mrb[68].mxu1 %vm2154_vm2, %v6443_v1 }
 0x327   : > { %6182 = vmatprep.mubr.msk.bf16.mxu1 %vm2154_vm2, %v6444_v36  ;;  %6211 = vmatpush3.bf16.msra.mxu1 %v6458_v45  ;;  %v8553_v45 = vld [vmem:[%s8779_s4] ss:$0 sm:$0xff] }
 0x328   : > { %6212 = vmatprep.subr.bf16.mxu1 %v6459_v29 }
 0x32b   : > { %6213 = vmatpush3.bf16.msra.mxu1 %v6459_v29  ;;  %v4761_v29 = vadd.f32 %v8344_v20, %v8553_v45  ;;  %v4766_v20 = vadd.f32 %v8358_v53, %v8553_v45 }
 0x32e   : > { %6183 = vmatmul.mubr.msk.bf16.gmra.mrb[72].mxu1 %vm2154_vm2, %v6445_v51 }
 0x32f   : > { %6186 = vmatprep.mubr.msk.bf16.mxu1 %vm2154_vm2, %v6446_v18 }
 0x336   : > { %6187 = vmatmul.mubr.msk.bf16.gmra.mrb[76].mxu1 %vm2154_vm2, %v6447_v24 }
 0x337   : > { %6190 = vmatprep.mubr.msk.bf16.mxu1 %vm2154_vm2, %v6448_v7 }
 0x33e   : > { %6191 = vmatmul.mubr.msk.bf16.gmra.mrb[80].mxu1 %vm2154_vm2, %v6449_v5 }
 0x33f   : > { %6194 = vmatprep.mubr.msk.bf16.mxu1 %vm2154_vm2, %v6450_v19 }
 0x346   : > { %6195 = vmatmul.mubr.msk.bf16.gmra.mrb[84].mxu1 %vm2154_vm2, %v6451_v23 }
 0x347   : > { %6198 = vmatprep.mubr.msk.bf16.mxu1 %vm2154_vm2, %v6452_v48 }
 0x34e   : > { %6199 = vmatmul.mubr.msk.bf16.gmra.mrb[88].mxu1 %vm2154_vm2, %v6453_v62 }
 0x369   : > { %v5942_v38 = vpop.f32.mrb[28].mxu1 }
 0x36a   : > { %v5943_v57 = vpop.f32.mrb[29].mxu1 }
 0x36b   : > { %v8515_v12 = vadd.f32 %v5943_v57, %v5942_v38  ;;  %v5945_v31 = vpop.f32.mrb[30].mxu1  ;;  %v4758_v57 = vadd.f32 %v8340_v44, %v8553_v45 }
 0x36c   : > { %v5946_v63 = vpop.f32.mrb[31].mxu1 }
 0x36d   : > { %v8517_v21 = vadd.f32 %v5946_v63, %v5945_v31 }
 0x371   : > { %v5948_v4 = vpop.f32.mrb[32].mxu1 }
 0x372   : > { %v5949_v41 = vpop.f32.mrb[33].mxu1 }
 0x373   : > { %v8519_v9 = vadd.f32 %v5949_v41, %v5948_v4  ;;  %v5951_v30 = vpop.f32.mrb[34].mxu1 }
 0x374   : > { %v5952_v46 = vpop.f32.mrb[35].mxu1 }
 0x375   : > { %v8524_v17 = vadd.f32 %v5952_v46, %v5951_v30 }
 0x379   : > { %v5954_v61 = vpop.f32.mrb[36].mxu1 }
 0x37a   : > { %v5955_v2 = vpop.f32.mrb[37].mxu1 }
 0x37b   : > { %v8526_v58 = vadd.f32 %v5955_v2, %v5954_v61  ;;  %v5957_v33 = vpop.f32.mrb[38].mxu1 }
 0x37c   : > { %v5958_v54 = vpop.f32.mrb[39].mxu1 }
 0x37d   : > { %v8528_v50 = vadd.f32 %v5958_v54, %v5957_v33 }
 0x381   : > { %v5960_v42 = vpop.f32.mrb[40].mxu1 }
 0x382   : > { %v5961_v15 = vpop.f32.mrb[41].mxu1 }
 0x383   : > { %v8530_v10 = vadd.f32 %v5961_v15, %v5960_v42  ;;  %v5963_v13 = vpop.f32.mrb[42].mxu1 }
 0x384   : > { %v5964_v11 = vpop.f32.mrb[43].mxu1 }
 0x385   : > { %v8532_v8 = vadd.f32 %v5964_v11, %v5963_v13 }
 0x3c9   : > { %v5966_v3 = vpop.f32.mrb[44].mxu1 }
 0x3ca   : > { %v5967_v47 = vpop.f32.mrb[45].mxu1 }
 0x3cb   : > { %v8534_v40 = vadd.f32 %v5967_v47, %v5966_v3  ;;  %v5969_v39 = vpop.f32.mrb[46].mxu1 }
 0x3cc   : > { %v5970_v6 = vpop.f32.mrb[47].mxu1 }
 0x3cd   : > { %v8536_v16 = vadd.f32 %v5970_v6, %v5969_v39  ;;  %v4774_v6 = vadd.f32 %v8362_v43, %v8553_v45 }
 0x3d1   : > { %v5972_v22 = vpop.f32.mrb[48].mxu1 }
 0x3d2   : > { %v5973_v28 = vpop.f32.mrb[49].mxu1 }
 0x3d3   : > { %v8538_v25 = vadd.f32 %v5973_v28, %v5972_v22  ;;  %v5975_v55 = vpop.f32.mrb[50].mxu1 }
 0x3d4   : > { %v5976_v26 = vpop.f32.mrb[51].mxu1 }
 0x3d5   : > { %v8540_v1 = vadd.f32 %v5976_v26, %v5975_v55 }
 0x3d9   : > { %v5978_v36 = vpop.f32.mrb[52].mxu1 }
 0x3da   : > { %v5979_v51 = vpop.f32.mrb[53].mxu1 }
 0x3db   : > { %v8542_v18 = vadd.f32 %v5979_v51, %v5978_v36  ;;  %v5981_v24 = vpop.f32.mrb[54].mxu1  ;;  %v4777_v51 = vadd.f32 %v8366_v56, %v8553_v45 }
 0x3dc   : > { %v5982_v7 = vpop.f32.mrb[55].mxu1 }
 0x3dd   : > { %v8544_v5 = vadd.f32 %v5982_v7, %v5981_v24  ;;  %v5086_v24 = vpop.permute.xlu0 %5085 }
 0x3e1   : > { %v5984_v19 = vpop.f32.mrb[56].mxu1 }
 0x3e2   : > { %v5985_v23 = vpop.f32.mrb[57].mxu1 }
 0x3e3   : > { %v8546_v48 = vadd.f32 %v5985_v23, %v5984_v19  ;;  %v5987_v62 = vpop.f32.mrb[58].mxu1  ;;  %v4769_v23 = vadd.f32 %v8360_v37, %v8553_v45  ;;  %v4790_v37 = vadd.f32 %v8476_v60, %v8553_v45 }
 0x3e4   : > { %v5988_v14 = vpop.f32.mrb[59].mxu1 }
 0x3e5   : > { %v8548_v34 = vadd.f32 %v5988_v14, %v5987_v62  ;;  %v5088_v14 = vpop.permute.xlu1 %5087 }
 0x3e8   : > { %v5894_v38 = vpop.f32.mrb[128].mxu0 }
 0x3e9   : > { %v5895_v31 = vpop.f32.mrb[129].mxu0  ;;  %v6172_v63 = vpop.f32.mrb[60].mxu1 }
 0x3ea   : > { %v5896_v4 = vadd.f32 %v5895_v31, %v5894_v38  ;;  %v4919_v41 = vadd.f32 %v6172_v63, %v4758_v57  ;;  %v5897_v30 = vpop.f32.mrb[130].mxu0  ;;  %v4910_v46 = vpop.f32.mrb[61].mxu1 }
 0x3eb   : > { %v5898_v61 = vpop.f32.mrb[131].mxu0  ;;  %v6173_v2 = vpop.f32.mrb[62].mxu1 }
 0x3ec   : > { %v4750_v33 = vadd.f32 %v5896_v4, %v8553_v45  ;;  %v5899_v54 = vadd.f32 %v5898_v61, %v5897_v30  ;;  %v4922_v42 = vadd.f32 %v6173_v2, %v4761_v29  ;;  %v4913_v15 = vpop.f32.mrb[63].mxu1  ;;  %v5039_v13 = vmax.f32 %v4919_v41, 0.0 }
 0x3ed   : > { %v4782_v2 = vadd.f32 %v8471_v35, %v8553_v45 }
 0x3ee   : > { %v4911_v11 = vadd.f32 %v4910_v46, %v4750_v33  ;;  %v5040_v3 = vmax.f32 %v4922_v42, 0.0  ;;  %v4753_v44 = vadd.f32 %v5899_v54, %v8553_v45  ;;  %v5090_v46 = vpop.permute.xlu0 %5089  ;;  %v4793_v42 = vadd.f32 %v8481_v59, %v8553_v45 }
 0x3f0   : > { %v5070_v47 = vpack.c.bf16 %v5040_v3, %v5039_v13  ;;  %v4914_v39 = vadd.f32 %v4913_v15, %v4753_v44  ;;  %v5037_v28 = vmax.f32 %v4911_v11, 0.0  ;;  %v4785_v3 = vadd.f32 %v8473_v52, %v8553_v45  ;;  %v5092_v44 = vpop.permute.xlu1 %5091 }
 0x3f1   : > { %v6176_v22 = vpop.f32.mrb[64].mxu1 }
 0x3f2   : > { %v5038_v55 = vmax.f32 %v4914_v39, 0.0  ;;  %v4935_v26 = vadd.f32 %v6176_v22, %v4774_v6  ;;  %v4926_v36 = vpop.f32.mrb[65].mxu1  ;;  %v5122_v4 = vsel %vm2154_vm2, %v5070_v47, %v5088_v14 }
 0x3f3   : > { %v4927_v7 = vadd.f32 %v4926_v36, %v4766_v20  ;;  %v6177_v19 = vpop.f32.mrb[66].mxu1 }
 0x3f4   : > { %v5069_v62 = vpack.c.bf16 %v5038_v55, %v5037_v28  ;;  %v4938_v43 = vadd.f32 %v6177_v19, %v4777_v51  ;;  %v4929_v38 = vpop.f32.mrb[67].mxu1  ;;  %v5043_v31 = vmax.f32 %v4935_v26, 0.0  ;;  %v4806_v55 = vadd.f32 %v8491_v49, %v8553_v45  ;;  %v5094_v26 = vpop.permute.xlu0 %5093 }
 0x3f5   : > { %v4930_v57 = vadd.f32 %v4929_v38, %v4769_v23  ;;  %v5041_v41 = vmax.f32 %v4927_v7, 0.0  ;;  %v4798_v51 = vadd.f32 %v8485_v27, %v8553_v45  ;;  %v4809_v19 = vadd.f32 %v8493_v0, %v8553_v45  ;;  %v5096_v38 = vpop.permute.xlu1 %5095 }
 0x3f6   : > { %v5044_v53 = vmax.f32 %v4938_v43, 0.0  ;;  %v5119_v63 = vsel %vm2154_vm2, %v5069_v62, %v5086_v24  ;;  %v4801_v43 = vadd.f32 %v8487_v32, %v8553_v45 }
 0x3f7   : > { %v5042_v30 = vmax.f32 %v4930_v57, 0.0  ;;  %6214 = vmatprep.mubr.msk.bf16.mxu1 %vm3151_vm5, %v5119_v63 }
 0x3f8   : > { %v5072_v56 = vpack.c.bf16 %v5044_v53, %v5043_v31  ;;  %6215 = vmatmul.mubr.msk.bf16.vlgmr.msra.gmra.mrb[92].mxu1 %vm3151_vm5, %v5122_v4 }
 0x3f9   : > { %v5071_v29 = vpack.c.bf16 %v5042_v30, %v5041_v41  ;;  %v6180_v61 = vpop.f32.mrb[68].mxu1  ;;  %v4822_v30 = vadd.f32 %v8519_v9, %v8553_v45 }
 0x3fa   : > { %v4951_v33 = vadd.f32 %v6180_v61, %v4790_v37  ;;  %v4942_v54 = vpop.f32.mrb[69].mxu1  ;;  %v5128_v22 = vsel %vm2154_vm2, %v5072_v56, %v5092_v44  ;;  %v5098_v56 = vpop.permute.xlu0 %5097 }
 0x3fb   : > { %v5125_v15 = vsel %vm2154_vm2, %v5071_v29, %v5090_v46  ;;  %v4943_v13 = vadd.f32 %v4942_v54, %v4782_v2  ;;  %v6181_v11 = vpop.f32.mrb[70].mxu1  ;;  %v4814_v46 = vadd.f32 %v8515_v12, %v8553_v45  ;;  %v4825_v2 = vadd.f32 %v8524_v17, %v8553_v45 }
 0x3fc   : > { %v4954_v60 = vadd.f32 %v6181_v11, %v4793_v42  ;;  %v4945_v47 = vpop.f32.mrb[71].mxu1  ;;  %6218 = vmatprep.mubr.msk.bf16.mxu1 %vm3151_vm5, %v5125_v15  ;;  %v5047_v6 = vmax.f32 %v4951_v33, 0.0  ;;  %v4817_v15 = vadd.f32 %v8517_v21, %v8553_v45 }
 0x3fd   : > { %v4946_v39 = vadd.f32 %v4945_v47, %v4785_v3  ;;  %v5045_v20 = vmax.f32 %v4943_v13, 0.0  ;;  %v5100_v13 = vpop.permute.xlu1 %5099 }
 0x3fe   : > { %v5048_v35 = vmax.f32 %v4954_v60, 0.0 }
 0x3ff   : > { %v5046_v28 = vmax.f32 %v4946_v39, 0.0 }
 0x400   : > { %v5074_v59 = vpack.c.bf16 %v5048_v35, %v5047_v6  ;;  %6219 = vmatmul.mubr.msk.bf16.gmra.mrb[96].mxu1 %vm3151_vm5, %v5128_v22  ;;  %v4838_v6 = vadd.f32 %v8530_v10, %v8553_v45  ;;  %v5102_v35 = vpop.permute.xlu0 %5101 }
 0x401   : > { %v5073_v52 = vpack.c.bf16 %v5046_v28, %v5045_v20  ;;  %v6184_v36 = vpop.f32.mrb[72].mxu1  ;;  %v4830_v20 = vadd.f32 %v8526_v58, %v8553_v45 }
 0x402   : > { %v4967_v24 = vadd.f32 %v6184_v36, %v4806_v55  ;;  %v4958_v7 = vpop.f32.mrb[73].mxu1  ;;  %v5134_v63 = vsel %vm2154_vm2, %v5074_v59, %v5096_v38  ;;  %v4841_v55 = vadd.f32 %v8532_v8, %v8553_v45  ;;  %v4854_v38 = vadd.f32 %v8538_v25, %v8553_v45 }
 0x403   : > { %v5131_v23 = vsel %vm2154_vm2, %v5073_v52, %v5094_v26  ;;  %v4959_v62 = vadd.f32 %v4958_v7, %v4798_v51  ;;  %v6185_v14 = vpop.f32.mrb[74].mxu1  ;;  %v4833_v51 = vadd.f32 %v8528_v50, %v8553_v45 }
 0x404   : > { %v4970_v49 = vadd.f32 %v6185_v14, %v4809_v19  ;;  %v4961_v57 = vpop.f32.mrb[75].mxu1  ;;  %6222 = vmatprep.mubr.msk.bf16.mxu1 %vm3151_vm5, %v5131_v23  ;;  %v5051_v53 = vmax.f32 %v4967_v24, 0.0  ;;  %v5104_v24 = vpop.permute.xlu1 %5103 }
 0x405   : > { %v4962_v31 = vadd.f32 %v4961_v57, %v4801_v43  ;;  %v5049_v4 = vmax.f32 %v4959_v62, 0.0 }
 0x406   : > { %v5052_v27 = vmax.f32 %v4970_v49, 0.0  ;;  %v5106_v49 = vpop.permute.xlu0 %5105 }
 0x407   : > { %v5050_v41 = vmax.f32 %v4962_v31, 0.0  ;;  %v4846_v31 = vadd.f32 %v8534_v40, %v8553_v45 }
 0x408   : > { %v5076_v0 = vpack.c.bf16 %v5052_v27, %v5051_v53  ;;  %6223 = vmatmul.mubr.msk.bf16.gmra.mrb[100].mxu1 %vm3151_vm5, %v5134_v63  ;;  %v4857_v63 = vadd.f32 %v8540_v1, %v8553_v45 }
 0x409   : > { %v5075_v32 = vpack.c.bf16 %v5050_v41, %v5049_v4  ;;  %v6188_v37 = vpop.f32.mrb[76].mxu1 }
 0x40a   : > { %v4983_v29 = vadd.f32 %v6188_v37, %v4822_v30  ;;  %v4974_v61 = vpop.f32.mrb[77].mxu1  ;;  %v5140_v60 = vsel %vm2154_vm2, %v5076_v0, %v5100_v13  ;;  %v4849_v30 = vadd.f32 %v8536_v16, %v8553_v45 }
 0x40b   : > { %v5137_v33 = vsel %vm2154_vm2, %v5075_v32, %v5098_v56  ;;  %v4975_v54 = vadd.f32 %v4974_v61, %v4814_v46  ;;  %v6189_v42 = vpop.f32.mrb[78].mxu1  ;;  %v5108_v56 = vpop.permute.xlu1 %5107 }
 0x40c   : > { %v4986_v9 = vadd.f32 %v6189_v42, %v4825_v2  ;;  %v4977_v11 = vpop.f32.mrb[79].mxu1  ;;  %6226 = vmatprep.mubr.msk.bf16.mxu1 %vm3151_vm5, %v5137_v33  ;;  %v5055_v44 = vmax.f32 %v4983_v29, 0.0  ;;  %v4870_v33 = vadd.f32 %v8546_v48, %v8553_v45 }
 0x40d   : > { %v4978_v3 = vadd.f32 %v4977_v11, %v4817_v15  ;;  %v5053_v47 = vmax.f32 %v4975_v54, 0.0  ;;  %v5110_v54 = vpop.permute.xlu0 %5109  ;;  %v4862_v15 = vadd.f32 %v8542_v18, %v8553_v45  ;;  %v4873_v11 = vadd.f32 %v8548_v34, %v8553_v45 }
 0x40e   : > { %v5056_v12 = vmax.f32 %v4986_v9, 0.0 }
 0x40f   : > { %v5054_v39 = vmax.f32 %v4978_v3, 0.0 }
 0x410   : > { %v5078_v17 = vpack.c.bf16 %v5056_v12, %v5055_v44  ;;  %6227 = vmatmul.mubr.msk.bf16.gmra.mrb[104].mxu1 %vm3151_vm5, %v5140_v60  ;;  %v4865_v60 = vadd.f32 %v8544_v5, %v8553_v45 }
 0x411   : > { %v5077_v21 = vpack.c.bf16 %v5054_v39, %v5053_v47  ;;  %v6192_v22 = vpop.f32.mrb[80].mxu1  ;;  %v5112_v47 = vpop.permute.xlu1 %5111 }
 0x412   : > { %v4999_v28 = vadd.f32 %v6192_v22, %v4838_v6  ;;  %v4990_v59 = vpop.f32.mrb[81].mxu1  ;;  %v5146_v62 = vsel %vm2154_vm2, %v5078_v17, %v5104_v24 }
 0x413   : > { %v5143_v26 = vsel %vm2154_vm2, %v5077_v21, %v5102_v35  ;;  %v4991_v52 = vadd.f32 %v4990_v59, %v4830_v20  ;;  %v6193_v36 = vpop.f32.mrb[82].mxu1  ;;  %v5114_v20 = vpop.permute.xlu0 %5113 }
 0x414   : > { %v5002_v10 = vadd.f32 %v6193_v36, %v4841_v55  ;;  %v4993_v7 = vpop.f32.mrb[83].mxu1  ;;  %6230 = vmatprep.mubr.msk.bf16.mxu1 %vm3151_vm5, %v5143_v26  ;;  %v5059_v23 = vmax.f32 %v4999_v28, 0.0  ;;  %v8653_v55 = vld [vmem:[%s8781_s6] ss:$0 sm:$0xff] }
 0x415   : > { %v4994_v19 = vadd.f32 %v4993_v7, %v4833_v51  ;;  %v5057_v14 = vmax.f32 %v4991_v52, 0.0  ;;  %v5116_v45 = vpop.permute.xlu1 %5115 }
 0x416   : > { %v5060_v58 = vmax.f32 %v5002_v10, 0.0 }
 0x417   : > { %v5058_v43 = vmax.f32 %v4994_v19, 0.0 }
 0x418   : > { %v5080_v8 = vpack.c.bf16 %v5060_v58, %v5059_v23  ;;  %6231 = vmatmul.mubr.msk.bf16.gmra.mrb[108].mxu1 %vm3151_vm5, %v5146_v62 }
 0x419   : > { %v5079_v50 = vpack.c.bf16 %v5058_v43, %v5057_v14  ;;  %v6196_v57 = vpop.f32.mrb[84].mxu1 }
 0x41a   : > { %v5015_v53 = vadd.f32 %v6196_v57, %v4854_v38  ;;  %v5006_v27 = vpop.f32.mrb[85].mxu1  ;;  %v5152_v29 = vsel %vm2154_vm2, %v5080_v8, %v5108_v56 }
 0x41b   : > { %v5149_v4 = vsel %vm2154_vm2, %v5079_v50, %v5106_v49  ;;  %v5007_v41 = vadd.f32 %v5006_v27, %v4846_v31  ;;  %v6197_v0 = vpop.f32.mrb[86].mxu1 }
 0x41c   : > { %v5018_v25 = vadd.f32 %v6197_v0, %v4857_v63  ;;  %v5009_v32 = vpop.f32.mrb[87].mxu1  ;;  %6234 = vmatprep.mubr.msk.bf16.mxu1 %vm3151_vm5, %v5149_v4  ;;  %v5063_v46 = vmax.f32 %v5015_v53, 0.0 }
 0x41d   : > { %v5010_v37 = vadd.f32 %v5009_v32, %v4849_v30  ;;  %v5061_v61 = vmax.f32 %v5007_v41, 0.0 }
 0x41e   : > { %v5064_v40 = vmax.f32 %v5018_v25, 0.0 }
 0x41f   : > { %v5062_v2 = vmax.f32 %v5010_v37, 0.0 }
 0x420   : > { %v5082_v1 = vpack.c.bf16 %v5064_v40, %v5063_v46  ;;  %6235 = vmatmul.mubr.msk.bf16.gmra.mrb[112].mxu1 %vm3151_vm5, %v5152_v29 }
 0x421   : > { %v5081_v16 = vpack.c.bf16 %v5062_v2, %v5061_v61  ;;  %v6200_v42 = vpop.f32.mrb[88].mxu1 }
 0x422   : > { %v5031_v13 = vadd.f32 %v6200_v42, %v4870_v33  ;;  %v5022_v9 = vpop.f32.mrb[89].mxu1  ;;  %v5158_v35 = vsel %vm2154_vm2, %v5082_v1, %v5112_v47 }
 0x423   : > { %v5155_v3 = vsel %vm2154_vm2, %v5081_v16, %v5110_v54  ;;  %v5023_v44 = vadd.f32 %v5022_v9, %v4862_v15  ;;  %v6201_v12 = vpop.f32.mrb[90].mxu1 }
 0x424   : > { %v5034_v48 = vadd.f32 %v6201_v12, %v4873_v11  ;;  %v5025_v39 = vpop.f32.mrb[91].mxu1  ;;  %6238 = vmatprep.mubr.msk.bf16.mxu1 %vm3151_vm5, %v5155_v3  ;;  %v5067_v18 = vmax.f32 %v5031_v13, 0.0 }
 0x425   : > { %v5026_v17 = vadd.f32 %v5025_v39, %v4865_v60  ;;  %v5065_v34 = vmax.f32 %v5023_v44, 0.0 }
 0x426   : > { %v5068_v6 = vmax.f32 %v5034_v48, 0.0 }
 0x427   : > { %v5066_v21 = vmax.f32 %v5026_v17, 0.0 }
 0x428   : > { %v5084_v22 = vpack.c.bf16 %v5068_v6, %v5067_v18  ;;  %6239 = vmatmul.mubr.msk.bf16.gmra.mrb[116].mxu1 %vm3151_vm5, %v5158_v35 }
 0x429   : > { %v5083_v28 = vpack.c.bf16 %v5066_v21, %v5065_v34 }
 0x42a   : > { %v5164_v59 = vsel %vm2154_vm2, %v5084_v22, %v5116_v45 }
 0x42b   : > { %v5161_v5 = vsel %vm2154_vm2, %v5083_v28, %v5114_v20 }
 0x42c   : > { %6242 = vmatprep.mubr.msk.bf16.mxu1 %vm3151_vm5, %v5161_v5 }
 0x430   : > { %6243 = vmatmul.mubr.msk.bf16.gmra.mrb[120].mxu1 %vm3151_vm5, %v5164_v59 }
 0x4cb   : > { %v6216_v26 = vpop.f32.mrb[92].mxu1 }
 0x4cc   : > { %v5295_v52 = vadd.f32 %v6216_v26, %v8653_v55  ;;  %v5286_v36 = vpop.f32.mrb[93].mxu1 }
 0x4cd   : > { %v5287_v51 = vadd.f32 %v8653_v55, %v5286_v36  ;;  %v6217_v24 = vpop.f32.mrb[94].mxu1 }
 0x4ce   : > { %v5415_v10 = vmax.f32 %v5295_v52, 0.0  ;;  %v5298_v7 = vadd.f32 %v6217_v24, %v8653_v55  ;;  %v5289_v19 = vpop.f32.mrb[95].mxu1 }
 0x4cf   : > { %v5413_v23 = vmax.f32 %v5287_v51, 0.0  ;;  %v5290_v58 = vadd.f32 %v8653_v55, %v5289_v19 }
 0x4d0   : > { %5447 = vst [vmem:[%s8661_s17 + $0x10] sm:$0xff] %v5415_v10  ;;  %v5416_v62 = vmax.f32 %v5298_v7, 0.0 }
 0x4d1   : > { %5445 = vst [vmem:[%s8661_s17] sm:$0xff] %v5413_v23  ;;  %v5414_v14 = vmax.f32 %v5290_v58, 0.0 }
 0x4d2   : > { %5448 = vst [vmem:[%s8661_s17 + $0x18] sm:$0xff] %v5416_v62 }
 0x4d3   : > { %5446 = vst [vmem:[%s8661_s17 + $0x8] sm:$0xff] %v5414_v14  ;;  %v6220_v43 = vpop.f32.mrb[96].mxu1 }
 0x4d4   : > { %v5311_v8 = vadd.f32 %v6220_v43, %v8653_v55  ;;  %v5302_v38 = vpop.f32.mrb[97].mxu1 }
 0x4d5   : > { %v5303_v49 = vadd.f32 %v8653_v55, %v5302_v38  ;;  %v6221_v50 = vpop.f32.mrb[98].mxu1 }
 0x4d6   : > { %v5419_v57 = vmax.f32 %v5311_v8, 0.0  ;;  %v5314_v31 = vadd.f32 %v6221_v50, %v8653_v55  ;;  %v5305_v53 = vpop.f32.mrb[99].mxu1 }
 0x4d7   : > { %v5417_v27 = vmax.f32 %v5303_v49, 0.0  ;;  %v5306_v63 = vadd.f32 %v8653_v55, %v5305_v53 }
 0x4d8   : > { %5451 = vst [vmem:[%s8661_s17 + $0x30] sm:$0xff] %v5419_v57  ;;  %v5420_v4 = vmax.f32 %v5314_v31, 0.0 }
 0x4d9   : > { %5449 = vst [vmem:[%s8661_s17 + $0x20] sm:$0xff] %v5417_v27  ;;  %v5418_v41 = vmax.f32 %v5306_v63, 0.0 }
 0x4da   : > { %5452 = vst [vmem:[%s8661_s17 + $0x38] sm:$0xff] %v5420_v4 }
 0x4db   : > { %5450 = vst [vmem:[%s8661_s17 + $0x28] sm:$0xff] %v5418_v41  ;;  %v6224_v0 = vpop.f32.mrb[100].mxu1 }
 0x4dc   : > { %v5327_v30 = vadd.f32 %v6224_v0, %v8653_v55  ;;  %v5318_v56 = vpop.f32.mrb[101].mxu1 }
 0x4dd   : > { %v5319_v25 = vadd.f32 %v8653_v55, %v5318_v56  ;;  %v6225_v32 = vpop.f32.mrb[102].mxu1 }
 0x4de   : > { %v5423_v37 = vmax.f32 %v5327_v30, 0.0  ;;  %v5330_v46 = vadd.f32 %v6225_v32, %v8653_v55  ;;  %v5321_v40 = vpop.f32.mrb[103].mxu1 }
 0x4df   : > { %v5421_v29 = vmax.f32 %v5319_v25, 0.0  ;;  %v5322_v61 = vadd.f32 %v8653_v55, %v5321_v40 }
 0x4e0   : > { %5455 = vst [vmem:[%s8661_s17 + $0x50] sm:$0xff] %v5423_v37  ;;  %v5424_v2 = vmax.f32 %v5330_v46, 0.0 }
 0x4e1   : > { %5453 = vst [vmem:[%s8661_s17 + $0x40] sm:$0xff] %v5421_v29  ;;  %v5422_v1 = vmax.f32 %v5322_v61, 0.0 }
 0x4e2   : > { %5456 = vst [vmem:[%s8661_s17 + $0x58] sm:$0xff] %v5424_v2 }
 0x4e3   : > { %5454 = vst [vmem:[%s8661_s17 + $0x48] sm:$0xff] %v5422_v1  ;;  %v6228_v33 = vpop.f32.mrb[104].mxu1 }
 0x4e4   : > { %v5343_v54 = vadd.f32 %v6228_v33, %v8653_v55  ;;  %v5334_v16 = vpop.f32.mrb[105].mxu1 }
 0x4e5   : > { %v5335_v42 = vadd.f32 %v8653_v55, %v5334_v16  ;;  %v6229_v15 = vpop.f32.mrb[106].mxu1 }
 0x4e6   : > { %v5427_v13 = vmax.f32 %v5343_v54, 0.0  ;;  %v5346_v9 = vadd.f32 %v6229_v15, %v8653_v55  ;;  %v5337_v11 = vpop.f32.mrb[107].mxu1 }
 0x4e7   : > { %v5425_v3 = vmax.f32 %v5335_v42, 0.0  ;;  %v5338_v44 = vadd.f32 %v8653_v55, %v5337_v11 }
 0x4e8   : > { %5459 = vst [vmem:[%s8661_s17 + $0x70] sm:$0xff] %v5427_v13  ;;  %v5428_v12 = vmax.f32 %v5346_v9, 0.0 }
 0x4e9   : > { %5457 = vst [vmem:[%s8661_s17 + $0x60] sm:$0xff] %v5425_v3  ;;  %v5426_v60 = vmax.f32 %v5338_v44, 0.0 }
 0x4ea   : > { %5460 = vst [vmem:[%s8661_s17 + $0x78] sm:$0xff] %v5428_v12 }
 0x4eb   : > { %5458 = vst [vmem:[%s8661_s17 + $0x68] sm:$0xff] %v5426_v60  ;;  %v6232_v47 = vpop.f32.mrb[108].mxu1 }
 0x4ec   : > { %v5359_v48 = vadd.f32 %v6232_v47, %v8653_v55  ;;  %v5350_v39 = vpop.f32.mrb[109].mxu1 }
 0x4ed   : > { %v5351_v17 = vadd.f32 %v8653_v55, %v5350_v39  ;;  %v6233_v18 = vpop.f32.mrb[110].mxu1 }
 0x4ee   : > { %v5431_v6 = vmax.f32 %v5359_v48, 0.0  ;;  %v5362_v35 = vadd.f32 %v6233_v18, %v8653_v55  ;;  %v5353_v34 = vpop.f32.mrb[111].mxu1 }
 0x4ef   : > { %v5429_v21 = vmax.f32 %v5351_v17, 0.0  ;;  %v5354_v22 = vadd.f32 %v8653_v55, %v5353_v34 }
 0x4f0   : > { %5463 = vst [vmem:[%s8661_s17 + $0x90] sm:$0xff] %v5431_v6  ;;  %v5432_v20 = vmax.f32 %v5362_v35, 0.0 }
 0x4f1   : > { %5461 = vst [vmem:[%s8661_s17 + $0x80] sm:$0xff] %v5429_v21  ;;  %v5430_v28 = vmax.f32 %v5354_v22, 0.0 }
 0x4f2   : > { %5464 = vst [vmem:[%s8661_s17 + $0x98] sm:$0xff] %v5432_v20 }
 0x4f3   : > { %5462 = vst [vmem:[%s8661_s17 + $0x88] sm:$0xff] %v5430_v28  ;;  %v6236_v5 = vpop.f32.mrb[112].mxu1 }
 0x4f4   : > { %v5375_v45 = vadd.f32 %v6236_v5, %v8653_v55  ;;  %v5366_v59 = vpop.f32.mrb[113].mxu1 }
 0x4f5   : > { %v5367_v26 = vadd.f32 %v8653_v55, %v5366_v59  ;;  %v6237_v52 = vpop.f32.mrb[114].mxu1 }
 0x4f6   : > { %v5435_v36 = vmax.f32 %v5375_v45, 0.0  ;;  %v5378_v51 = vadd.f32 %v6237_v52, %v8653_v55  ;;  %v5369_v24 = vpop.f32.mrb[115].mxu1 }
 0x4f7   : > { %v5433_v10 = vmax.f32 %v5367_v26, 0.0  ;;  %v5370_v7 = vadd.f32 %v8653_v55, %v5369_v24 }
 0x4f8   : > { %5467 = vst [vmem:[%s8661_s17 + $0xb0] sm:$0xff] %v5435_v36  ;;  %v5436_v19 = vmax.f32 %v5378_v51, 0.0 }
 0x4f9   : > { %5465 = vst [vmem:[%s8661_s17 + $0xa0] sm:$0xff] %v5433_v10  ;;  %v5434_v23 = vmax.f32 %v5370_v7, 0.0 }
 0x4fa   : > { %5468 = vst [vmem:[%s8661_s17 + $0xb8] sm:$0xff] %v5436_v19 }
 0x4fb   : > { %5466 = vst [vmem:[%s8661_s17 + $0xa8] sm:$0xff] %v5434_v23  ;;  %v6240_v58 = vpop.f32.mrb[116].mxu1 }
 0x4fc   : > { %v5391_v62 = vadd.f32 %v6240_v58, %v8653_v55  ;;  %v5382_v14 = vpop.f32.mrb[117].mxu1 }
 0x4fd   : > { %v5383_v43 = vadd.f32 %v8653_v55, %v5382_v14  ;;  %v6241_v8 = vpop.f32.mrb[118].mxu1 }
 0x4fe   : > { %v5439_v38 = vmax.f32 %v5391_v62, 0.0  ;;  %v5394_v49 = vadd.f32 %v6241_v8, %v8653_v55  ;;  %v5385_v50 = vpop.f32.mrb[119].mxu1 }
 0x4ff   : > { %v5437_v57 = vmax.f32 %v5383_v43, 0.0  ;;  %v5386_v31 = vadd.f32 %v8653_v55, %v5385_v50 }
 0x500   : > { %5471 = vst [vmem:[%s8661_s17 + $0xd0] sm:$0xff] %v5439_v38  ;;  %v5440_v53 = vmax.f32 %v5394_v49, 0.0 }
 0x501   : > { %5469 = vst [vmem:[%s8661_s17 + $0xc0] sm:$0xff] %v5437_v57  ;;  %v5438_v27 = vmax.f32 %v5386_v31, 0.0 }
 0x502   : > { %5472 = vst [vmem:[%s8661_s17 + $0xd8] sm:$0xff] %v5440_v53 }
 0x503   : > { %5470 = vst [vmem:[%s8661_s17 + $0xc8] sm:$0xff] %v5438_v27  ;;  %v6244_v63 = vpop.f32.mrb[120].mxu1 }
 0x504   : > { %v5407_v4 = vadd.f32 %v6244_v63, %v8653_v55  ;;  %v5398_v41 = vpop.f32.mrb[121].mxu1 }
 0x505   : > { %v5399_v0 = vadd.f32 %v8653_v55, %v5398_v41  ;;  %v6245_v30 = vpop.f32.mrb[122].mxu1 }
 0x506   : > { %v5443_v56 = vmax.f32 %v5407_v4, 0.0  ;;  %v5410_v25 = vadd.f32 %v6245_v30, %v8653_v55  ;;  %v5401_v32 = vpop.f32.mrb[123].mxu1 }
 0x507   : > { %v5441_v37 = vmax.f32 %v5399_v0, 0.0  ;;  %v5402_v46 = vadd.f32 %v8653_v55, %v5401_v32 }
 0x508   : > { %5475 = vst [vmem:[%s8661_s17 + $0xf0] sm:$0xff] %v5443_v56  ;;  %v5444_v40 = vmax.f32 %v5410_v25, 0.0 }
 0x509   : > { %5473 = vst [vmem:[%s8661_s17 + $0xe0] sm:$0xff] %v5441_v37  ;;  %v5442_v29 = vmax.f32 %v5402_v46, 0.0 }
 0x50a   : > { %5476 = vst [vmem:[%s8661_s17 + $0xf8] sm:$0xff] %v5444_v40 }
 0x50b   : > { %5474 = vst [vmem:[%s8661_s17 + $0xe8] sm:$0xff] %v5442_v29 }
 0x50c   : > { %6491 = shalt.err (!%p6488_p3)
}
 0x50d   : > { %s6492_s23 = scalar_lea.hbm %s8725_s22, 4096  ;;  %s6496_s16 = scalar_lea.hbm %s8782_s7, 8192 }
 0x50e   : > { %p6493_p4 = scmp.ne.s32.totalorder %s8725_s22, %s6492_s23  ;;  %p6497_p9 = scmp.lt.u32.totalorder %s8725_s22, %s8782_s7 }
 0x50f   : > { %p6498_p10 = scmp.lt.u32.totalorder %s6496_s16, %s6492_s23  ;;  %p6500_p12 = scmp.lt.u32.totalorder %s6492_s23, %s8725_s22 }
 0x510   : > { %p6494_p7 = pnand %p6493_p4, %p6627_p5 }
 0x511   : > { %p6499_p11 = por %p6498_p10, %p6497_p9 }
 0x512   : > { %p6495_p8 = pneg %p6494_p7 }
 0x513   : > { %p6501_p13 = por %p6500_p12, %p6499_p11 }
 0x515   : > { %p6502_p0 = pnand %p6501_p13, %p6495_p8 }
 0x517   : > { %6505 = shalt.err (!%p6502_p0)
}
 0x518   : > { %s6547_s20 = smov 128   ;;  %s6548_s21 = smov 8  }
 0x519   : > { %6262 = dma.vmem_to_hbm [thread:$0]  (%p6627_p5), %s8727_s19, 4096, %s8725_s22, %s8734_s28, %s6547_s20, %s6547_s20, %s6548_s21  }
 0x51a PF: > { %p6268_p1 = scmp.ge.s32.totalorder %s6540_s27, 2  ;;  %s5507_s29 = sand.u32 1, %s6528_s24  }
 0x51b   : > { %s5508_s8 = scalar_lea.sflag [#allocation5], %s5507_s29 }
 0x51c   : > { %p6265_p2 = pnand %p6268_p1, %p6631_p6 }
 0x51e   : > { %6523 = dma.done.wait (!%p6265_p2), %s5508_s8, 4096  }
 0x51f   : > { %6525 = vsyncadd (!%p6265_p2), %s5508_s8, 4294963200  ;;  %p17_p3 = scmp.ge.s32.totalorder %s6614_s30, 4   ;;  %s8801_s24 = smov %s6532_s25 }
 0x520   : > { %s8802_s25 = smov %s6536_s26  ;;  %s8803_s26 = smov %s6625_s10 }
 0x521   : > { %s8804_s27 = smov %s6614_s30  ;;  %19 = sbr.rel (!%p17_p3) target bundleno = 3 (0x3), region = 89 }
 0x528   :  { %5513 = vsyncpa [#allocation5], 1 }
 0x529   :  { %5515 = vsyncpa [#allocation5 + $0x1], 1 }

</bundles_post_ra>
